<compile_context>
chip_gen: v7x
topology: tpu7x:2x2x1
jax: 0.10.0
libtpu: 0.0.40
codegen_flags: <defaults>
</compile_context>

<pallas_src>
import functools

import jax
import jax.numpy as jnp
from jax.experimental import pallas as pl
from jax.experimental.pallas import tpu as pltpu

BN_EPS = 1e-5
LANE = 128
MAX_TILE_M = 512   # rows per tile; small enough to double-buffer under v7x VMEM
MAX_TILE_K = 512   # im2col-K chunk per MXU pass


def _round_up(n, m):
    return (n + m - 1) // m * m


def _tile(n, max_tile, align):
    """Pick a tile size <= max_tile (aligned) and the padded extent it implies."""
    nt = -(-n // max_tile)                    # number of tiles
    t = _round_up(-(-n // nt), align)         # per-tile size, aligned
    return t, t * nt


# ---------------------------------------------------------------------------
# Pallas kernels
# ---------------------------------------------------------------------------
def conv_bn_stats_kernel(p_ref, w_ref, g_ref, b_ref,
                         y_ref, scale_ref, shift_ref,
                         acc_ref, sum_ref, sq_ref, *, true_m):
    """Pass 1: conv-as-GEMM (bf16 in, f32 scratch accumulation) + BN stats.

    Grid = (M tiles, K tiles); acc_ref accumulates the MXU partials across K,
    the conv output tile is stored once per M tile. sum/sq scratches persist
    across the whole grid; folded BN scale/shift are written on the very last
    grid step.
    """
    m = pl.program_id(0)
    k = pl.program_id(1)
    nm = pl.num_programs(0)
    nk = pl.num_programs(1)

    @pl.when((m == 0) & (k == 0))
    def _():
        sum_ref[...] = jnp.zeros_like(sum_ref)
        sq_ref[...] = jnp.zeros_like(sq_ref)

    @pl.when(k == 0)
    def _():
        acc_ref[...] = jnp.zeros_like(acc_ref)

    acc_ref[...] += jnp.dot(p_ref[...], w_ref[...],
                            preferred_element_type=jnp.float32)

    @pl.when(k == nk - 1)
    def _():
        y = acc_ref[...]
        y_ref[...] = y.astype(y_ref.dtype)
        sum_ref[...] += jnp.sum(y, axis=0, keepdims=True)
        sq_ref[...] += jnp.sum(y * y, axis=0, keepdims=True)

    @pl.when((m == nm - 1) & (k == nk - 1))
    def _():
        inv_m = 1.0 / true_m                      # true rows, not padded rows
        mean = sum_ref[...] * inv_m
        var = jnp.maximum(sq_ref[...] * inv_m - mean * mean, 0.0)
        scale = g_ref[...] * jax.lax.rsqrt(var + BN_EPS)
        scale_ref[...] = scale
        shift_ref[...] = b_ref[...] - mean * scale


def bn_apply_kernel(y_ref, scale_ref, shift_ref, o_ref, *, do_relu):
    y = y_ref[...].astype(jnp.float32) * scale_ref[...] + shift_ref[...]
    if do_relu:
        y = jnp.maximum(y, 0.0)
    o_ref[...] = y.astype(o_ref.dtype)


def bn_join_proj_kernel(y2_ref, sc2_ref, sh2_ref, ys_ref, scs_ref, shs_ref, o_ref):
    """Fused: BN-apply(conv2) + BN-apply(shortcut conv) + add + ReLU."""
    r = y2_ref[...] * sc2_ref[...] + sh2_ref[...]
    s = ys_ref[...] * scs_ref[...] + shs_ref[...]
    o_ref[...] = jnp.maximum(r + s, 0.0)


def bn_join_identity_kernel(y2_ref, sc2_ref, sh2_ref, x_ref, o_ref):
    """Fused: BN-apply(conv2) + identity-shortcut add + ReLU."""
    r = y2_ref[...] * sc2_ref[...] + sh2_ref[...]
    o_ref[...] = jnp.maximum(r + x_ref[...], 0.0)


# ---------------------------------------------------------------------------
# Glue: im2col, weight packing, pallas_call wrappers
# ---------------------------------------------------------------------------
def _im2col_nhwc(x, ksz, stride, padding):
    N, H, W, C = x.shape
    if padding:
        x = jnp.pad(x, ((0, 0), (padding, padding), (padding, padding), (0, 0)))
    Ho = (H + 2 * padding - ksz) // stride + 1
    Wo = (W + 2 * padding - ksz) // stride + 1
    cols = []
    for i in range(ksz):
        for j in range(ksz):
            cols.append(x[:, i:i + stride * Ho:stride, j:j + stride * Wo:stride, :])
    p = jnp.concatenate(cols, axis=-1)          # tap-major, channel-minor
    return p.reshape(N * Ho * Wo, ksz * ksz * C), Ho, Wo


def _pack_weight(w_oihw, kp, cp):
    """[Cout,Cin,kh,kw] -> bf16 [Kp, Cp] matching im2col (tap-major, ch-minor)."""
    Cout, Cin, kh, kw = w_oihw.shape
    w = jnp.transpose(w_oihw, (2, 3, 1, 0))     # [kh, kw, Cin, Cout]
    w = w.reshape(kh * kw * Cin, Cout)
    w = jnp.pad(w, ((0, kp - kh * kw * Cin), (0, cp - Cout)))
    return w.astype(jnp.bfloat16)


def conv_bn_stats(x_nhwc, w_oihw, gamma, beta, *, stride, padding, y_dtype):
    """Tiled conv(bias=False) + training-BN stats.

    Returns (y [Mp,Cp] conv output, scale [1,Cp], shift [1,Cp], geometry).
    """
    N, H, W, Cin = x_nhwc.shape
    Cout = w_oihw.shape[0]
    ksz = w_oihw.shape[2]

    patches, Ho, Wo = _im2col_nhwc(x_nhwc.astype(jnp.bfloat16), ksz, stride, padding)
    M, K = patches.shape

    tm, Mp = _tile(M, MAX_TILE_M, 16)           # 16-aligned sublanes (bf16 tiles)
    tk, Kp = _tile(K, MAX_TILE_K, LANE)
    Cp = _round_up(Cout, LANE)

    patches = jnp.pad(patches, ((0, Mp - M), (0, Kp - K)))
    w = _pack_weight(w_oihw, Kp, Cp)
    g = jnp.pad(gamma.astype(jnp.float32).reshape(1, Cout), ((0, 0), (0, Cp - Cout)))
    b = jnp.pad(beta.astype(jnp.float32).reshape(1, Cout), ((0, 0), (0, Cp - Cout)))

    nm, nk = Mp // tm, Kp // tk

    y, scale, shift = pl.pallas_call(
        functools.partial(conv_bn_stats_kernel, true_m=float(M)),
        out_shape=(jax.ShapeDtypeStruct((Mp, Cp), y_dtype),
                   jax.ShapeDtypeStruct((1, Cp), jnp.float32),
                   jax.ShapeDtypeStruct((1, Cp), jnp.float32)),
        grid_spec=pltpu.PrefetchScalarGridSpec(
            num_scalar_prefetch=0,
            grid=(nm, nk),
            in_specs=[
                pl.BlockSpec((tm, tk), lambda m, k: (m, k)),
                pl.BlockSpec((tk, Cp), lambda m, k: (k, 0)),
                pl.BlockSpec((1, Cp), lambda m, k: (0, 0)),
                pl.BlockSpec((1, Cp), lambda m, k: (0, 0)),
            ],
            out_specs=(
                pl.BlockSpec((tm, Cp), lambda m, k: (m, 0)),
                pl.BlockSpec((1, Cp), lambda m, k: (0, 0)),
                pl.BlockSpec((1, Cp), lambda m, k: (0, 0)),
            ),
            scratch_shapes=[
                pltpu.VMEM((tm, Cp), jnp.float32),   # matmul accumulator
                pltpu.VMEM((1, Cp), jnp.float32),    # per-channel sum
                pltpu.VMEM((1, Cp), jnp.float32),    # per-channel sum of squares
            ],
        ),
        # M carries the cross-tile BN reduction via the scratch accumulators,
        # so it must stay sequential; K is the matmul reduction.
        compiler_params=pltpu.CompilerParams(
            dimension_semantics=("arbitrary", "arbitrary")),
    )(patches, w, g, b)

    return y, scale, shift, (M, Ho, Wo, tm)


def bn_apply(y, scale, shift, *, tm, relu, out_dtype):
    Mp, Cp = y.shape
    return pl.pallas_call(
        functools.partial(bn_apply_kernel, do_relu=relu),
        out_shape=jax.ShapeDtypeStruct((Mp, Cp), out_dtype),
        grid_spec=pltpu.PrefetchScalarGridSpec(
            num_scalar_prefetch=0,
            grid=(Mp // tm,),
            in_specs=[
                pl.BlockSpec((tm, Cp), lambda m: (m, 0)),
                pl.BlockSpec((1, Cp), lambda m: (0, 0)),
                pl.BlockSpec((1, Cp), lambda m: (0, 0)),
            ],
            out_specs=pl.BlockSpec((tm, Cp), lambda m: (m, 0)),
        ),
        compiler_params=pltpu.CompilerParams(dimension_semantics=("parallel",)),
    )(y, scale, shift)


def bn_join_proj(y2, sc2, sh2, ys, scs, shs, *, tm):
    Mp, Cp = y2.shape
    return pl.pallas_call(
        bn_join_proj_kernel,
        out_shape=jax.ShapeDtypeStruct((Mp, Cp), jnp.float32),
        grid_spec=pltpu.PrefetchScalarGridSpec(
            num_scalar_prefetch=0,
            grid=(Mp // tm,),
            in_specs=[
                pl.BlockSpec((tm, Cp), lambda m: (m, 0)),
                pl.BlockSpec((1, Cp), lambda m: (0, 0)),
                pl.BlockSpec((1, Cp), lambda m: (0, 0)),
                pl.BlockSpec((tm, Cp), lambda m: (m, 0)),
                pl.BlockSpec((1, Cp), lambda m: (0, 0)),
                pl.BlockSpec((1, Cp), lambda m: (0, 0)),
            ],
            out_specs=pl.BlockSpec((tm, Cp), lambda m: (m, 0)),
        ),
        compiler_params=pltpu.CompilerParams(dimension_semantics=("parallel",)),
    )(y2, sc2, sh2, ys, scs, shs)


def bn_join_identity(y2, sc2, sh2, x_slab, *, tm):
    Mp, Cp = y2.shape
    return pl.pallas_call(
        bn_join_identity_kernel,
        out_shape=jax.ShapeDtypeStruct((Mp, Cp), jnp.float32),
        grid_spec=pltpu.PrefetchScalarGridSpec(
            num_scalar_prefetch=0,
            grid=(Mp // tm,),
            in_specs=[
                pl.BlockSpec((tm, Cp), lambda m: (m, 0)),
                pl.BlockSpec((1, Cp), lambda m: (0, 0)),
                pl.BlockSpec((1, Cp), lambda m: (0, 0)),
                pl.BlockSpec((tm, Cp), lambda m: (m, 0)),
            ],
            out_specs=pl.BlockSpec((tm, Cp), lambda m: (m, 0)),
        ),
        compiler_params=pltpu.CompilerParams(dimension_semantics=("parallel",)),
    )(y2, sc2, sh2, x_slab)


# ---------------------------------------------------------------------------
# Block forward
# ---------------------------------------------------------------------------
def block_forward(x_nchw, params, *, stride):
    """Block.forward: relu(residual(x) + shortcut(x)). Input/output NCHW."""
    x = jnp.transpose(x_nchw, (0, 2, 3, 1)).astype(jnp.float32)  # NCHW -> NHWC
    N, H, W, Cin = x.shape
    planes = params["w1"].shape[0]
    Cout = params["w2"].shape[0]

    # residual unit 1: conv3x3(stride) -> BN -> ReLU  (bf16 intermediate)
    y1, sc1, sh1, (M, Ho, Wo, tm) = conv_bn_stats(
        x, params["w1"], params["g1"], params["b1"],
        stride=stride, padding=1, y_dtype=jnp.bfloat16)
    r1 = bn_apply(y1, sc1, sh1, tm=tm, relu=True, out_dtype=jnp.bfloat16)
    # channel slice fuses into the next im2col's gather; keeps conv2's K small
    r1 = r1[:M, :planes].reshape(N, Ho, Wo, planes)

    # residual unit 2: conv3x3(1) -> BN (affine deferred into the fused join)
    y2, sc2, sh2, (M2, Ho2, Wo2, tm2) = conv_bn_stats(
        r1, params["w2"], params["g2"], params["b2"],
        stride=1, padding=1, y_dtype=jnp.float32)
    Mp2, Cp_out = y2.shape

    if params["ws"] is not None:
        # projection shortcut: conv1x1(stride) -> BN, affine fused into the join
        ys, scs, shs, _ = conv_bn_stats(
            x, params["ws"], params["gs"], params["bs"],
            stride=stride, padding=0, y_dtype=jnp.float32)
        assert ys.shape == y2.shape
        out = bn_join_proj(y2, sc2, sh2, ys, scs, shs, tm=tm2)
    else:
        # identity shortcut (stride == 1, Cin == Cout)
        xs = x.reshape(N * H * W, Cin)
        xs = jnp.pad(xs, ((0, Mp2 - xs.shape[0]), (0, Cp_out - Cin)))
        out = bn_join_identity(y2, sc2, sh2, xs, tm=tm2)

    out = out[:M2, :Cout].reshape(N, Ho2, Wo2, Cout)
    return jnp.transpose(out, (0, 3, 1, 2))   # NHWC -> NCHW


def init_block_params(key, in_planes, planes, expansion, stride):
    ks = jax.random.split(key, 9)
    exp_planes = planes * expansion
    params = {
        "w1": 0.1 * jax.random.normal(ks[0], (planes, in_planes, 3, 3), jnp.float32),
        "g1": 1.0 + 0.1 * jax.random.normal(ks[1], (planes,), jnp.float32),
        "b1": 0.1 * jax.random.normal(ks[2], (planes,), jnp.float32),
        "w2": 0.1 * jax.random.normal(ks[3], (exp_planes, planes, 3, 3), jnp.float32),
        "g2": 1.0 + 0.1 * jax.random.normal(ks[4], (exp_planes,), jnp.float32),
        "b2": 0.1 * jax.random.normal(ks[5], (exp_planes,), jnp.float32),
    }
    if stride != 1 or in_planes != exp_planes:
        params["ws"] = 0.1 * jax.random.normal(ks[6], (exp_planes, in_planes, 1, 1), jnp.float32)
        params["gs"] = 1.0 + 0.1 * jax.random.normal(ks[7], (exp_planes,), jnp.float32)
        params["bs"] = 0.1 * jax.random.normal(ks[8], (exp_planes,), jnp.float32)
    else:
        params["ws"] = None
    return params


# ---------------------------------------------------------------------------
# Pure-JAX reference (bf16 conv inputs to mirror the kernel's MXU precision)
# ---------------------------------------------------------------------------
def _ref_conv(x_nhwc, w_oihw, stride, padding):
    w_hwio = jnp.transpose(w_oihw, (2, 3, 1, 0)).astype(jnp.bfloat16)
    return jax.lax.conv_general_dilated(
        x_nhwc.astype(jnp.bfloat16), w_hwio, (stride, stride),
        [(padding, padding), (padding, padding)],
        dimension_numbers=("NHWC", "HWIO", "NHWC"),
        preferred_element_type=jnp.float32)


def _ref_bn(y, g, b):
    mean = jnp.mean(y, axis=(0, 1, 2), keepdims=True)
    var = jnp.mean(jnp.square(y - mean), axis=(0, 1, 2), keepdims=True)
    return (y - mean) * jax.lax.rsqrt(var + BN_EPS) * g + b


def _ref_block_unit(x, w, g, b, stride, padding, relu):
    y = _ref_bn(_ref_conv(x, w, stride, padding), g, b)
    return jnp.maximum(y, 0.0) if relu else y


def ref_block_forward(x_nchw, params, *, stride):
    x = jnp.transpose(x_nchw, (0, 2, 3, 1)).astype(jnp.float32)
    r = _ref_block_unit(x, params["w1"], params["g1"], params["b1"], stride, 1, True)
    r = _ref_block_unit(r, params["w2"], params["g2"], params["b2"], 1, 1, False)
    if params["ws"] is not None:
        s = _ref_block_unit(x, params["ws"], params["gs"], params["bs"], stride, 0, False)
    else:
        s = x
    return jnp.transpose(jnp.maximum(r + s, 0.0), (0, 3, 1, 2))


if __name__ == "__main__":
    key = jax.random.PRNGKey(0)
    k_x, k_p, k_x2, k_p2 = jax.random.split(key, 4)

    # Test 1: projection shortcut (in_planes != planes*expansion).
    N, Cin, H, W = 2, 4, 16, 16
    planes, expansion, stride = 8, 1, 1
    x = jax.random.normal(k_x, (N, Cin, H, W), jnp.float32)
    params = init_block_params(k_p, Cin, planes, expansion, stride)

    fwd = jax.jit(functools.partial(block_forward, stride=stride))
    out = jax.block_until_ready(fwd(x, params))
    ref = ref_block_forward(x, params, stride=stride)
    assert out.shape == (N, planes * expansion, H, W)
    assert jnp.allclose(out, ref, atol=2e-2, rtol=2e-2), "projection-shortcut mismatch"

    # Test 2: identity shortcut (stride == 1, in_planes == planes*expansion).
    Cin2 = 8
    x2 = jax.random.normal(k_x2, (N, Cin2, H, W), jnp.float32)
    params2 = init_block_params(k_p2, Cin2, planes, expansion, 1)
    out2 = jax.block_until_ready(fwd(x2, params2))
    ref2 = ref_block_forward(x2, params2, stride=1)
    assert out2.shape == (N, planes * expansion, H, W)
    assert jnp.allclose(out2, ref2, atol=2e-2, rtol=2e-2), "identity-shortcut mismatch"

    print("KERNEL_OK")
</pallas_src>

<mosaic_0001>
module attributes {stable_mosaic.version = 11 : i64} {
  func.func @conv_bn_stats_kernel(%arg0: i32, %arg1: i32, %arg2: memref<512x128xbf16, #tpu.memory_space<vmem>>, %arg3: memref<128x128xbf16, #tpu.memory_space<vmem>>, %arg4: memref<1x128xf32, #tpu.memory_space<vmem>>, %arg5: memref<1x128xf32, #tpu.memory_space<vmem>>, %arg6: memref<512x128xbf16, #tpu.memory_space<vmem>>, %arg7: memref<1x128xf32, #tpu.memory_space<vmem>>, %arg8: memref<1x128xf32, #tpu.memory_space<vmem>>, %arg9: memref<512x128xf32, #tpu.memory_space<vmem>>, %arg10: memref<1x128xf32, #tpu.memory_space<vmem>>, %arg11: memref<1x128xf32, #tpu.memory_space<vmem>>) attributes {dimension_semantics = [#tpu.dimension_semantics<arbitrary>, #tpu.dimension_semantics<arbitrary>], iteration_bounds = array<i64: 1, 1>, scalar_prefetch = 0 : i64, scratch_operands = 3 : i64, tpu.core_type = #tpu.core_type<tc>, window_params = [{transform_indices = @transform_0, window_bounds = array<i64: 512, 128>}, {transform_indices = @transform_1, window_bounds = array<i64: 128, 128>}, {pipeline_mode = #tpu.pipeline_mode<synchronous>, transform_indices = @transform_2, window_bounds = array<i64: 1, 128>}, {pipeline_mode = #tpu.pipeline_mode<synchronous>, transform_indices = @transform_3, window_bounds = array<i64: 1, 128>}, {transform_indices = @transform_4, window_bounds = array<i64: 512, 128>}, {pipeline_mode = #tpu.pipeline_mode<synchronous>, transform_indices = @transform_5, window_bounds = array<i64: 1, 128>}, {pipeline_mode = #tpu.pipeline_mode<synchronous>, transform_indices = @transform_6, window_bounds = array<i64: 1, 128>}]} {
    %c0_i32 = arith.constant 0 : i32
    %0 = arith.cmpi eq, %arg0, %c0_i32 : i32
    %c0_i32_0 = arith.constant 0 : i32
    %1 = arith.cmpi eq, %arg1, %c0_i32_0 : i32
    %2 = arith.andi %0, %1 : i1
    %3 = arith.extui %2 : i1 to i32
    %c0_i32_1 = arith.constant 0 : i32
    %4 = arith.cmpi ne, %3, %c0_i32_1 : i32
    scf.if %4 {
      %cst_16 = arith.constant 0.000000e+00 : f32
      %22 = vector.broadcast %cst_16 : f32 to vector<1x128xf32>
      %c0_17 = arith.constant 0 : index
      %c0_18 = arith.constant 0 : index
      %23 = vector.load %arg10[%c0_17, %c0_18] : memref<1x128xf32, #tpu.memory_space<vmem>>, vector<1x128xf32>
      tpu.vector_store %arg10[%c0_17, %c0_18], %22 {strides = array<i32>} : memref<1x128xf32, #tpu.memory_space<vmem>>, vector<1x128xf32>,
      %cst_19 = arith.constant 0.000000e+00 : f32
      %24 = vector.broadcast %cst_19 : f32 to vector<1x128xf32>
      %c0_20 = arith.constant 0 : index
      %c0_21 = arith.constant 0 : index
      %25 = vector.load %arg11[%c0_20, %c0_21] : memref<1x128xf32, #tpu.memory_space<vmem>>, vector<1x128xf32>
      tpu.vector_store %arg11[%c0_20, %c0_21], %24 {strides = array<i32>} : memref<1x128xf32, #tpu.memory_space<vmem>>, vector<1x128xf32>,
    } else {
    }
    %c0_i32_2 = arith.constant 0 : i32
    %5 = arith.cmpi eq, %arg1, %c0_i32_2 : i32
    %6 = arith.extui %5 : i1 to i32
    %c0_i32_3 = arith.constant 0 : i32
    %7 = arith.cmpi ne, %6, %c0_i32_3 : i32
    scf.if %7 {
      %cst_16 = arith.constant 0.000000e+00 : f32
      %22 = vector.broadcast %cst_16 : f32 to vector<512x128xf32>
      %c0_17 = arith.constant 0 : index
      %c0_18 = arith.constant 0 : index
      %23 = vector.load %arg9[%c0_17, %c0_18] : memref<512x128xf32, #tpu.memory_space<vmem>>, vector<512x128xf32>
      tpu.vector_store %arg9[%c0_17, %c0_18], %22 {strides = array<i32>} : memref<512x128xf32, #tpu.memory_space<vmem>>, vector<512x128xf32>,
    } else {
    }
    %c0 = arith.constant 0 : index
    %c0_4 = arith.constant 0 : index
    %8 = vector.load %arg9[%c0, %c0_4] : memref<512x128xf32, #tpu.memory_space<vmem>>, vector<512x128xf32>
    %c0_5 = arith.constant 0 : index
    %c0_6 = arith.constant 0 : index
    %9 = vector.load %arg2[%c0_5, %c0_6] : memref<512x128xbf16, #tpu.memory_space<vmem>>, vector<512x128xbf16>
    %c0_7 = arith.constant 0 : index
    %c0_8 = arith.constant 0 : index
    %10 = vector.load %arg3[%c0_7, %c0_8] : memref<128x128xbf16, #tpu.memory_space<vmem>>, vector<128x128xbf16>
    %cst = arith.constant dense<0.000000e+00> : vector<512x128xf32>
    %11 = tpu.matmul %9, %10, %cst {dimension_numbers = #tpu.dot_dimension_numbers<[1], [0], [0], [1], [0, 0, 1, 1], [], []>} : vector<512x128xbf16>, vector<128x128xbf16>, vector<512x128xf32> -> vector<512x128xf32>
    %12 = arith.addf %8, %11 : vector<512x128xf32>
    %c0_9 = arith.constant 0 : index
    %c0_10 = arith.constant 0 : index
    %13 = vector.load %arg9[%c0_9, %c0_10] : memref<512x128xf32, #tpu.memory_space<vmem>>, vector<512x128xf32>
    tpu.vector_store %arg9[%c0_9, %c0_10], %12 {strides = array<i32>} : memref<512x128xf32, #tpu.memory_space<vmem>>, vector<512x128xf32>,
    %c0_i32_11 = arith.constant 0 : i32
    %14 = arith.cmpi eq, %arg1, %c0_i32_11 : i32
    %15 = arith.extui %14 : i1 to i32
    %c0_i32_12 = arith.constant 0 : i32
    %16 = arith.cmpi ne, %15, %c0_i32_12 : i32
    scf.if %16 {
      %c0_16 = arith.constant 0 : index
      %c0_17 = arith.constant 0 : index
      %22 = vector.load %arg9[%c0_16, %c0_17] : memref<512x128xf32, #tpu.memory_space<vmem>>, vector<512x128xf32>
      %23 = arith.truncf %22 : vector<512x128xf32> to vector<512x128xbf16>
      %c0_18 = arith.constant 0 : index
      %c0_19 = arith.constant 0 : index
      %24 = vector.load %arg6[%c0_18, %c0_19] : memref<512x128xbf16, #tpu.memory_space<vmem>>, vector<512x128xbf16>
      tpu.vector_store %arg6[%c0_18, %c0_19], %23 {strides = array<i32>} : memref<512x128xbf16, #tpu.memory_space<vmem>>, vector<512x128xbf16>,
      %c0_20 = arith.constant 0 : index
      %c0_21 = arith.constant 0 : index
      %25 = vector.load %arg10[%c0_20, %c0_21] : memref<1x128xf32, #tpu.memory_space<vmem>>, vector<1x128xf32>
      %cst_22 = arith.constant dense<0.000000e+00> : vector<128xf32>
      %26 = vector.multi_reduction <add>, %22, %cst_22 [0] : vector<512x128xf32> to vector<128xf32>
      %27 = vector.shape_cast %26 : vector<128xf32> to vector<1x128xf32>
      %28 = arith.addf %25, %27 : vector<1x128xf32>
      %c0_23 = arith.constant 0 : index
      %c0_24 = arith.constant 0 : index
      %29 = vector.load %arg10[%c0_23, %c0_24] : memref<1x128xf32, #tpu.memory_space<vmem>>, vector<1x128xf32>
      tpu.vector_store %arg10[%c0_23, %c0_24], %28 {strides = array<i32>} : memref<1x128xf32, #tpu.memory_space<vmem>>, vector<1x128xf32>,
      %c0_25 = arith.constant 0 : index
      %c0_26 = arith.constant 0 : index
      %30 = vector.load %arg11[%c0_25, %c0_26] : memref<1x128xf32, #tpu.memory_space<vmem>>, vector<1x128xf32>
      %31 = arith.mulf %22, %22 : vector<512x128xf32>
      %cst_27 = arith.constant dense<0.000000e+00> : vector<128xf32>
      %32 = vector.multi_reduction <add>, %31, %cst_27 [0] : vector<512x128xf32> to vector<128xf32>
      %33 = vector.shape_cast %32 : vector<128xf32> to vector<1x128xf32>
      %34 = arith.addf %30, %33 : vector<1x128xf32>
      %c0_28 = arith.constant 0 : index
      %c0_29 = arith.constant 0 : index
      %35 = vector.load %arg11[%c0_28, %c0_29] : memref<1x128xf32, #tpu.memory_space<vmem>>, vector<1x128xf32>
      tpu.vector_store %arg11[%c0_28, %c0_29], %34 {strides = array<i32>} : memref<1x128xf32, #tpu.memory_space<vmem>>, vector<1x128xf32>,
    } else {
    }
    %c0_i32_13 = arith.constant 0 : i32
    %17 = arith.cmpi eq, %arg0, %c0_i32_13 : i32
    %c0_i32_14 = arith.constant 0 : i32
    %18 = arith.cmpi eq, %arg1, %c0_i32_14 : i32
    %19 = arith.andi %17, %18 : i1
    %20 = arith.extui %19 : i1 to i32
    %c0_i32_15 = arith.constant 0 : i32
    %21 = arith.cmpi ne, %20, %c0_i32_15 : i32
    scf.if %21 {
      %c0_16 = arith.constant 0 : index
      %c0_17 = arith.constant 0 : index
      %22 = vector.load %arg10[%c0_16, %c0_17] : memref<1x128xf32, #tpu.memory_space<vmem>>, vector<1x128xf32>
      %cst_18 = arith.constant 0.001953125 : f32
      %23 = vector.broadcast %cst_18 : f32 to vector<1x128xf32>
      %24 = arith.mulf %22, %23 : vector<1x128xf32>
      %c0_19 = arith.constant 0 : index
      %c0_20 = arith.constant 0 : index
      %25 = vector.load %arg11[%c0_19, %c0_20] : memref<1x128xf32, #tpu.memory_space<vmem>>, vector<1x128xf32>
      %cst_21 = arith.constant 0.001953125 : f32
      %26 = vector.broadcast %cst_21 : f32 to vector<1x128xf32>
      %27 = arith.mulf %25, %26 : vector<1x128xf32>
      %28 = arith.mulf %24, %24 : vector<1x128xf32>
      %29 = arith.subf %27, %28 : vector<1x128xf32>
      %cst_22 = arith.constant 0.000000e+00 : f32
      %30 = vector.broadcast %cst_22 : f32 to vector<1x128xf32>
      %31 = arith.maximumf %29, %30 : vector<1x128xf32>
      %c0_23 = arith.constant 0 : index
      %c0_24 = arith.constant 0 : index
      %32 = vector.load %arg4[%c0_23, %c0_24] : memref<1x128xf32, #tpu.memory_space<vmem>>, vector<1x128xf32>
      %cst_25 = arith.constant 9.99999974E-6 : f32
      %33 = vector.broadcast %cst_25 : f32 to vector<1x128xf32>
      %34 = arith.addf %31, %33 : vector<1x128xf32>
      %35 = math.rsqrt %34 : vector<1x128xf32>
      %36 = arith.mulf %32, %35 : vector<1x128xf32>
      %c0_26 = arith.constant 0 : index
      %c0_27 = arith.constant 0 : index
      %37 = vector.load %arg7[%c0_26, %c0_27] : memref<1x128xf32, #tpu.memory_space<vmem>>, vector<1x128xf32>
      tpu.vector_store %arg7[%c0_26, %c0_27], %36 {strides = array<i32>} : memref<1x128xf32, #tpu.memory_space<vmem>>, vector<1x128xf32>,
      %c0_28 = arith.constant 0 : index
      %c0_29 = arith.constant 0 : index
      %38 = vector.load %arg5[%c0_28, %c0_29] : memref<1x128xf32, #tpu.memory_space<vmem>>, vector<1x128xf32>
      %39 = arith.mulf %24, %36 : vector<1x128xf32>
      %40 = arith.subf %38, %39 : vector<1x128xf32>
      %c0_30 = arith.constant 0 : index
      %c0_31 = arith.constant 0 : index
      %41 = vector.load %arg8[%c0_30, %c0_31] : memref<1x128xf32, #tpu.memory_space<vmem>>, vector<1x128xf32>
      tpu.vector_store %arg8[%c0_30, %c0_31], %40 {strides = array<i32>} : memref<1x128xf32, #tpu.memory_space<vmem>>, vector<1x128xf32>,
    } else {
    }
    return
  }
  func.func @transform_0(%arg0: i32, %arg1: i32) -> (i32, i32) {
    %c0_i32 = arith.constant 0 : i32
    return %arg0, %arg1 : i32, i32
  }
  func.func @transform_1(%arg0: i32, %arg1: i32) -> (i32, i32) {
    %c0_i32 = arith.constant 0 : i32
    %c0_i32_0 = arith.constant 0 : i32
    return %arg1, %c0_i32 : i32, i32
  }
  func.func @transform_2(%arg0: i32, %arg1: i32) -> (i32, i32) {
    %c0_i32 = arith.constant 0 : i32
    %c0_i32_0 = arith.constant 0 : i32
    %c0_i32_1 = arith.constant 0 : i32
    return %c0_i32, %c0_i32_0 : i32, i32
  }
  func.func @transform_3(%arg0: i32, %arg1: i32) -> (i32, i32) {
    %c0_i32 = arith.constant 0 : i32
    %c0_i32_0 = arith.constant 0 : i32
    %c0_i32_1 = arith.constant 0 : i32
    return %c0_i32, %c0_i32_0 : i32, i32
  }
  func.func @transform_4(%arg0: i32, %arg1: i32) -> (i32, i32) {
    %c0_i32 = arith.constant 0 : i32
    %c0_i32_0 = arith.constant 0 : i32
    return %arg0, %c0_i32 : i32, i32
  }
  func.func @transform_5(%arg0: i32, %arg1: i32) -> (i32, i32) {
    %c0_i32 = arith.constant 0 : i32
    %c0_i32_0 = arith.constant 0 : i32
    %c0_i32_1 = arith.constant 0 : i32
    return %c0_i32, %c0_i32_0 : i32, i32
  }
  func.func @transform_6(%arg0: i32, %arg1: i32) -> (i32, i32) {
    %c0_i32 = arith.constant 0 : i32
    %c0_i32_0 = arith.constant 0 : i32
    %c0_i32_1 = arith.constant 0 : i32
    return %c0_i32, %c0_i32_0 : i32, i32
  }
}

module attributes {stable_mosaic.version = 11 : i64} {
  func.func @bn_apply_kernel(%arg0: i32, %arg1: memref<512x128xbf16, #tpu.memory_space<vmem>>, %arg2: memref<1x128xf32, #tpu.memory_space<vmem>>, %arg3: memref<1x128xf32, #tpu.memory_space<vmem>>, %arg4: memref<512x128xbf16, #tpu.memory_space<vmem>>) attributes {dimension_semantics = [#tpu.dimension_semantics<parallel>], iteration_bounds = array<i64: 1>, scalar_prefetch = 0 : i64, scratch_operands = 0 : i64, tpu.core_type = #tpu.core_type<tc>, window_params = [{transform_indices = @transform_0, window_bounds = array<i64: 512, 128>}, {pipeline_mode = #tpu.pipeline_mode<synchronous>, transform_indices = @transform_1, window_bounds = array<i64: 1, 128>}, {pipeline_mode = #tpu.pipeline_mode<synchronous>, transform_indices = @transform_2, window_bounds = array<i64: 1, 128>}, {transform_indices = @transform_3, window_bounds = array<i64: 512, 128>}]} {
    %c0 = arith.constant 0 : index
    %c0_0 = arith.constant 0 : index
    %0 = vector.load %arg1[%c0, %c0_0] : memref<512x128xbf16, #tpu.memory_space<vmem>>, vector<512x128xbf16>
    %1 = arith.extf %0 : vector<512x128xbf16> to vector<512x128xf32>
    %c0_1 = arith.constant 0 : index
    %c0_2 = arith.constant 0 : index
    %2 = vector.load %arg2[%c0_1, %c0_2] : memref<1x128xf32, #tpu.memory_space<vmem>>, vector<1x128xf32>
    %3 = vector.broadcast %2 : vector<1x128xf32> to vector<512x128xf32>
    %4 = arith.mulf %1, %3 : vector<512x128xf32>
    %c0_3 = arith.constant 0 : index
    %c0_4 = arith.constant 0 : index
    %5 = vector.load %arg3[%c0_3, %c0_4] : memref<1x128xf32, #tpu.memory_space<vmem>>, vector<1x128xf32>
    %6 = vector.broadcast %5 : vector<1x128xf32> to vector<512x128xf32>
    %7 = arith.addf %4, %6 : vector<512x128xf32>
    %cst = arith.constant 0.000000e+00 : f32
    %8 = vector.broadcast %cst : f32 to vector<512x128xf32>
    %9 = arith.maximumf %7, %8 : vector<512x128xf32>
    %10 = arith.truncf %9 : vector<512x128xf32> to vector<512x128xbf16>
    %c0_5 = arith.constant 0 : index
    %c0_6 = arith.constant 0 : index
    %11 = vector.load %arg4[%c0_5, %c0_6] : memref<512x128xbf16, #tpu.memory_space<vmem>>, vector<512x128xbf16>
    tpu.vector_store %arg4[%c0_5, %c0_6], %10 {strides = array<i32>} : memref<512x128xbf16, #tpu.memory_space<vmem>>, vector<512x128xbf16>,
    return
  }
  func.func @transform_0(%arg0: i32) -> (i32, i32) {
    %c0_i32 = arith.constant 0 : i32
    %c0_i32_0 = arith.constant 0 : i32
    return %arg0, %c0_i32 : i32, i32
  }
  func.func @transform_1(%arg0: i32) -> (i32, i32) {
    %c0_i32 = arith.constant 0 : i32
    %c0_i32_0 = arith.constant 0 : i32
    %c0_i32_1 = arith.constant 0 : i32
    return %c0_i32, %c0_i32_0 : i32, i32
  }
  func.func @transform_2(%arg0: i32) -> (i32, i32) {
    %c0_i32 = arith.constant 0 : i32
    %c0_i32_0 = arith.constant 0 : i32
    %c0_i32_1 = arith.constant 0 : i32
    return %c0_i32, %c0_i32_0 : i32, i32
  }
  func.func @transform_3(%arg0: i32) -> (i32, i32) {
    %c0_i32 = arith.constant 0 : i32
    %c0_i32_0 = arith.constant 0 : i32
    return %arg0, %c0_i32 : i32, i32
  }
}

module attributes {stable_mosaic.version = 11 : i64} {
  func.func @conv_bn_stats_kernel(%arg0: i32, %arg1: i32, %arg2: memref<512x128xbf16, #tpu.memory_space<vmem>>, %arg3: memref<128x128xbf16, #tpu.memory_space<vmem>>, %arg4: memref<1x128xf32, #tpu.memory_space<vmem>>, %arg5: memref<1x128xf32, #tpu.memory_space<vmem>>, %arg6: memref<512x128xf32, #tpu.memory_space<vmem>>, %arg7: memref<1x128xf32, #tpu.memory_space<vmem>>, %arg8: memref<1x128xf32, #tpu.memory_space<vmem>>, %arg9: memref<512x128xf32, #tpu.memory_space<vmem>>, %arg10: memref<1x128xf32, #tpu.memory_space<vmem>>, %arg11: memref<1x128xf32, #tpu.memory_space<vmem>>) attributes {dimension_semantics = [#tpu.dimension_semantics<arbitrary>, #tpu.dimension_semantics<arbitrary>], iteration_bounds = array<i64: 1, 1>, scalar_prefetch = 0 : i64, scratch_operands = 3 : i64, tpu.core_type = #tpu.core_type<tc>, window_params = [{transform_indices = @transform_0, window_bounds = array<i64: 512, 128>}, {transform_indices = @transform_1, window_bounds = array<i64: 128, 128>}, {pipeline_mode = #tpu.pipeline_mode<synchronous>, transform_indices = @transform_2, window_bounds = array<i64: 1, 128>}, {pipeline_mode = #tpu.pipeline_mode<synchronous>, transform_indices = @transform_3, window_bounds = array<i64: 1, 128>}, {transform_indices = @transform_4, window_bounds = array<i64: 512, 128>}, {pipeline_mode = #tpu.pipeline_mode<synchronous>, transform_indices = @transform_5, window_bounds = array<i64: 1, 128>}, {pipeline_mode = #tpu.pipeline_mode<synchronous>, transform_indices = @transform_6, window_bounds = array<i64: 1, 128>}]} {
    %c0_i32 = arith.constant 0 : i32
    %0 = arith.cmpi eq, %arg0, %c0_i32 : i32
    %c0_i32_0 = arith.constant 0 : i32
    %1 = arith.cmpi eq, %arg1, %c0_i32_0 : i32
    %2 = arith.andi %0, %1 : i1
    %3 = arith.extui %2 : i1 to i32
    %c0_i32_1 = arith.constant 0 : i32
    %4 = arith.cmpi ne, %3, %c0_i32_1 : i32
    scf.if %4 {
      %cst_16 = arith.constant 0.000000e+00 : f32
      %22 = vector.broadcast %cst_16 : f32 to vector<1x128xf32>
      %c0_17 = arith.constant 0 : index
      %c0_18 = arith.constant 0 : index
      %23 = vector.load %arg10[%c0_17, %c0_18] : memref<1x128xf32, #tpu.memory_space<vmem>>, vector<1x128xf32>
      tpu.vector_store %arg10[%c0_17, %c0_18], %22 {strides = array<i32>} : memref<1x128xf32, #tpu.memory_space<vmem>>, vector<1x128xf32>,
      %cst_19 = arith.constant 0.000000e+00 : f32
      %24 = vector.broadcast %cst_19 : f32 to vector<1x128xf32>
      %c0_20 = arith.constant 0 : index
      %c0_21 = arith.constant 0 : index
      %25 = vector.load %arg11[%c0_20, %c0_21] : memref<1x128xf32, #tpu.memory_space<vmem>>, vector<1x128xf32>
      tpu.vector_store %arg11[%c0_20, %c0_21], %24 {strides = array<i32>} : memref<1x128xf32, #tpu.memory_space<vmem>>, vector<1x128xf32>,
    } else {
    }
    %c0_i32_2 = arith.constant 0 : i32
    %5 = arith.cmpi eq, %arg1, %c0_i32_2 : i32
    %6 = arith.extui %5 : i1 to i32
    %c0_i32_3 = arith.constant 0 : i32
    %7 = arith.cmpi ne, %6, %c0_i32_3 : i32
    scf.if %7 {
      %cst_16 = arith.constant 0.000000e+00 : f32
      %22 = vector.broadcast %cst_16 : f32 to vector<512x128xf32>
      %c0_17 = arith.constant 0 : index
      %c0_18 = arith.constant 0 : index
      %23 = vector.load %arg9[%c0_17, %c0_18] : memref<512x128xf32, #tpu.memory_space<vmem>>, vector<512x128xf32>
      tpu.vector_store %arg9[%c0_17, %c0_18], %22 {strides = array<i32>} : memref<512x128xf32, #tpu.memory_space<vmem>>, vector<512x128xf32>,
    } else {
    }
    %c0 = arith.constant 0 : index
    %c0_4 = arith.constant 0 : index
    %8 = vector.load %arg9[%c0, %c0_4] : memref<512x128xf32, #tpu.memory_space<vmem>>, vector<512x128xf32>
    %c0_5 = arith.constant 0 : index
    %c0_6 = arith.constant 0 : index
    %9 = vector.load %arg2[%c0_5, %c0_6] : memref<512x128xbf16, #tpu.memory_space<vmem>>, vector<512x128xbf16>
    %c0_7 = arith.constant 0 : index
    %c0_8 = arith.constant 0 : index
    %10 = vector.load %arg3[%c0_7, %c0_8] : memref<128x128xbf16, #tpu.memory_space<vmem>>, vector<128x128xbf16>
    %cst = arith.constant dense<0.000000e+00> : vector<512x128xf32>
    %11 = tpu.matmul %9, %10, %cst {dimension_numbers = #tpu.dot_dimension_numbers<[1], [0], [0], [1], [0, 0, 1, 1], [], []>} : vector<512x128xbf16>, vector<128x128xbf16>, vector<512x128xf32> -> vector<512x128xf32>
    %12 = arith.addf %8, %11 : vector<512x128xf32>
    %c0_9 = arith.constant 0 : index
    %c0_10 = arith.constant 0 : index
    %13 = vector.load %arg9[%c0_9, %c0_10] : memref<512x128xf32, #tpu.memory_space<vmem>>, vector<512x128xf32>
    tpu.vector_store %arg9[%c0_9, %c0_10], %12 {strides = array<i32>} : memref<512x128xf32, #tpu.memory_space<vmem>>, vector<512x128xf32>,
    %c0_i32_11 = arith.constant 0 : i32
    %14 = arith.cmpi eq, %arg1, %c0_i32_11 : i32
    %15 = arith.extui %14 : i1 to i32
    %c0_i32_12 = arith.constant 0 : i32
    %16 = arith.cmpi ne, %15, %c0_i32_12 : i32
    scf.if %16 {
      %c0_16 = arith.constant 0 : index
      %c0_17 = arith.constant 0 : index
      %22 = vector.load %arg9[%c0_16, %c0_17] : memref<512x128xf32, #tpu.memory_space<vmem>>, vector<512x128xf32>
      %c0_18 = arith.constant 0 : index
      %c0_19 = arith.constant 0 : index
      %23 = vector.load %arg6[%c0_18, %c0_19] : memref<512x128xf32, #tpu.memory_space<vmem>>, vector<512x128xf32>
      tpu.vector_store %arg6[%c0_18, %c0_19], %22 {strides = array<i32>} : memref<512x128xf32, #tpu.memory_space<vmem>>, vector<512x128xf32>,
      %c0_20 = arith.constant 0 : index
      %c0_21 = arith.constant 0 : index
      %24 = vector.load %arg10[%c0_20, %c0_21] : memref<1x128xf32, #tpu.memory_space<vmem>>, vector<1x128xf32>
      %cst_22 = arith.constant dense<0.000000e+00> : vector<128xf32>
      %25 = vector.multi_reduction <add>, %22, %cst_22 [0] : vector<512x128xf32> to vector<128xf32>
      %26 = vector.shape_cast %25 : vector<128xf32> to vector<1x128xf32>
      %27 = arith.addf %24, %26 : vector<1x128xf32>
      %c0_23 = arith.constant 0 : index
      %c0_24 = arith.constant 0 : index
      %28 = vector.load %arg10[%c0_23, %c0_24] : memref<1x128xf32, #tpu.memory_space<vmem>>, vector<1x128xf32>
      tpu.vector_store %arg10[%c0_23, %c0_24], %27 {strides = array<i32>} : memref<1x128xf32, #tpu.memory_space<vmem>>, vector<1x128xf32>,
      %c0_25 = arith.constant 0 : index
      %c0_26 = arith.constant 0 : index
      %29 = vector.load %arg11[%c0_25, %c0_26] : memref<1x128xf32, #tpu.memory_space<vmem>>, vector<1x128xf32>
      %30 = arith.mulf %22, %22 : vector<512x128xf32>
      %cst_27 = arith.constant dense<0.000000e+00> : vector<128xf32>
      %31 = vector.multi_reduction <add>, %30, %cst_27 [0] : vector<512x128xf32> to vector<128xf32>
      %32 = vector.shape_cast %31 : vector<128xf32> to vector<1x128xf32>
      %33 = arith.addf %29, %32 : vector<1x128xf32>
      %c0_28 = arith.constant 0 : index
      %c0_29 = arith.constant 0 : index
      %34 = vector.load %arg11[%c0_28, %c0_29] : memref<1x128xf32, #tpu.memory_space<vmem>>, vector<1x128xf32>
      tpu.vector_store %arg11[%c0_28, %c0_29], %33 {strides = array<i32>} : memref<1x128xf32, #tpu.memory_space<vmem>>, vector<1x128xf32>,
    } else {
    }
    %c0_i32_13 = arith.constant 0 : i32
    %17 = arith.cmpi eq, %arg0, %c0_i32_13 : i32
    %c0_i32_14 = arith.constant 0 : i32
    %18 = arith.cmpi eq, %arg1, %c0_i32_14 : i32
    %19 = arith.andi %17, %18 : i1
    %20 = arith.extui %19 : i1 to i32
    %c0_i32_15 = arith.constant 0 : i32
    %21 = arith.cmpi ne, %20, %c0_i32_15 : i32
    scf.if %21 {
      %c0_16 = arith.constant 0 : index
      %c0_17 = arith.constant 0 : index
      %22 = vector.load %arg10[%c0_16, %c0_17] : memref<1x128xf32, #tpu.memory_space<vmem>>, vector<1x128xf32>
      %cst_18 = arith.constant 0.001953125 : f32
      %23 = vector.broadcast %cst_18 : f32 to vector<1x128xf32>
      %24 = arith.mulf %22, %23 : vector<1x128xf32>
      %c0_19 = arith.constant 0 : index
      %c0_20 = arith.constant 0 : index
      %25 = vector.load %arg11[%c0_19, %c0_20] : memref<1x128xf32, #tpu.memory_space<vmem>>, vector<1x128xf32>
      %cst_21 = arith.constant 0.001953125 : f32
      %26 = vector.broadcast %cst_21 : f32 to vector<1x128xf32>
      %27 = arith.mulf %25, %26 : vector<1x128xf32>
      %28 = arith.mulf %24, %24 : vector<1x128xf32>
      %29 = arith.subf %27, %28 : vector<1x128xf32>
      %cst_22 = arith.constant 0.000000e+00 : f32
      %30 = vector.broadcast %cst_22 : f32 to vector<1x128xf32>
      %31 = arith.maximumf %29, %30 : vector<1x128xf32>
      %c0_23 = arith.constant 0 : index
      %c0_24 = arith.constant 0 : index
      %32 = vector.load %arg4[%c0_23, %c0_24] : memref<1x128xf32, #tpu.memory_space<vmem>>, vector<1x128xf32>
      %cst_25 = arith.constant 9.99999974E-6 : f32
      %33 = vector.broadcast %cst_25 : f32 to vector<1x128xf32>
      %34 = arith.addf %31, %33 : vector<1x128xf32>
      %35 = math.rsqrt %34 : vector<1x128xf32>
      %36 = arith.mulf %32, %35 : vector<1x128xf32>
      %c0_26 = arith.constant 0 : index
      %c0_27 = arith.constant 0 : index
      %37 = vector.load %arg7[%c0_26, %c0_27] : memref<1x128xf32, #tpu.memory_space<vmem>>, vector<1x128xf32>
      tpu.vector_store %arg7[%c0_26, %c0_27], %36 {strides = array<i32>} : memref<1x128xf32, #tpu.memory_space<vmem>>, vector<1x128xf32>,
      %c0_28 = arith.constant 0 : index
      %c0_29 = arith.constant 0 : index
      %38 = vector.load %arg5[%c0_28, %c0_29] : memref<1x128xf32, #tpu.memory_space<vmem>>, vector<1x128xf32>
      %39 = arith.mulf %24, %36 : vector<1x128xf32>
      %40 = arith.subf %38, %39 : vector<1x128xf32>
      %c0_30 = arith.constant 0 : index
      %c0_31 = arith.constant 0 : index
      %41 = vector.load %arg8[%c0_30, %c0_31] : memref<1x128xf32, #tpu.memory_space<vmem>>, vector<1x128xf32>
      tpu.vector_store %arg8[%c0_30, %c0_31], %40 {strides = array<i32>} : memref<1x128xf32, #tpu.memory_space<vmem>>, vector<1x128xf32>,
    } else {
    }
    return
  }
  func.func @transform_0(%arg0: i32, %arg1: i32) -> (i32, i32) {
    %c0_i32 = arith.constant 0 : i32
    return %arg0, %arg1 : i32, i32
  }
  func.func @transform_1(%arg0: i32, %arg1: i32) -> (i32, i32) {
    %c0_i32 = arith.constant 0 : i32
    %c0_i32_0 = arith.constant 0 : i32
    return %arg1, %c0_i32 : i32, i32
  }
  func.func @transform_2(%arg0: i32, %arg1: i32) -> (i32, i32) {
    %c0_i32 = arith.constant 0 : i32
    %c0_i32_0 = arith.constant 0 : i32
    %c0_i32_1 = arith.constant 0 : i32
    return %c0_i32, %c0_i32_0 : i32, i32
  }
  func.func @transform_3(%arg0: i32, %arg1: i32) -> (i32, i32) {
    %c0_i32 = arith.constant 0 : i32
    %c0_i32_0 = arith.constant 0 : i32
    %c0_i32_1 = arith.constant 0 : i32
    return %c0_i32, %c0_i32_0 : i32, i32
  }
  func.func @transform_4(%arg0: i32, %arg1: i32) -> (i32, i32) {
    %c0_i32 = arith.constant 0 : i32
    %c0_i32_0 = arith.constant 0 : i32
    return %arg0, %c0_i32 : i32, i32
  }
  func.func @transform_5(%arg0: i32, %arg1: i32) -> (i32, i32) {
    %c0_i32 = arith.constant 0 : i32
    %c0_i32_0 = arith.constant 0 : i32
    %c0_i32_1 = arith.constant 0 : i32
    return %c0_i32, %c0_i32_0 : i32, i32
  }
  func.func @transform_6(%arg0: i32, %arg1: i32) -> (i32, i32) {
    %c0_i32 = arith.constant 0 : i32
    %c0_i32_0 = arith.constant 0 : i32
    %c0_i32_1 = arith.constant 0 : i32
    return %c0_i32, %c0_i32_0 : i32, i32
  }
}

module attributes {stable_mosaic.version = 11 : i64} {
  func.func @bn_join_proj_kernel(%arg0: i32, %arg1: memref<512x128xf32, #tpu.memory_space<vmem>>, %arg2: memref<1x128xf32, #tpu.memory_space<vmem>>, %arg3: memref<1x128xf32, #tpu.memory_space<vmem>>, %arg4: memref<512x128xf32, #tpu.memory_space<vmem>>, %arg5: memref<1x128xf32, #tpu.memory_space<vmem>>, %arg6: memref<1x128xf32, #tpu.memory_space<vmem>>, %arg7: memref<512x128xf32, #tpu.memory_space<vmem>>) attributes {dimension_semantics = [#tpu.dimension_semantics<parallel>], iteration_bounds = array<i64: 1>, scalar_prefetch = 0 : i64, scratch_operands = 0 : i64, tpu.core_type = #tpu.core_type<tc>, window_params = [{transform_indices = @transform_0, window_bounds = array<i64: 512, 128>}, {pipeline_mode = #tpu.pipeline_mode<synchronous>, transform_indices = @transform_1, window_bounds = array<i64: 1, 128>}, {pipeline_mode = #tpu.pipeline_mode<synchronous>, transform_indices = @transform_2, window_bounds = array<i64: 1, 128>}, {transform_indices = @transform_3, window_bounds = array<i64: 512, 128>}, {pipeline_mode = #tpu.pipeline_mode<synchronous>, transform_indices = @transform_4, window_bounds = array<i64: 1, 128>}, {pipeline_mode = #tpu.pipeline_mode<synchronous>, transform_indices = @transform_5, window_bounds = array<i64: 1, 128>}, {transform_indices = @transform_6, window_bounds = array<i64: 512, 128>}]} {
    %c0 = arith.constant 0 : index
    %c0_0 = arith.constant 0 : index
    %0 = vector.load %arg1[%c0, %c0_0] : memref<512x128xf32, #tpu.memory_space<vmem>>, vector<512x128xf32>
    %c0_1 = arith.constant 0 : index
    %c0_2 = arith.constant 0 : index
    %1 = vector.load %arg2[%c0_1, %c0_2] : memref<1x128xf32, #tpu.memory_space<vmem>>, vector<1x128xf32>
    %2 = vector.broadcast %1 : vector<1x128xf32> to vector<512x128xf32>
    %3 = arith.mulf %0, %2 : vector<512x128xf32>
    %c0_3 = arith.constant 0 : index
    %c0_4 = arith.constant 0 : index
    %4 = vector.load %arg3[%c0_3, %c0_4] : memref<1x128xf32, #tpu.memory_space<vmem>>, vector<1x128xf32>
    %5 = vector.broadcast %4 : vector<1x128xf32> to vector<512x128xf32>
    %6 = arith.addf %3, %5 : vector<512x128xf32>
    %c0_5 = arith.constant 0 : index
    %c0_6 = arith.constant 0 : index
    %7 = vector.load %arg4[%c0_5, %c0_6] : memref<512x128xf32, #tpu.memory_space<vmem>>, vector<512x128xf32>
    %c0_7 = arith.constant 0 : index
    %c0_8 = arith.constant 0 : index
    %8 = vector.load %arg5[%c0_7, %c0_8] : memref<1x128xf32, #tpu.memory_space<vmem>>, vector<1x128xf32>
    %9 = vector.broadcast %8 : vector<1x128xf32> to vector<512x128xf32>
    %10 = arith.mulf %7, %9 : vector<512x128xf32>
    %c0_9 = arith.constant 0 : index
    %c0_10 = arith.constant 0 : index
    %11 = vector.load %arg6[%c0_9, %c0_10] : memref<1x128xf32, #tpu.memory_space<vmem>>, vector<1x128xf32>
    %12 = vector.broadcast %11 : vector<1x128xf32> to vector<512x128xf32>
    %13 = arith.addf %10, %12 : vector<512x128xf32>
    %14 = arith.addf %6, %13 : vector<512x128xf32>
    %cst = arith.constant 0.000000e+00 : f32
    %15 = vector.broadcast %cst : f32 to vector<512x128xf32>
    %16 = arith.maximumf %14, %15 : vector<512x128xf32>
    %c0_11 = arith.constant 0 : index
    %c0_12 = arith.constant 0 : index
    %17 = vector.load %arg7[%c0_11, %c0_12] : memref<512x128xf32, #tpu.memory_space<vmem>>, vector<512x128xf32>
    tpu.vector_store %arg7[%c0_11, %c0_12], %16 {strides = array<i32>} : memref<512x128xf32, #tpu.memory_space<vmem>>, vector<512x128xf32>,
    return
  }
  func.func @transform_0(%arg0: i32) -> (i32, i32) {
    %c0_i32 = arith.constant 0 : i32
    %c0_i32_0 = arith.constant 0 : i32
    return %arg0, %c0_i32 : i32, i32
  }
  func.func @transform_1(%arg0: i32) -> (i32, i32) {
    %c0_i32 = arith.constant 0 : i32
    %c0_i32_0 = arith.constant 0 : i32
    %c0_i32_1 = arith.constant 0 : i32
    return %c0_i32, %c0_i32_0 : i32, i32
  }
  func.func @transform_2(%arg0: i32) -> (i32, i32) {
    %c0_i32 = arith.constant 0 : i32
    %c0_i32_0 = arith.constant 0 : i32
    %c0_i32_1 = arith.constant 0 : i32
    return %c0_i32, %c0_i32_0 : i32, i32
  }
  func.func @transform_3(%arg0: i32) -> (i32, i32) {
    %c0_i32 = arith.constant 0 : i32
    %c0_i32_0 = arith.constant 0 : i32
    return %arg0, %c0_i32 : i32, i32
  }
  func.func @transform_4(%arg0: i32) -> (i32, i32) {
    %c0_i32 = arith.constant 0 : i32
    %c0_i32_0 = arith.constant 0 : i32
    %c0_i32_1 = arith.constant 0 : i32
    return %c0_i32, %c0_i32_0 : i32, i32
  }
  func.func @transform_5(%arg0: i32) -> (i32, i32) {
    %c0_i32 = arith.constant 0 : i32
    %c0_i32_0 = arith.constant 0 : i32
    %c0_i32_1 = arith.constant 0 : i32
    return %c0_i32, %c0_i32_0 : i32, i32
  }
  func.func @transform_6(%arg0: i32) -> (i32, i32) {
    %c0_i32 = arith.constant 0 : i32
    %c0_i32_0 = arith.constant 0 : i32
    return %arg0, %c0_i32 : i32, i32
  }
}

</mosaic_0001>

<bundles_post_ra>
// kernel: block_forward.6
= control target key start
LH: loop header
LB: loop body
LE: loop exit
PB: predicated region body
PF: predicated region fallthrough
CT: control target
= control target key end

     0   :  { %s1502_s0 = inlined_call_operand.vmem [shape: bf16[512,128], index: 0, kind: input, shape index: {}]   ;;  %s1503_s1 = inlined_call_operand.vmem [shape: f32[1,128], index: 1, kind: input, shape index: {}]   ;;  %s1504_s2 = inlined_call_operand.vmem [shape: f32[1,128], index: 2, kind: input, shape index: {}]   ;;  %s1505_s3 = inlined_call_operand.vmem [shape: bf16[512,128], index: 3, kind: output, shape index: {}]  }
   0x1   :  { %v803_v0 = vld [vmem:[%s1502_s0] sm:$0xff]   ;;  %v1090_v4 = vld [vmem:[%s1502_s0 + $0x8] sm:$0xff]   ;;  %v1091_v5 = vld [vmem:[%s1502_s0 + $0x10] sm:$0xff]  }
   0x2   :  { %v1178_v1 = vld [vmem:[%s1503_s1] ss:$0 sm:$0xff]  ;;  %v804_v2 = vunpack.c.l.bf16 %v803_v0  ;;  %v805_v3 = vunpack.c.h.bf16 %v803_v0  ;;  %v1092_v6 = vld [vmem:[%s1502_s0 + $0x18] sm:$0xff]   ;;  %v808_v8 = vunpack.c.l.bf16 %v1090_v4  ;;  %v809_v9 = vunpack.c.h.bf16 %v1090_v4  ;;  %v1094_v33 = vld [vmem:[%s1502_s0 + $0x28] sm:$0xff]  }
   0x3   :  { %v1192_v7 = vld [vmem:[%s1504_s2] ss:$0 sm:$0xff]  ;;  %v812_v10 = vunpack.c.l.bf16 %v1091_v5  ;;  %v813_v11 = vunpack.c.h.bf16 %v1091_v5  ;;  %v816_v14 = vunpack.c.l.bf16 %v1092_v6  ;;  %v817_v15 = vunpack.c.h.bf16 %v1092_v6  ;;  %v1095_v38 = vld [vmem:[%s1502_s0 + $0x30] sm:$0xff]   ;;  %v1096_v43 = vld [vmem:[%s1502_s0 + $0x38] sm:$0xff]  }
   0x4   :  { %v149_v12 = vmul.f32 %v804_v2, %v1178_v1  ;;  %v150_v13 = vmul.f32 %v805_v3, %v1178_v1  ;;  %v151_v16 = vmul.f32 %v808_v8, %v1178_v1  ;;  %v152_v17 = vmul.f32 %v809_v9, %v1178_v1  ;;  %v1093_v28 = vld [vmem:[%s1502_s0 + $0x20] sm:$0xff]  }
   0x5   :  { %v153_v18 = vmul.f32 %v812_v10, %v1178_v1  ;;  %v154_v19 = vmul.f32 %v813_v11, %v1178_v1  ;;  %v155_v22 = vmul.f32 %v816_v14, %v1178_v1  ;;  %v156_v23 = vmul.f32 %v817_v15, %v1178_v1  ;;  %v1097_v0 = vld [vmem:[%s1502_s0 + $0x40] sm:$0xff]   ;;  %v1098_v11 = vld [vmem:[%s1502_s0 + $0x48] sm:$0xff]  }
   0x6   :  { %v220_v20 = vadd.f32 %v1192_v7, %v149_v12  ;;  %v221_v21 = vadd.f32 %v1192_v7, %v150_v13  ;;  %v222_v24 = vadd.f32 %v1192_v7, %v151_v16  ;;  %v223_v25 = vadd.f32 %v1192_v7, %v152_v17  ;;  %v1099_v16 = vld [vmem:[%s1502_s0 + $0x50] sm:$0xff]  }
   0x7   :  { %v224_v26 = vadd.f32 %v1192_v7, %v153_v18  ;;  %v225_v27 = vadd.f32 %v1192_v7, %v154_v19  ;;  %v226_v31 = vadd.f32 %v1192_v7, %v155_v22  ;;  %v227_v32 = vadd.f32 %v1192_v7, %v156_v23 }
   0x8   :  { %v284_v29 = vmax.f32 %v220_v20, 0.0  ;;  %v285_v30 = vmax.f32 %v221_v21, 0.0  ;;  %v286_v34 = vmax.f32 %v222_v24, 0.0  ;;  %v287_v35 = vmax.f32 %v223_v25, 0.0  ;;  %v1100_v25 = vld [vmem:[%s1502_s0 + $0x58] sm:$0xff]  }
   0x9   :  { %v288_v36 = vmax.f32 %v224_v26, 0.0  ;;  %v289_v37 = vmax.f32 %v225_v27, 0.0  ;;  %v290_v40 = vmax.f32 %v226_v31, 0.0  ;;  %v291_v41 = vmax.f32 %v227_v32, 0.0 }
   0xa   :  { %v933_v39 = vpack.c.bf16 %v285_v30, %v284_v29  ;;  %v820_v42 = vunpack.c.l.bf16 %v1093_v28  ;;  %v938_v44 = vpack.c.bf16 %v287_v35, %v286_v34  ;;  %v821_v46 = vunpack.c.h.bf16 %v1093_v28 }
   0xb   :  { %v943_v45 = vpack.c.bf16 %v289_v37, %v288_v36  ;;  %v824_v47 = vunpack.c.l.bf16 %v1094_v33  ;;  %v948_v48 = vpack.c.bf16 %v291_v41, %v290_v40  ;;  %v825_v50 = vunpack.c.h.bf16 %v1094_v33 }
   0xc   :  { %934 = vst [vmem:[%s1505_s3] sm:$0xff] %v933_v39   ;;  %v157_v49 = vmul.f32 %v820_v42, %v1178_v1  ;;  %v828_v51 = vunpack.c.l.bf16 %v1095_v38  ;;  %1121 = vst [vmem:[%s1505_s3 + $0x8] sm:$0xff] %v938_v44   ;;  %v158_v52 = vmul.f32 %v821_v46, %v1178_v1  ;;  %v829_v54 = vunpack.c.h.bf16 %v1095_v38  ;;  %v1101_v38 = vld [vmem:[%s1502_s0 + $0x60] sm:$0xff]  }
   0xd   :  { %1122 = vst [vmem:[%s1505_s3 + $0x10] sm:$0xff] %v943_v45   ;;  %v159_v53 = vmul.f32 %v824_v47, %v1178_v1  ;;  %v832_v55 = vunpack.c.l.bf16 %v1096_v43  ;;  %1123 = vst [vmem:[%s1505_s3 + $0x18] sm:$0xff] %v948_v48   ;;  %v160_v57 = vmul.f32 %v825_v50, %v1178_v1  ;;  %v833_v59 = vunpack.c.h.bf16 %v1096_v43 }
   0xe   :  { %v228_v56 = vadd.f32 %v1192_v7, %v157_v49  ;;  %v161_v58 = vmul.f32 %v828_v51, %v1178_v1  ;;  %v229_v60 = vadd.f32 %v1192_v7, %v158_v52  ;;  %v162_v62 = vmul.f32 %v829_v54, %v1178_v1  ;;  %v1102_v51 = vld [vmem:[%s1502_s0 + $0x68] sm:$0xff]  }
   0xf   :  { %v230_v61 = vadd.f32 %v1192_v7, %v159_v53  ;;  %v163_v63 = vmul.f32 %v832_v55, %v1178_v1  ;;  %v231_v3 = vadd.f32 %v1192_v7, %v160_v57  ;;  %v164_v5 = vmul.f32 %v833_v59, %v1178_v1 }
  0x10   :  { %v292_v2 = vmax.f32 %v228_v56, 0.0  ;;  %v232_v4 = vadd.f32 %v1192_v7, %v161_v58  ;;  %v293_v6 = vmax.f32 %v229_v60, 0.0  ;;  %v233_v9 = vadd.f32 %v1192_v7, %v162_v62  ;;  %v1103_v60 = vld [vmem:[%s1502_s0 + $0x70] sm:$0xff]  }
  0x11   :  { %v294_v8 = vmax.f32 %v230_v61, 0.0  ;;  %v234_v10 = vadd.f32 %v1192_v7, %v163_v63  ;;  %v295_v12 = vmax.f32 %v231_v3, 0.0  ;;  %v235_v14 = vadd.f32 %v1192_v7, %v164_v5 }
  0x12   :  { %v296_v13 = vmax.f32 %v232_v4, 0.0  ;;  %v836_v15 = vunpack.c.l.bf16 %v1097_v0  ;;  %v953_v17 = vpack.c.bf16 %v293_v6, %v292_v2  ;;  %v297_v18 = vmax.f32 %v233_v9, 0.0  ;;  %v1104_v2 = vld [vmem:[%s1502_s0 + $0x78] sm:$0xff]  }
  0x13   :  { %v298_v19 = vmax.f32 %v234_v10, 0.0  ;;  %v837_v20 = vunpack.c.h.bf16 %v1097_v0  ;;  %v958_v21 = vpack.c.bf16 %v295_v12, %v294_v8  ;;  %v299_v22 = vmax.f32 %v235_v14, 0.0  ;;  %v1105_v12 = vld [vmem:[%s1502_s0 + $0x80] sm:$0xff]  }
  0x14   :  { %v165_v23 = vmul.f32 %v836_v15, %v1178_v1  ;;  %v840_v24 = vunpack.c.l.bf16 %v1098_v11  ;;  %1124 = vst [vmem:[%s1505_s3 + $0x20] sm:$0xff] %v953_v17   ;;  %v963_v26 = vpack.c.bf16 %v297_v18, %v296_v13  ;;  %v841_v28 = vunpack.c.h.bf16 %v1098_v11 }
  0x15   :  { %v166_v27 = vmul.f32 %v837_v20, %v1178_v1  ;;  %v844_v29 = vunpack.c.l.bf16 %v1099_v16  ;;  %1125 = vst [vmem:[%s1505_s3 + $0x28] sm:$0xff] %v958_v21   ;;  %v968_v30 = vpack.c.bf16 %v299_v22, %v298_v19  ;;  %v845_v33 = vunpack.c.h.bf16 %v1099_v16 }
  0x16   :  { %v236_v31 = vadd.f32 %v1192_v7, %v165_v23  ;;  %v167_v32 = vmul.f32 %v840_v24, %v1178_v1  ;;  %1126 = vst [vmem:[%s1505_s3 + $0x30] sm:$0xff] %v963_v26   ;;  %v168_v35 = vmul.f32 %v841_v28, %v1178_v1  ;;  %v848_v37 = vunpack.c.l.bf16 %v1100_v25 }
  0x17   :  { %v237_v34 = vadd.f32 %v1192_v7, %v166_v27  ;;  %v169_v36 = vmul.f32 %v844_v29, %v1178_v1  ;;  %1127 = vst [vmem:[%s1505_s3 + $0x38] sm:$0xff] %v968_v30   ;;  %v170_v41 = vmul.f32 %v845_v33, %v1178_v1  ;;  %v849_v42 = vunpack.c.h.bf16 %v1100_v25  ;;  %v1106_v29 = vld [vmem:[%s1502_s0 + $0x88] sm:$0xff]  }
  0x18   :  { %v300_v39 = vmax.f32 %v236_v31, 0.0  ;;  %v238_v40 = vadd.f32 %v1192_v7, %v167_v32  ;;  %v239_v44 = vadd.f32 %v1192_v7, %v168_v35  ;;  %v171_v46 = vmul.f32 %v848_v37, %v1178_v1 }
  0x19   :  { %v301_v43 = vmax.f32 %v237_v34, 0.0  ;;  %v240_v45 = vadd.f32 %v1192_v7, %v169_v36  ;;  %v241_v48 = vadd.f32 %v1192_v7, %v170_v41  ;;  %v172_v49 = vmul.f32 %v849_v42, %v1178_v1  ;;  %v1107_v34 = vld [vmem:[%s1502_s0 + $0x90] sm:$0xff]  }
  0x1a   :  { %v302_v47 = vmax.f32 %v238_v40, 0.0  ;;  %v852_v50 = vunpack.c.l.bf16 %v1101_v38  ;;  %v303_v53 = vmax.f32 %v239_v44, 0.0  ;;  %v242_v55 = vadd.f32 %v1192_v7, %v171_v46 }
  0x1b   :  { %v973_v52 = vpack.c.bf16 %v301_v43, %v300_v39  ;;  %v304_v54 = vmax.f32 %v240_v45, 0.0  ;;  %v305_v56 = vmax.f32 %v241_v48, 0.0  ;;  %v243_v57 = vadd.f32 %v1192_v7, %v172_v49  ;;  %v1108_v43 = vld [vmem:[%s1502_s0 + $0x98] sm:$0xff]  }
  0x1c   :  { %v853_v58 = vunpack.c.h.bf16 %v1101_v38  ;;  %v173_v59 = vmul.f32 %v852_v50, %v1178_v1  ;;  %v978_v61 = vpack.c.bf16 %v303_v53, %v302_v47  ;;  %v306_v62 = vmax.f32 %v242_v55, 0.0 }
  0x1d   :  { %1128 = vst [vmem:[%s1505_s3 + $0x40] sm:$0xff] %v973_v52   ;;  %v856_v63 = vunpack.c.l.bf16 %v1102_v51  ;;  %v857_v0 = vunpack.c.h.bf16 %v1102_v51  ;;  %v983_v3 = vpack.c.bf16 %v305_v56, %v304_v54  ;;  %v307_v4 = vmax.f32 %v243_v57, 0.0  ;;  %v1109_v56 = vld [vmem:[%s1502_s0 + $0xa0] sm:$0xff]  }
  0x1e   :  { %v174_v5 = vmul.f32 %v853_v58, %v1178_v1  ;;  %v244_v6 = vadd.f32 %v1192_v7, %v173_v59  ;;  %1129 = vst [vmem:[%s1505_s3 + $0x48] sm:$0xff] %v978_v61   ;;  %v860_v10 = vunpack.c.l.bf16 %v1103_v60  ;;  %v861_v11 = vunpack.c.h.bf16 %v1103_v60 }
  0x1f   :  { %v175_v8 = vmul.f32 %v856_v63, %v1178_v1  ;;  %v176_v9 = vmul.f32 %v857_v0, %v1178_v1  ;;  %1130 = vst [vmem:[%s1505_s3 + $0x50] sm:$0xff] %v983_v3   ;;  %v988_v13 = vpack.c.bf16 %v307_v4, %v306_v62  ;;  %v864_v16 = vunpack.c.l.bf16 %v1104_v2 }
  0x20   :  { %v245_v14 = vadd.f32 %v1192_v7, %v174_v5  ;;  %v308_v15 = vmax.f32 %v244_v6, 0.0  ;;  %v177_v19 = vmul.f32 %v860_v10, %v1178_v1  ;;  %v178_v20 = vmul.f32 %v861_v11, %v1178_v1 }
  0x21   :  { %v246_v17 = vadd.f32 %v1192_v7, %v175_v8  ;;  %v247_v18 = vadd.f32 %v1192_v7, %v176_v9  ;;  %1131 = vst [vmem:[%s1505_s3 + $0x58] sm:$0xff] %v988_v13   ;;  %v865_v22 = vunpack.c.h.bf16 %v1104_v2  ;;  %v179_v23 = vmul.f32 %v864_v16, %v1178_v1  ;;  %v1110_v2 = vld [vmem:[%s1502_s0 + $0xa8] sm:$0xff]   ;;  %v1111_v16 = vld [vmem:[%s1502_s0 + $0xb0] sm:$0xff]  }
  0x22   :  { %v309_v21 = vmax.f32 %v245_v14, 0.0  ;;  %v868_v24 = vunpack.c.l.bf16 %v1105_v12  ;;  %v248_v27 = vadd.f32 %v1192_v7, %v177_v19  ;;  %v249_v28 = vadd.f32 %v1192_v7, %v178_v20 }
  0x23   :  { %v310_v25 = vmax.f32 %v246_v17, 0.0  ;;  %v311_v26 = vmax.f32 %v247_v18, 0.0  ;;  %v180_v31 = vmul.f32 %v865_v22, %v1178_v1  ;;  %v250_v32 = vadd.f32 %v1192_v7, %v179_v23 }
  0x24   :  { %v993_v30 = vpack.c.bf16 %v309_v21, %v308_v15  ;;  %v869_v33 = vunpack.c.h.bf16 %v1105_v12  ;;  %v312_v36 = vmax.f32 %v248_v27, 0.0  ;;  %v313_v37 = vmax.f32 %v249_v28, 0.0  ;;  %v1112_v21 = vld [vmem:[%s1502_s0 + $0xb8] sm:$0xff]  }
  0x25   :  { %v998_v35 = vpack.c.bf16 %v311_v26, %v310_v25  ;;  %v181_v38 = vmul.f32 %v868_v24, %v1178_v1  ;;  %v251_v39 = vadd.f32 %v1192_v7, %v180_v31  ;;  %v314_v40 = vmax.f32 %v250_v32, 0.0 }
  0x26   :  { %1132 = vst [vmem:[%s1505_s3 + $0x60] sm:$0xff] %v993_v30   ;;  %v182_v41 = vmul.f32 %v869_v33, %v1178_v1  ;;  %v872_v42 = vunpack.c.l.bf16 %v1106_v29  ;;  %v1003_v44 = vpack.c.bf16 %v313_v37, %v312_v36  ;;  %v873_v46 = vunpack.c.h.bf16 %v1106_v29 }
  0x27   :  { %1133 = vst [vmem:[%s1505_s3 + $0x68] sm:$0xff] %v998_v35   ;;  %v252_v45 = vadd.f32 %v1192_v7, %v181_v38  ;;  %v876_v47 = vunpack.c.l.bf16 %v1107_v34  ;;  %v315_v48 = vmax.f32 %v251_v39, 0.0  ;;  %v877_v51 = vunpack.c.h.bf16 %v1107_v34  ;;  %v1113_v34 = vld [vmem:[%s1502_s0 + $0xc0] sm:$0xff]  }
  0x28   :  { %v253_v49 = vadd.f32 %v1192_v7, %v182_v41  ;;  %v183_v50 = vmul.f32 %v872_v42, %v1178_v1  ;;  %1134 = vst [vmem:[%s1505_s3 + $0x70] sm:$0xff] %v1003_v44   ;;  %v184_v53 = vmul.f32 %v873_v46, %v1178_v1  ;;  %v880_v55 = vunpack.c.l.bf16 %v1108_v43 }
  0x29   :  { %v316_v52 = vmax.f32 %v252_v45, 0.0  ;;  %v185_v54 = vmul.f32 %v876_v47, %v1178_v1  ;;  %v1008_v57 = vpack.c.bf16 %v315_v48, %v314_v40  ;;  %v186_v60 = vmul.f32 %v877_v51, %v1178_v1  ;;  %v1114_v47 = vld [vmem:[%s1502_s0 + $0xc8] sm:$0xff]  }
  0x2a   :  { %v317_v58 = vmax.f32 %v253_v49, 0.0  ;;  %v254_v59 = vadd.f32 %v1192_v7, %v183_v50  ;;  %v255_v61 = vadd.f32 %v1192_v7, %v184_v53  ;;  %v881_v63 = vunpack.c.h.bf16 %v1108_v43 }
  0x2b   :  { %v256_v62 = vadd.f32 %v1192_v7, %v185_v54  ;;  %v187_v0 = vmul.f32 %v880_v55, %v1178_v1  ;;  %1135 = vst [vmem:[%s1505_s3 + $0x78] sm:$0xff] %v1008_v57   ;;  %v257_v5 = vadd.f32 %v1192_v7, %v186_v60  ;;  %v884_v6 = vunpack.c.l.bf16 %v1109_v56 }
  0x2c   :  { %v1013_v3 = vpack.c.bf16 %v317_v58, %v316_v52  ;;  %v318_v4 = vmax.f32 %v254_v59, 0.0  ;;  %v319_v8 = vmax.f32 %v255_v61, 0.0  ;;  %v188_v10 = vmul.f32 %v881_v63, %v1178_v1  ;;  %v1115_v52 = vld [vmem:[%s1502_s0 + $0xd0] sm:$0xff]   ;;  %v1116_v61 = vld [vmem:[%s1502_s0 + $0xd8] sm:$0xff]  }
  0x2d   :  { %v320_v9 = vmax.f32 %v256_v62, 0.0  ;;  %v258_v11 = vadd.f32 %v1192_v7, %v187_v0  ;;  %v321_v12 = vmax.f32 %v257_v5, 0.0  ;;  %v885_v13 = vunpack.c.h.bf16 %v1109_v56 }
  0x2e   :  { %1136 = vst [vmem:[%s1505_s3 + $0x80] sm:$0xff] %v1013_v3   ;;  %v189_v14 = vmul.f32 %v884_v6, %v1178_v1  ;;  %v888_v15 = vunpack.c.l.bf16 %v1110_v2  ;;  %v1018_v17 = vpack.c.bf16 %v319_v8, %v318_v4  ;;  %v259_v18 = vadd.f32 %v1192_v7, %v188_v10 }
  0x2f   :  { %v322_v19 = vmax.f32 %v258_v11, 0.0  ;;  %v889_v20 = vunpack.c.h.bf16 %v1110_v2  ;;  %v1023_v22 = vpack.c.bf16 %v321_v12, %v320_v9  ;;  %v190_v23 = vmul.f32 %v885_v13, %v1178_v1  ;;  %v1117_v12 = vld [vmem:[%s1502_s0 + $0xe0] sm:$0xff]  }
  0x30   :  { %v260_v24 = vadd.f32 %v1192_v7, %v189_v14  ;;  %v191_v25 = vmul.f32 %v888_v15, %v1178_v1  ;;  %1137 = vst [vmem:[%s1505_s3 + $0x88] sm:$0xff] %v1018_v17   ;;  %v323_v26 = vmax.f32 %v259_v18, 0.0  ;;  %v892_v28 = vunpack.c.l.bf16 %v1111_v16 }
  0x31   :  { %v192_v27 = vmul.f32 %v889_v20, %v1178_v1  ;;  %v893_v29 = vunpack.c.h.bf16 %v1111_v16  ;;  %1138 = vst [vmem:[%s1505_s3 + $0x90] sm:$0xff] %v1023_v22   ;;  %v261_v30 = vadd.f32 %v1192_v7, %v190_v23  ;;  %v896_v33 = vunpack.c.l.bf16 %v1112_v21 }
  0x32   :  { %v324_v31 = vmax.f32 %v260_v24, 0.0  ;;  %v262_v32 = vadd.f32 %v1192_v7, %v191_v25  ;;  %v1028_v35 = vpack.c.bf16 %v323_v26, %v322_v19  ;;  %v193_v37 = vmul.f32 %v892_v28, %v1178_v1 }
  0x33   :  { %v263_v36 = vadd.f32 %v1192_v7, %v192_v27  ;;  %v194_v38 = vmul.f32 %v893_v29, %v1178_v1  ;;  %v325_v39 = vmax.f32 %v261_v30, 0.0  ;;  %v897_v41 = vunpack.c.h.bf16 %v1112_v21  ;;  %v1118_v21 = vld [vmem:[%s1502_s0 + $0xe8] sm:$0xff]  }
  0x34   :  { %v326_v40 = vmax.f32 %v262_v32, 0.0  ;;  %v195_v42 = vmul.f32 %v896_v33, %v1178_v1  ;;  %1139 = vst [vmem:[%s1505_s3 + $0x98] sm:$0xff] %v1028_v35   ;;  %v264_v44 = vadd.f32 %v1192_v7, %v193_v37  ;;  %v900_v46 = vunpack.c.l.bf16 %v1113_v34 }
  0x35   :  { %v327_v43 = vmax.f32 %v263_v36, 0.0  ;;  %v265_v45 = vadd.f32 %v1192_v7, %v194_v38  ;;  %v1033_v48 = vpack.c.bf16 %v325_v39, %v324_v31  ;;  %v196_v49 = vmul.f32 %v897_v41, %v1178_v1  ;;  %v1120_v39 = vld [vmem:[%s1502_s0 + $0xf8] sm:$0xff]  }
  0x36   :  { %v266_v50 = vadd.f32 %v1192_v7, %v195_v42  ;;  %v901_v51 = vunpack.c.h.bf16 %v1113_v34  ;;  %v328_v54 = vmax.f32 %v264_v44, 0.0  ;;  %v197_v56 = vmul.f32 %v900_v46, %v1178_v1  ;;  %v1119_v34 = vld [vmem:[%s1502_s0 + $0xf0] sm:$0xff]  }
  0x37   :  { %v1038_v53 = vpack.c.bf16 %v327_v43, %v326_v40  ;;  %v329_v55 = vmax.f32 %v265_v45, 0.0  ;;  %1140 = vst [vmem:[%s1505_s3 + $0xa0] sm:$0xff] %v1033_v48   ;;  %v267_v57 = vadd.f32 %v1192_v7, %v196_v49  ;;  %v904_v60 = vunpack.c.l.bf16 %v1114_v47 }
  0x38   :  { %v330_v58 = vmax.f32 %v266_v50, 0.0  ;;  %v198_v59 = vmul.f32 %v901_v51, %v1178_v1  ;;  %v268_v63 = vadd.f32 %v1192_v7, %v197_v56  ;;  %v905_v0 = vunpack.c.h.bf16 %v1114_v47 }
  0x39   :  { %1141 = vst [vmem:[%s1505_s3 + $0xa8] sm:$0xff] %v1038_v53   ;;  %v1043_v62 = vpack.c.bf16 %v329_v55, %v328_v54  ;;  %v908_v2 = vunpack.c.l.bf16 %v1115_v52  ;;  %v331_v3 = vmax.f32 %v267_v57, 0.0  ;;  %v199_v5 = vmul.f32 %v904_v60, %v1178_v1 }
  0x3a   :  { %v269_v4 = vadd.f32 %v1192_v7, %v198_v59  ;;  %v909_v6 = vunpack.c.h.bf16 %v1115_v52  ;;  %v332_v8 = vmax.f32 %v268_v63, 0.0  ;;  %v200_v9 = vmul.f32 %v905_v0, %v1178_v1 }
  0x3b   :  { %1142 = vst [vmem:[%s1505_s3 + $0xb0] sm:$0xff] %v1043_v62   ;;  %v201_v10 = vmul.f32 %v908_v2, %v1178_v1  ;;  %v912_v11 = vunpack.c.l.bf16 %v1116_v61  ;;  %v1048_v13 = vpack.c.bf16 %v331_v3, %v330_v58  ;;  %v270_v15 = vadd.f32 %v1192_v7, %v199_v5 }
  0x3c   :  { %v333_v14 = vmax.f32 %v269_v4, 0.0  ;;  %v202_v16 = vmul.f32 %v909_v6, %v1178_v1  ;;  %v271_v17 = vadd.f32 %v1192_v7, %v200_v9  ;;  %v913_v19 = vunpack.c.h.bf16 %v1116_v61 }
  0x3d   :  { %v272_v18 = vadd.f32 %v1192_v7, %v201_v10  ;;  %v203_v20 = vmul.f32 %v912_v11, %v1178_v1  ;;  %1143 = vst [vmem:[%s1505_s3 + $0xb8] sm:$0xff] %v1048_v13   ;;  %v334_v23 = vmax.f32 %v270_v15, 0.0  ;;  %v916_v25 = vunpack.c.l.bf16 %v1117_v12 }
  0x3e   :  { %v1053_v22 = vpack.c.bf16 %v333_v14, %v332_v8  ;;  %v273_v24 = vadd.f32 %v1192_v7, %v202_v16  ;;  %v335_v26 = vmax.f32 %v271_v17, 0.0  ;;  %v204_v28 = vmul.f32 %v913_v19, %v1178_v1 }
  0x3f   :  { %v336_v27 = vmax.f32 %v272_v18, 0.0  ;;  %v274_v29 = vadd.f32 %v1192_v7, %v203_v20  ;;  %v917_v31 = vunpack.c.h.bf16 %v1117_v12  ;;  %v205_v32 = vmul.f32 %v916_v25, %v1178_v1 }
  0x40   :  { %1144 = vst [vmem:[%s1505_s3 + $0xc0] sm:$0xff] %v1053_v22   ;;  %v337_v30 = vmax.f32 %v273_v24, 0.0  ;;  %v920_v33 = vunpack.c.l.bf16 %v1118_v21  ;;  %v1058_v35 = vpack.c.bf16 %v335_v26, %v334_v23  ;;  %v275_v36 = vadd.f32 %v1192_v7, %v204_v28 }
  0x41   :  { %v338_v37 = vmax.f32 %v274_v29, 0.0  ;;  %v921_v38 = vunpack.c.h.bf16 %v1118_v21  ;;  %v206_v41 = vmul.f32 %v917_v31, %v1178_v1  ;;  %v276_v42 = vadd.f32 %v1192_v7, %v205_v32 }
  0x42   :  { %v1063_v40 = vpack.c.bf16 %v337_v30, %v336_v27  ;;  %v207_v43 = vmul.f32 %v920_v33, %v1178_v1  ;;  %1145 = vst [vmem:[%s1505_s3 + $0xc8] sm:$0xff] %v1058_v35   ;;  %v339_v44 = vmax.f32 %v275_v36, 0.0  ;;  %v924_v46 = vunpack.c.l.bf16 %v1119_v34 }
  0x43   :  { %v208_v45 = vmul.f32 %v921_v38, %v1178_v1  ;;  %v925_v47 = vunpack.c.h.bf16 %v1119_v34  ;;  %v277_v48 = vadd.f32 %v1192_v7, %v206_v41  ;;  %v340_v49 = vmax.f32 %v276_v42, 0.0 }
  0x44   :  { %1146 = vst [vmem:[%s1505_s3 + $0xd0] sm:$0xff] %v1063_v40   ;;  %v278_v50 = vadd.f32 %v1192_v7, %v207_v43  ;;  %v928_v51 = vunpack.c.l.bf16 %v1120_v39  ;;  %v1068_v52 = vpack.c.bf16 %v339_v44, %v338_v37  ;;  %v209_v54 = vmul.f32 %v924_v46, %v1178_v1 }
  0x45   :  { %v279_v53 = vadd.f32 %v1192_v7, %v208_v45  ;;  %v210_v55 = vmul.f32 %v925_v47, %v1178_v1  ;;  %v341_v56 = vmax.f32 %v277_v48, 0.0  ;;  %v929_v58 = vunpack.c.h.bf16 %v1120_v39 }
  0x46   :  { %v342_v57 = vmax.f32 %v278_v50, 0.0  ;;  %v211_v59 = vmul.f32 %v928_v51, %v1178_v1  ;;  %1147 = vst [vmem:[%s1505_s3 + $0xd8] sm:$0xff] %v1068_v52   ;;  %v280_v61 = vadd.f32 %v1192_v7, %v209_v54 }
  0x47   :  { %v343_v60 = vmax.f32 %v279_v53, 0.0  ;;  %v281_v62 = vadd.f32 %v1192_v7, %v210_v55  ;;  %v1073_v63 = vpack.c.bf16 %v341_v56, %v340_v49  ;;  %v212_v0 = vmul.f32 %v929_v58, %v1178_v1 }
  0x48   :  { %v282_v2 = vadd.f32 %v1192_v7, %v211_v59  ;;  %v344_v4 = vmax.f32 %v280_v61, 0.0 }
  0x49   :  { %v1078_v3 = vpack.c.bf16 %v343_v60, %v342_v57  ;;  %v345_v5 = vmax.f32 %v281_v62, 0.0  ;;  %1148 = vst [vmem:[%s1505_s3 + $0xe0] sm:$0xff] %v1073_v63   ;;  %v283_v6 = vadd.f32 %v1192_v7, %v212_v0 }
  0x4a   :  { %v346_v8 = vmax.f32 %v282_v2, 0.0 }
  0x4b   :  { %1149 = vst [vmem:[%s1505_s3 + $0xe8] sm:$0xff] %v1078_v3   ;;  %v1083_v9 = vpack.c.bf16 %v345_v5, %v344_v4  ;;  %v347_v10 = vmax.f32 %v283_v6, 0.0 }
  0x4d   :  { %1150 = vst [vmem:[%s1505_s3 + $0xf0] sm:$0xff] %v1083_v9   ;;  %v1088_v1 = vpack.c.bf16 %v347_v10, %v346_v8 }
  0x4f   :  { %1151 = vst [vmem:[%s1505_s3 + $0xf8] sm:$0xff] %v1088_v1  }

// kernel: block_forward.5
= control target key start
LH: loop header
LB: loop body
LE: loop exit
PB: predicated region body
PF: predicated region fallthrough
CT: control target
= control target key end

     0   :  { %v2060_v40 = vmov 0.0   ;;  %s2516_s1 = inlined_call_operand.vmem [shape: bf16[128,128], index: 1, kind: input, shape index: {}]   ;;  %s2517_s0 = inlined_call_operand.vmem [shape: bf16[512,128], index: 0, kind: input, shape index: {}]   ;;  %s2518_s4 = inlined_call_operand.vmem [shape: bf16[512,128], index: 4, kind: output, shape index: {0}]   ;;  %s2519_s2 = inlined_call_operand.vmem [shape: f32[1,128], index: 2, kind: input, shape index: {}]   ;;  %s2520_s3 = inlined_call_operand.vmem [shape: f32[1,128], index: 3, kind: input, shape index: {}]   ;;  %s2521_s5 = inlined_call_operand.vmem [shape: f32[1,128], index: 5, kind: output, shape index: {1}]   ;;  %s2522_s6 = inlined_call_operand.vmem [shape: f32[1,128], index: 6, kind: output, shape index: {2}]  }
   0x1   :  { %v2018_v0 = vld [vmem:[%s2516_s1] sm:$0xff]   ;;  %v2019_v1 = vld [vmem:[%s2516_s1 + $0x8] sm:$0xff]   ;;  %v2020_v2 = vld [vmem:[%s2516_s1 + $0x10] sm:$0xff]   ;;  %27 = vst [vmem:[#allocation3] sm:$0x1] %v2060_v40 }
   0x2   :  { %1921 = vmatprep.subr.bf16.mxu0 %v2018_v0  ;;  %2001 = vmatprep.subr.bf16.mxu1 %v2018_v0  ;;  %v2021_v3 = vld [vmem:[%s2516_s1 + $0x18] sm:$0xff]   ;;  %v2026_v4 = vld [vmem:[%s2517_s0] sm:$0xff]   ;;  %v2023_v6 = vld [vmem:[%s2516_s1 + $0x28] sm:$0xff]   ;;  %28 = vst [vmem:[#allocation4] sm:$0x1] %v2060_v40 }
   0x3   :  { %1922 = vmatpush3.bf16.msra.mxu0 %v2018_v0  ;;  %2009 = vmatpush3.bf16.msra.mxu1 %v2018_v0  ;;  %v2022_v5 = vld [vmem:[%s2516_s1 + $0x20] sm:$0xff]   ;;  %v2024_v7 = vld [vmem:[%s2516_s1 + $0x30] sm:$0xff]   ;;  %v2025_v8 = vld [vmem:[%s2516_s1 + $0x38] sm:$0xff]  }
   0x4   :  { %1923 = vmatprep.subr.bf16.mxu0 %v2019_v1  ;;  %2002 = vmatprep.subr.bf16.mxu1 %v2019_v1  ;;  %v2042_v9 = vld [vmem:[%s2517_s0 + $0x80] sm:$0xff]   ;;  %v2027_v10 = vld [vmem:[%s2517_s0 + $0x8] sm:$0xff]   ;;  %v2028_v11 = vld [vmem:[%s2517_s0 + $0x10] sm:$0xff]  }
   0x5   :  { %1937 = vmatprep.mubr.bf16.mxu0 %v2026_v4  ;;  %1969 = vmatprep.mubr.bf16.mxu1 %v2042_v9  ;;  %v2043_v12 = vld [vmem:[%s2517_s0 + $0x88] sm:$0xff]   ;;  %v2044_v13 = vld [vmem:[%s2517_s0 + $0x90] sm:$0xff]   ;;  %v2029_v14 = vld [vmem:[%s2517_s0 + $0x18] sm:$0xff]  }
   0x6   :  { %v2030_v15 = vld [vmem:[%s2517_s0 + $0x20] sm:$0xff]   ;;  %v2045_v16 = vld [vmem:[%s2517_s0 + $0x98] sm:$0xff]   ;;  %v2031_v18 = vld [vmem:[%s2517_s0 + $0x28] sm:$0xff]  }
   0x7   :  { %1924 = vmatpush3.bf16.msra.mxu0 %v2019_v1  ;;  %2010 = vmatpush3.bf16.msra.mxu1 %v2019_v1  ;;  %v2046_v17 = vld [vmem:[%s2517_s0 + $0xa0] sm:$0xff]   ;;  %v2047_v19 = vld [vmem:[%s2517_s0 + $0xa8] sm:$0xff]   ;;  %v2032_v20 = vld [vmem:[%s2517_s0 + $0x30] sm:$0xff]  }
   0x8   :  { %1925 = vmatprep.subr.bf16.mxu0 %v2020_v2  ;;  %2003 = vmatprep.subr.bf16.mxu1 %v2020_v2  ;;  %v2048_v21 = vld [vmem:[%s2517_s0 + $0xb0] sm:$0xff]   ;;  %v2033_v22 = vld [vmem:[%s2517_s0 + $0x38] sm:$0xff]   ;;  %v2034_v24 = vld [vmem:[%s2517_s0 + $0x40] sm:$0xff]  }
   0x9   :  { %v2049_v23 = vld [vmem:[%s2517_s0 + $0xb8] sm:$0xff]   ;;  %v2050_v25 = vld [vmem:[%s2517_s0 + $0xc0] sm:$0xff]   ;;  %v2035_v26 = vld [vmem:[%s2517_s0 + $0x48] sm:$0xff]  }
   0xa   :  { %v2051_v27 = vld [vmem:[%s2517_s0 + $0xc8] sm:$0xff]   ;;  %v2036_v28 = vld [vmem:[%s2517_s0 + $0x50] sm:$0xff]   ;;  %v2037_v30 = vld [vmem:[%s2517_s0 + $0x58] sm:$0xff]  }
   0xb   :  { %1926 = vmatpush3.bf16.msra.mxu0 %v2020_v2  ;;  %2011 = vmatpush3.bf16.msra.mxu1 %v2020_v2  ;;  %v2052_v29 = vld [vmem:[%s2517_s0 + $0xd0] sm:$0xff]   ;;  %v2053_v31 = vld [vmem:[%s2517_s0 + $0xd8] sm:$0xff]   ;;  %v2038_v32 = vld [vmem:[%s2517_s0 + $0x60] sm:$0xff]  }
   0xc   :  { %1927 = vmatprep.subr.bf16.mxu0 %v2021_v3  ;;  %2004 = vmatprep.subr.bf16.mxu1 %v2021_v3  ;;  %v2054_v33 = vld [vmem:[%s2517_s0 + $0xe0] sm:$0xff]   ;;  %v2039_v34 = vld [vmem:[%s2517_s0 + $0x68] sm:$0xff]   ;;  %v2040_v36 = vld [vmem:[%s2517_s0 + $0x70] sm:$0xff]  }
   0xd   :  { %v2055_v35 = vld [vmem:[%s2517_s0 + $0xe8] sm:$0xff]   ;;  %v2056_v37 = vld [vmem:[%s2517_s0 + $0xf0] sm:$0xff]   ;;  %v2041_v38 = vld [vmem:[%s2517_s0 + $0x78] sm:$0xff]  }
   0xe   :  { %v2057_v39 = vld [vmem:[%s2517_s0 + $0xf8] sm:$0xff]  }
   0xf   :  { %1928 = vmatpush3.bf16.msra.mxu0 %v2021_v3  ;;  %2012 = vmatpush3.bf16.msra.mxu1 %v2021_v3 }
  0x10   :  { %1929 = vmatprep.subr.bf16.mxu0 %v2022_v5  ;;  %2005 = vmatprep.subr.bf16.mxu1 %v2022_v5 }
  0x13   :  { %1930 = vmatpush3.bf16.msra.mxu0 %v2022_v5  ;;  %2013 = vmatpush3.bf16.msra.mxu1 %v2022_v5 }
  0x14   :  { %1931 = vmatprep.subr.bf16.mxu0 %v2023_v6  ;;  %2006 = vmatprep.subr.bf16.mxu1 %v2023_v6 }
  0x17   :  { %1932 = vmatpush3.bf16.msra.mxu0 %v2023_v6  ;;  %2014 = vmatpush3.bf16.msra.mxu1 %v2023_v6 }
  0x18   :  { %1933 = vmatprep.subr.bf16.mxu0 %v2024_v7  ;;  %2007 = vmatprep.subr.bf16.mxu1 %v2024_v7 }
  0x1b   :  { %1934 = vmatpush3.bf16.msra.mxu0 %v2024_v7  ;;  %2015 = vmatpush3.bf16.msra.mxu1 %v2024_v7 }
  0x1c   :  { %1935 = vmatprep.subr.bf16.mxu0 %v2025_v8  ;;  %2008 = vmatprep.subr.bf16.mxu1 %v2025_v8 }
  0x1f   :  { %1936 = vmatpush3.bf16.msra.mxu0 %v2025_v8  ;;  %2016 = vmatpush3.bf16.msra.mxu1 %v2025_v8 }
  0x22   :  { %1938 = vmatmul.mubr.bf16.vlgmr.msra.gmra.mrb[0].mxu0 %v2027_v10  ;;  %1970 = vmatmul.mubr.bf16.vlgmr.msra.gmra.mrb[0].mxu1 %v2043_v12 }
  0x23   :  { %1941 = vmatprep.mubr.bf16.mxu0 %v2028_v11  ;;  %1973 = vmatprep.mubr.bf16.mxu1 %v2044_v13 }
  0x2a   :  { %1942 = vmatmul.mubr.bf16.gmra.mrb[4].mxu0 %v2029_v14  ;;  %1974 = vmatmul.mubr.bf16.gmra.mrb[4].mxu1 %v2045_v16 }
  0x2b   :  { %1945 = vmatprep.mubr.bf16.mxu0 %v2030_v15  ;;  %1977 = vmatprep.mubr.bf16.mxu1 %v2046_v17 }
  0x32   :  { %1946 = vmatmul.mubr.bf16.gmra.mrb[8].mxu0 %v2031_v18  ;;  %1978 = vmatmul.mubr.bf16.gmra.mrb[8].mxu1 %v2047_v19 }
  0x33   :  { %1949 = vmatprep.mubr.bf16.mxu0 %v2032_v20  ;;  %1981 = vmatprep.mubr.bf16.mxu1 %v2048_v21 }
  0x3a   :  { %1950 = vmatmul.mubr.bf16.gmra.mrb[12].mxu0 %v2033_v22  ;;  %1982 = vmatmul.mubr.bf16.gmra.mrb[12].mxu1 %v2049_v23 }
  0x3b   :  { %1953 = vmatprep.mubr.bf16.mxu0 %v2034_v24  ;;  %1985 = vmatprep.mubr.bf16.mxu1 %v2050_v25 }
  0x42   :  { %1954 = vmatmul.mubr.bf16.gmra.mrb[16].mxu0 %v2035_v26  ;;  %1986 = vmatmul.mubr.bf16.gmra.mrb[16].mxu1 %v2051_v27 }
  0x43   :  { %1957 = vmatprep.mubr.bf16.mxu0 %v2036_v28  ;;  %1989 = vmatprep.mubr.bf16.mxu1 %v2052_v29 }
  0x4a   :  { %1958 = vmatmul.mubr.bf16.gmra.mrb[20].mxu0 %v2037_v30  ;;  %1990 = vmatmul.mubr.bf16.gmra.mrb[20].mxu1 %v2053_v31 }
  0x4b   :  { %1961 = vmatprep.mubr.bf16.mxu0 %v2038_v32  ;;  %1993 = vmatprep.mubr.bf16.mxu1 %v2054_v33 }
  0x52   :  { %1962 = vmatmul.mubr.bf16.gmra.mrb[24].mxu0 %v2039_v34  ;;  %1994 = vmatmul.mubr.bf16.gmra.mrb[24].mxu1 %v2055_v35 }
  0x53   :  { %1965 = vmatprep.mubr.bf16.mxu0 %v2040_v36  ;;  %1997 = vmatprep.mubr.bf16.mxu1 %v2056_v37 }
  0x5a   :  { %1966 = vmatmul.mubr.bf16.gmra.mrb[28].mxu0 %v2041_v38  ;;  %1998 = vmatmul.mubr.bf16.gmra.mrb[28].mxu1 %v2057_v39 }
  0xf5   :  { %v1939_v41 = vpop.f32.mrb[0].mxu0  ;;  %v2216_v42 = vpop.f32.mrb[0].mxu1 }
  0xf6   :  { %v514_v43 = vpop.f32.mrb[1].mxu0  ;;  %v2218_v44 = vpop.f32.mrb[1].mxu1  ;;  %v1359_v56 = vmul.f32 %v1939_v41, %v1939_v41 }
  0xf7   :  { %v1940_v45 = vpop.f32.mrb[2].mxu0  ;;  %v2220_v46 = vpop.f32.mrb[2].mxu1  ;;  %v1357_v47 = vmul.f32 %v514_v43, %v514_v43 }
  0xf8   :  { %v1698_v48 = vpack.c.bf16 %v1940_v45, %v1939_v41  ;;  %v517_v49 = vpop.f32.mrb[3].mxu0  ;;  %v1778_v50 = vpack.c.bf16 %v2220_v46, %v2216_v42  ;;  %v2224_v51 = vpop.f32.mrb[3].mxu1  ;;  %v1360_v59 = vmul.f32 %v1940_v45, %v1940_v45 }
  0xf9   :  { %v1693_v52 = vpack.c.bf16 %v517_v49, %v514_v43  ;;  %v1285_v53 = vadd.f32 %v517_v49, %v514_v43  ;;  %v1358_v54 = vmul.f32 %v517_v49, %v517_v49  ;;  %v1773_v55 = vpack.c.bf16 %v2224_v51, %v2218_v44 }
  0xfa   :  { %1850 = vst [vmem:[%s2518_s4 + $0x8] sm:$0xff] %v1698_v48   ;;  %1866 = vst [vmem:[%s2518_s4 + $0x88] sm:$0xff] %v1778_v50  }
  0xfb   :  { %1694 = vst [vmem:[%s2518_s4] sm:$0xff] %v1693_v52   ;;  %v1286_v57 = vadd.f32 %v1939_v41, %v1285_v53  ;;  %v1421_v58 = vadd.f32 %v1358_v54, %v1357_v47  ;;  %1865 = vst [vmem:[%s2518_s4 + $0x80] sm:$0xff] %v1773_v55  }
  0xfd   :  { %v1422_v60 = vadd.f32 %v1421_v58, %v1359_v56  ;;  %v1943_v61 = vpop.f32.mrb[4].mxu0  ;;  %v1287_v62 = vadd.f32 %v1940_v45, %v1286_v57  ;;  %v2240_v63 = vpop.f32.mrb[4].mxu1 }
  0xfe   :  { %v530_v0 = vpop.f32.mrb[5].mxu0  ;;  %v2242_v1 = vpop.f32.mrb[5].mxu1  ;;  %v1363_v16 = vmul.f32 %v1943_v61, %v1943_v61 }
  0xff   :  { %v1288_v2 = vadd.f32 %v1287_v62, %v530_v0  ;;  %v1361_v3 = vmul.f32 %v530_v0, %v530_v0  ;;  %v1423_v4 = vadd.f32 %v1422_v60, %v1360_v59  ;;  %v1944_v5 = vpop.f32.mrb[6].mxu0  ;;  %v2244_v6 = vpop.f32.mrb[6].mxu1 }
 0x100   :  { %v1708_v7 = vpack.c.bf16 %v1944_v5, %v1943_v61  ;;  %v533_v8 = vpop.f32.mrb[7].mxu0  ;;  %v1788_v9 = vpack.c.bf16 %v2244_v6, %v2240_v63  ;;  %v2248_v10 = vpop.f32.mrb[7].mxu1  ;;  %v1364_v19 = vmul.f32 %v1944_v5, %v1944_v5 }
 0x101   :  { %v1424_v11 = vadd.f32 %v1423_v4, %v1361_v3  ;;  %v1703_v12 = vpack.c.bf16 %v533_v8, %v530_v0  ;;  %v1289_v13 = vadd.f32 %v1288_v2, %v533_v8  ;;  %v1362_v14 = vmul.f32 %v533_v8, %v533_v8 }
 0x102   :  { %1852 = vst [vmem:[%s2518_s4 + $0x18] sm:$0xff] %v1708_v7   ;;  %1868 = vst [vmem:[%s2518_s4 + $0x98] sm:$0xff] %v1788_v9   ;;  %v1783_v15 = vpack.c.bf16 %v2248_v10, %v2242_v1 }
 0x103   :  { %1851 = vst [vmem:[%s2518_s4 + $0x10] sm:$0xff] %v1703_v12   ;;  %v1290_v17 = vadd.f32 %v1943_v61, %v1289_v13  ;;  %v1425_v18 = vadd.f32 %v1424_v11, %v1362_v14 }
 0x104   :  { %1867 = vst [vmem:[%s2518_s4 + $0x90] sm:$0xff] %v1783_v15  }
 0x105   :  { %v1426_v20 = vadd.f32 %v1425_v18, %v1363_v16  ;;  %v1947_v21 = vpop.f32.mrb[8].mxu0  ;;  %v1291_v22 = vadd.f32 %v1944_v5, %v1290_v17  ;;  %v2264_v23 = vpop.f32.mrb[8].mxu1 }
 0x106   :  { %v546_v24 = vpop.f32.mrb[9].mxu0  ;;  %v2266_v25 = vpop.f32.mrb[9].mxu1  ;;  %v1367_v40 = vmul.f32 %v1947_v21, %v1947_v21 }
 0x107   :  { %v1292_v26 = vadd.f32 %v1291_v22, %v546_v24  ;;  %v1365_v27 = vmul.f32 %v546_v24, %v546_v24  ;;  %v1427_v28 = vadd.f32 %v1426_v20, %v1364_v19  ;;  %v1948_v29 = vpop.f32.mrb[10].mxu0  ;;  %v2268_v30 = vpop.f32.mrb[10].mxu1 }
 0x108   :  { %v1718_v31 = vpack.c.bf16 %v1948_v29, %v1947_v21  ;;  %v549_v32 = vpop.f32.mrb[11].mxu0  ;;  %v1798_v33 = vpack.c.bf16 %v2268_v30, %v2264_v23  ;;  %v2272_v34 = vpop.f32.mrb[11].mxu1  ;;  %v1368_v45 = vmul.f32 %v1948_v29, %v1948_v29 }
 0x109   :  { %v1428_v35 = vadd.f32 %v1427_v28, %v1365_v27  ;;  %v1713_v36 = vpack.c.bf16 %v549_v32, %v546_v24  ;;  %v1293_v37 = vadd.f32 %v1292_v26, %v549_v32  ;;  %v1366_v38 = vmul.f32 %v549_v32, %v549_v32 }
 0x10a   :  { %1854 = vst [vmem:[%s2518_s4 + $0x28] sm:$0xff] %v1718_v31   ;;  %1870 = vst [vmem:[%s2518_s4 + $0xa8] sm:$0xff] %v1798_v33   ;;  %v1793_v39 = vpack.c.bf16 %v2272_v34, %v2266_v25 }
 0x10b   :  { %1853 = vst [vmem:[%s2518_s4 + $0x20] sm:$0xff] %v1713_v36   ;;  %v1294_v41 = vadd.f32 %v1947_v21, %v1293_v37  ;;  %v1429_v43 = vadd.f32 %v1428_v35, %v1366_v38 }
 0x10c   :  { %1869 = vst [vmem:[%s2518_s4 + $0xa0] sm:$0xff] %v1793_v39  }
 0x10d   :  { %v1430_v47 = vadd.f32 %v1429_v43, %v1367_v40  ;;  %v1951_v48 = vpop.f32.mrb[12].mxu0  ;;  %v1295_v49 = vadd.f32 %v1948_v29, %v1294_v41  ;;  %v2288_v50 = vpop.f32.mrb[12].mxu1 }
 0x10e   :  { %v562_v52 = vpop.f32.mrb[13].mxu0  ;;  %v2290_v53 = vpop.f32.mrb[13].mxu1  ;;  %v1371_v7 = vmul.f32 %v1951_v48, %v1951_v48 }
 0x10f   :  { %v1296_v54 = vadd.f32 %v1295_v49, %v562_v52  ;;  %v1369_v55 = vmul.f32 %v562_v52, %v562_v52  ;;  %v1431_v56 = vadd.f32 %v1430_v47, %v1368_v45  ;;  %v1952_v57 = vpop.f32.mrb[14].mxu0  ;;  %v2292_v58 = vpop.f32.mrb[14].mxu1 }
 0x110   :  { %v1728_v59 = vpack.c.bf16 %v1952_v57, %v1951_v48  ;;  %v565_v60 = vpop.f32.mrb[15].mxu0  ;;  %v1808_v61 = vpack.c.bf16 %v2292_v58, %v2288_v50  ;;  %v2296_v62 = vpop.f32.mrb[15].mxu1  ;;  %v1372_v11 = vmul.f32 %v1952_v57, %v1952_v57 }
 0x111   :  { %v1432_v0 = vadd.f32 %v1431_v56, %v1369_v55  ;;  %v1723_v2 = vpack.c.bf16 %v565_v60, %v562_v52  ;;  %v1297_v3 = vadd.f32 %v1296_v54, %v565_v60  ;;  %v1370_v4 = vmul.f32 %v565_v60, %v565_v60 }
 0x112   :  { %1856 = vst [vmem:[%s2518_s4 + $0x38] sm:$0xff] %v1728_v59   ;;  %1872 = vst [vmem:[%s2518_s4 + $0xb8] sm:$0xff] %v1808_v61   ;;  %v1803_v5 = vpack.c.bf16 %v2296_v62, %v2290_v53 }
 0x113   :  { %1855 = vst [vmem:[%s2518_s4 + $0x30] sm:$0xff] %v1723_v2   ;;  %v1298_v8 = vadd.f32 %v1951_v48, %v1297_v3  ;;  %v1433_v9 = vadd.f32 %v1432_v0, %v1370_v4 }
 0x114   :  { %1871 = vst [vmem:[%s2518_s4 + $0xb0] sm:$0xff] %v1803_v5  }
 0x115   :  { %v1434_v12 = vadd.f32 %v1433_v9, %v1371_v7  ;;  %v1955_v13 = vpop.f32.mrb[16].mxu0  ;;  %v1299_v14 = vadd.f32 %v1952_v57, %v1298_v8  ;;  %v2312_v15 = vpop.f32.mrb[16].mxu1 }
 0x116   :  { %v578_v16 = vpop.f32.mrb[17].mxu0  ;;  %v2314_v17 = vpop.f32.mrb[17].mxu1  ;;  %v1375_v36 = vmul.f32 %v1955_v13, %v1955_v13 }
 0x117   :  { %v1300_v18 = vadd.f32 %v1299_v14, %v578_v16  ;;  %v1373_v19 = vmul.f32 %v578_v16, %v578_v16  ;;  %v1435_v20 = vadd.f32 %v1434_v12, %v1372_v11  ;;  %v1956_v21 = vpop.f32.mrb[18].mxu0  ;;  %v2316_v22 = vpop.f32.mrb[18].mxu1 }
 0x118   :  { %v1738_v24 = vpack.c.bf16 %v1956_v21, %v1955_v13  ;;  %v581_v26 = vpop.f32.mrb[19].mxu0  ;;  %v1818_v27 = vpack.c.bf16 %v2316_v22, %v2312_v15  ;;  %v2320_v28 = vpop.f32.mrb[19].mxu1  ;;  %v1376_v39 = vmul.f32 %v1956_v21, %v1956_v21 }
 0x119   :  { %v1436_v29 = vadd.f32 %v1435_v20, %v1373_v19  ;;  %v1733_v31 = vpack.c.bf16 %v581_v26, %v578_v16  ;;  %v1301_v32 = vadd.f32 %v1300_v18, %v581_v26  ;;  %v1374_v33 = vmul.f32 %v581_v26, %v581_v26 }
 0x11a   :  { %1858 = vst [vmem:[%s2518_s4 + $0x48] sm:$0xff] %v1738_v24   ;;  %1874 = vst [vmem:[%s2518_s4 + $0xc8] sm:$0xff] %v1818_v27   ;;  %v1813_v35 = vpack.c.bf16 %v2320_v28, %v2314_v17 }
 0x11b   :  { %1857 = vst [vmem:[%s2518_s4 + $0x40] sm:$0xff] %v1733_v31   ;;  %v1302_v37 = vadd.f32 %v1955_v13, %v1301_v32  ;;  %v1437_v38 = vadd.f32 %v1436_v29, %v1374_v33 }
 0x11c   :  { %1873 = vst [vmem:[%s2518_s4 + $0xc0] sm:$0xff] %v1813_v35  }
 0x11d   :  { %v1438_v40 = vadd.f32 %v1437_v38, %v1375_v36  ;;  %v1959_v41 = vpop.f32.mrb[20].mxu0  ;;  %v1303_v43 = vadd.f32 %v1956_v21, %v1302_v37  ;;  %v2336_v45 = vpop.f32.mrb[20].mxu1 }
 0x11e   :  { %v594_v47 = vpop.f32.mrb[21].mxu0  ;;  %v2338_v48 = vpop.f32.mrb[21].mxu1  ;;  %v1379_v7 = vmul.f32 %v1959_v41, %v1959_v41 }
 0x11f   :  { %v1304_v49 = vadd.f32 %v1303_v43, %v594_v47  ;;  %v1377_v52 = vmul.f32 %v594_v47, %v594_v47  ;;  %v1439_v54 = vadd.f32 %v1438_v40, %v1376_v39  ;;  %v1960_v55 = vpop.f32.mrb[22].mxu0  ;;  %v2340_v56 = vpop.f32.mrb[22].mxu1 }
 0x120   :  { %v1748_v57 = vpack.c.bf16 %v1960_v55, %v1959_v41  ;;  %v597_v59 = vpop.f32.mrb[23].mxu0  ;;  %v1828_v60 = vpack.c.bf16 %v2340_v56, %v2336_v45  ;;  %v2344_v61 = vpop.f32.mrb[23].mxu1  ;;  %v1380_v11 = vmul.f32 %v1960_v55, %v1960_v55 }
 0x121   :  { %v1440_v0 = vadd.f32 %v1439_v54, %v1377_v52  ;;  %v1743_v2 = vpack.c.bf16 %v597_v59, %v594_v47  ;;  %v1305_v3 = vadd.f32 %v1304_v49, %v597_v59  ;;  %v1378_v4 = vmul.f32 %v597_v59, %v597_v59 }
 0x122   :  { %1860 = vst [vmem:[%s2518_s4 + $0x58] sm:$0xff] %v1748_v57   ;;  %1876 = vst [vmem:[%s2518_s4 + $0xd8] sm:$0xff] %v1828_v60   ;;  %v1823_v5 = vpack.c.bf16 %v2344_v61, %v2338_v48 }
 0x123   :  { %1859 = vst [vmem:[%s2518_s4 + $0x50] sm:$0xff] %v1743_v2   ;;  %v1306_v8 = vadd.f32 %v1959_v41, %v1305_v3  ;;  %v1441_v9 = vadd.f32 %v1440_v0, %v1378_v4 }
 0x124   :  { %1875 = vst [vmem:[%s2518_s4 + $0xd0] sm:$0xff] %v1823_v5  }
 0x125   :  { %v1442_v12 = vadd.f32 %v1441_v9, %v1379_v7  ;;  %v1963_v13 = vpop.f32.mrb[24].mxu0  ;;  %v1307_v14 = vadd.f32 %v1960_v55, %v1306_v8  ;;  %v2360_v16 = vpop.f32.mrb[24].mxu1 }
 0x126   :  { %v610_v18 = vpop.f32.mrb[25].mxu0  ;;  %v2362_v19 = vpop.f32.mrb[25].mxu1  ;;  %v1383_v40 = vmul.f32 %v1963_v13, %v1963_v13 }
 0x127   :  { %v1308_v20 = vadd.f32 %v1307_v14, %v610_v18  ;;  %v1381_v21 = vmul.f32 %v610_v18, %v610_v18  ;;  %v1443_v24 = vadd.f32 %v1442_v12, %v1380_v11  ;;  %v1964_v26 = vpop.f32.mrb[26].mxu0  ;;  %v2364_v27 = vpop.f32.mrb[26].mxu1 }
 0x128   :  { %v1758_v29 = vpack.c.bf16 %v1964_v26, %v1963_v13  ;;  %v613_v31 = vpop.f32.mrb[27].mxu0  ;;  %v1838_v32 = vpack.c.bf16 %v2364_v27, %v2360_v16  ;;  %v2368_v33 = vpop.f32.mrb[27].mxu1  ;;  %v1384_v47 = vmul.f32 %v1964_v26, %v1964_v26 }
 0x129   :  { %v1444_v35 = vadd.f32 %v1443_v24, %v1381_v21  ;;  %v1753_v36 = vpack.c.bf16 %v613_v31, %v610_v18  ;;  %v1309_v37 = vadd.f32 %v1308_v20, %v613_v31  ;;  %v1382_v38 = vmul.f32 %v613_v31, %v613_v31 }
 0x12a   :  { %1862 = vst [vmem:[%s2518_s4 + $0x68] sm:$0xff] %v1758_v29   ;;  %1878 = vst [vmem:[%s2518_s4 + $0xe8] sm:$0xff] %v1838_v32   ;;  %v1833_v39 = vpack.c.bf16 %v2368_v33, %v2362_v19  ;;  %v1389_v32 = vmul.f32 %v2218_v44, %v2218_v44 }
 0x12b   :  { %1861 = vst [vmem:[%s2518_s4 + $0x60] sm:$0xff] %v1753_v36   ;;  %v1310_v41 = vadd.f32 %v1963_v13, %v1309_v37  ;;  %v1445_v43 = vadd.f32 %v1444_v35, %v1382_v38 }
 0x12c   :  { %1877 = vst [vmem:[%s2518_s4 + $0xe0] sm:$0xff] %v1833_v39   ;;  %v1390_v39 = vmul.f32 %v2224_v51, %v2224_v51 }
 0x12d   :  { %v1446_v49 = vadd.f32 %v1445_v43, %v1383_v40  ;;  %v1967_v52 = vpop.f32.mrb[28].mxu0  ;;  %v1311_v54 = vadd.f32 %v1964_v26, %v1310_v41  ;;  %v2384_v55 = vpop.f32.mrb[28].mxu1  ;;  %v1391_v40 = vmul.f32 %v2216_v42, %v2216_v42 }
 0x12e   :  { %v626_v57 = vpop.f32.mrb[29].mxu0  ;;  %v2386_v59 = vpop.f32.mrb[29].mxu1  ;;  %v1387_v20 = vmul.f32 %v1967_v52, %v1967_v52 }
 0x12f   :  { %v1312_v60 = vadd.f32 %v1311_v54, %v626_v57  ;;  %v1385_v0 = vmul.f32 %v626_v57, %v626_v57  ;;  %v1447_v2 = vadd.f32 %v1446_v49, %v1384_v47  ;;  %v1968_v3 = vpop.f32.mrb[30].mxu0  ;;  %v2388_v4 = vpop.f32.mrb[30].mxu1  ;;  %v1392_v47 = vmul.f32 %v2220_v46, %v2220_v46 }
 0x130   :  { %v1768_v5 = vpack.c.bf16 %v1968_v3, %v1967_v52  ;;  %v629_v7 = vpop.f32.mrb[31].mxu0  ;;  %v1848_v8 = vpack.c.bf16 %v2388_v4, %v2384_v55  ;;  %v2392_v9 = vpop.f32.mrb[31].mxu1  ;;  %v1388_v26 = vmul.f32 %v1968_v3, %v1968_v3 }
 0x131   :  { %v1448_v11 = vadd.f32 %v1447_v2, %v1385_v0  ;;  %v1763_v12 = vpack.c.bf16 %v629_v7, %v626_v57  ;;  %v1313_v13 = vadd.f32 %v1312_v60, %v629_v7  ;;  %v1386_v14 = vmul.f32 %v629_v7, %v629_v7 }
 0x132   :  { %1864 = vst [vmem:[%s2518_s4 + $0x78] sm:$0xff] %v1768_v5   ;;  %1880 = vst [vmem:[%s2518_s4 + $0xf8] sm:$0xff] %v1848_v8   ;;  %v1843_v18 = vpack.c.bf16 %v2392_v9, %v2386_v59  ;;  %v1394_v0 = vmul.f32 %v2248_v10, %v2248_v10 }
 0x133   :  { %1863 = vst [vmem:[%s2518_s4 + $0x70] sm:$0xff] %v1763_v12   ;;  %v1314_v21 = vadd.f32 %v1967_v52, %v1313_v13  ;;  %v1449_v24 = vadd.f32 %v1448_v11, %v1386_v14  ;;  %v1398_v13 = vmul.f32 %v2272_v34, %v2272_v34 }
 0x134   :  { %1879 = vst [vmem:[%s2518_s4 + $0xf0] sm:$0xff] %v1843_v18  }
 0x135   :  { %v1450_v29 = vadd.f32 %v1449_v24, %v1387_v20  ;;  %v1315_v31 = vadd.f32 %v1968_v3, %v1314_v21 }
 0x137   :  { %v1316_v35 = vadd.f32 %v1315_v31, %v2218_v44  ;;  %v1451_v36 = vadd.f32 %v1450_v29, %v1388_v26  ;;  %v1393_v44 = vmul.f32 %v2242_v1, %v2242_v1  ;;  %v1402_v31 = vmul.f32 %v2296_v62, %v2296_v62 }
 0x139   :  { %v1452_v37 = vadd.f32 %v1451_v36, %v1389_v32  ;;  %v1317_v38 = vadd.f32 %v1316_v35, %v2224_v51 }
 0x13b   :  { %v1318_v41 = vadd.f32 %v2216_v42, %v1317_v38  ;;  %v1453_v43 = vadd.f32 %v1452_v37, %v1390_v39  ;;  %v1395_v42 = vmul.f32 %v2240_v63, %v2240_v63 }
 0x13d   :  { %v1454_v49 = vadd.f32 %v1453_v43, %v1391_v40  ;;  %v1319_v52 = vadd.f32 %v2220_v46, %v1318_v41  ;;  %v1396_v46 = vmul.f32 %v2244_v6, %v2244_v6  ;;  %v1406_v41 = vmul.f32 %v2320_v28, %v2320_v28 }
 0x13f   :  { %v1320_v54 = vadd.f32 %v1319_v52, %v2242_v1  ;;  %v1455_v57 = vadd.f32 %v1454_v49, %v1392_v47  ;;  %v1397_v1 = vmul.f32 %v2266_v25, %v2266_v25 }
 0x141   :  { %v1456_v60 = vadd.f32 %v1455_v57, %v1393_v44  ;;  %v1321_v51 = vadd.f32 %v1320_v54, %v2248_v10 }
 0x143   :  { %v1322_v2 = vadd.f32 %v2240_v63, %v1321_v51  ;;  %v1457_v3 = vadd.f32 %v1456_v60, %v1394_v0  ;;  %v1399_v63 = vmul.f32 %v2264_v23, %v2264_v23  ;;  %v1410_v60 = vmul.f32 %v2344_v61, %v2344_v61 }
 0x145   :  { %v1458_v5 = vadd.f32 %v1457_v3, %v1395_v42  ;;  %v1323_v7 = vadd.f32 %v2244_v6, %v1322_v2  ;;  %v1400_v6 = vmul.f32 %v2268_v30, %v2268_v30 }
 0x147   :  { %v1324_v8 = vadd.f32 %v1323_v7, %v2266_v25  ;;  %v1459_v11 = vadd.f32 %v1458_v5, %v1396_v46  ;;  %v1401_v25 = vmul.f32 %v2290_v53, %v2290_v53  ;;  %v1414_v7 = vmul.f32 %v2368_v33, %v2368_v33 }
 0x149   :  { %v1460_v12 = vadd.f32 %v1459_v11, %v1397_v1  ;;  %v1325_v10 = vadd.f32 %v1324_v8, %v2272_v34 }
 0x14b   :  { %v1326_v14 = vadd.f32 %v2264_v23, %v1325_v10  ;;  %v1461_v18 = vadd.f32 %v1460_v12, %v1398_v13  ;;  %v1403_v23 = vmul.f32 %v2288_v50, %v2288_v50 }
 0x14d   :  { %v1462_v20 = vadd.f32 %v1461_v18, %v1399_v63  ;;  %v1327_v21 = vadd.f32 %v2268_v30, %v1326_v14  ;;  %v1404_v30 = vmul.f32 %v2292_v58, %v2292_v58  ;;  %v1418_v14 = vmul.f32 %v2392_v9, %v2392_v9 }
 0x14f   :  { %v1328_v24 = vadd.f32 %v1327_v21, %v2290_v53  ;;  %v1463_v26 = vadd.f32 %v1462_v20, %v1400_v6  ;;  %v1405_v53 = vmul.f32 %v2314_v17, %v2314_v17 }
 0x151   :  { %v1464_v29 = vadd.f32 %v1463_v26, %v1401_v25  ;;  %v1329_v34 = vadd.f32 %v1328_v24, %v2296_v62 }
 0x153   :  { %v1330_v32 = vadd.f32 %v2288_v50, %v1329_v34  ;;  %v1465_v35 = vadd.f32 %v1464_v29, %v1402_v31  ;;  %v1407_v50 = vmul.f32 %v2312_v15, %v2312_v15 }
 0x155   :  { %v1466_v36 = vadd.f32 %v1465_v35, %v1403_v23  ;;  %v1331_v37 = vadd.f32 %v2292_v58, %v1330_v32  ;;  %v1408_v58 = vmul.f32 %v2316_v22, %v2316_v22  ;;  %v1284_v35 = vld [vmem:[#allocation3] sm:$0x1] }
 0x157   :  { %v1332_v38 = vadd.f32 %v1331_v37, %v2314_v17  ;;  %v1467_v39 = vadd.f32 %v1466_v36, %v1404_v30  ;;  %v1409_v17 = vmul.f32 %v2338_v48, %v2338_v48  ;;  %v1356_v36 = vld [vmem:[#allocation4] sm:$0x1] }
 0x159   :  { %v1468_v40 = vadd.f32 %v1467_v39, %v1405_v53  ;;  %v1333_v62 = vadd.f32 %v1332_v38, %v2320_v28 }
 0x15b   :  { %v1334_v43 = vadd.f32 %v2312_v15, %v1333_v62  ;;  %v1469_v47 = vadd.f32 %v1468_v40, %v1406_v41  ;;  %v1411_v15 = vmul.f32 %v2336_v45, %v2336_v45 }
 0x15d   :  { %v1470_v49 = vadd.f32 %v1469_v47, %v1407_v50  ;;  %v1335_v52 = vadd.f32 %v2316_v22, %v1334_v43  ;;  %v1412_v22 = vmul.f32 %v2340_v56, %v2340_v56 }
 0x15f   :  { %v1336_v44 = vadd.f32 %v1335_v52, %v2338_v48  ;;  %v1471_v54 = vadd.f32 %v1470_v49, %v1408_v58  ;;  %v1413_v48 = vmul.f32 %v2362_v19, %v2362_v19  ;;  %v1501_v58 = vld [vmem:[%s2519_s2] sm:$0x1] }
 0x161   :  { %v1472_v57 = vadd.f32 %v1471_v54, %v1409_v17  ;;  %v1337_v28 = vadd.f32 %v1336_v44, %v2344_v61  ;;  %v1506_v17 = vld [vmem:[%s2520_s3] sm:$0x1] }
 0x163   :  { %v1338_v51 = vadd.f32 %v2336_v45, %v1337_v28  ;;  %v1473_v0 = vadd.f32 %v1472_v57, %v1410_v60  ;;  %v1415_v45 = vmul.f32 %v2360_v16, %v2360_v16 }
 0x165   :  { %v1474_v42 = vadd.f32 %v1473_v0, %v1411_v15  ;;  %v1339_v2 = vadd.f32 %v2340_v56, %v1338_v51  ;;  %v1416_v56 = vmul.f32 %v2364_v27, %v2364_v27 }
 0x167   :  { %v1340_v3 = vadd.f32 %v1339_v2, %v2362_v19  ;;  %v1475_v46 = vadd.f32 %v1474_v42, %v1412_v22  ;;  %v1417_v19 = vmul.f32 %v2386_v59, %v2386_v59 }
 0x169   :  { %v1476_v5 = vadd.f32 %v1475_v46, %v1413_v48  ;;  %v1341_v61 = vadd.f32 %v1340_v3, %v2368_v33 }
 0x16b   :  { %v1342_v1 = vadd.f32 %v2360_v16, %v1341_v61  ;;  %v1477_v8 = vadd.f32 %v1476_v5, %v1414_v7  ;;  %v1419_v16 = vmul.f32 %v2384_v55, %v2384_v55 }
 0x16d   :  { %v1478_v11 = vadd.f32 %v1477_v8, %v1415_v45  ;;  %v1343_v12 = vadd.f32 %v2364_v27, %v1342_v1  ;;  %v1420_v27 = vmul.f32 %v2388_v4, %v2388_v4 }
 0x16f   :  { %v1344_v10 = vadd.f32 %v1343_v12, %v2386_v59  ;;  %v1479_v13 = vadd.f32 %v1478_v11, %v1416_v56 }
 0x171   :  { %v1480_v63 = vadd.f32 %v1479_v13, %v1417_v19  ;;  %v1345_v33 = vadd.f32 %v1344_v10, %v2392_v9 }
 0x173   :  { %v1346_v18 = vadd.f32 %v2384_v55, %v1345_v33  ;;  %v1481_v6 = vadd.f32 %v1480_v63, %v1418_v14 }
 0x175   :  { %v1347_v20 = vadd.f32 %v2388_v4, %v1346_v18  ;;  %v1482_v21 = vadd.f32 %v1481_v6, %v1419_v16 }
 0x177   :  { %v1348_v59 = vrot.slane %v1347_v20, 4  ;;  %v1483_v25 = vadd.f32 %v1482_v21, %v1420_v27 }
 0x179   :  { %v1349_v24 = vadd.f32 %v1348_v59, %v1347_v20  ;;  %v1484_v26 = vrot.slane %v1483_v25, 4 }
 0x17b   :  { %v1350_v29 = vrot.slane %v1349_v24, 2  ;;  %v1485_v34 = vadd.f32 %v1484_v26, %v1483_v25 }
 0x17d   :  { %v1351_v31 = vadd.f32 %v1350_v29, %v1349_v24  ;;  %v1486_v9 = vrot.slane %v1485_v34, 2 }
 0x17f   :  { %v1352_v23 = vrot.slane %v1351_v31, 1  ;;  %v1487_v32 = vadd.f32 %v1486_v9, %v1485_v34 }
 0x181   :  { %v1353_v30 = vadd.f32 %v1352_v23, %v1351_v31  ;;  %v1488_v55 = vrot.slane %v1487_v32, 1 }
 0x183   :  { %v1354_v37 = vadd.f32 %v1353_v30, %v1284_v35  ;;  %v1489_v53 = vadd.f32 %v1488_v55, %v1487_v32 }
 0x185   :  { %1355 = vst [vmem:[#allocation3] sm:$0x1] %v1354_v37  ;;  %v1490_v38 = vadd.f32 %v1489_v53, %v1356_v36 }
 0x187   :  { %1491 = vst [vmem:[#allocation4] sm:$0x1] %v1490_v38 }
 0x18c   :  { %v1494_v4 = vld [vmem:[#allocation3] sm:$0x1] }
 0x18d   :  { %v1495_v39 = vmul.f32 0.001953125, %v1494_v4 }
 0x18e   :  { %v1496_v40 = vld [vmem:[#allocation4] sm:$0x1] }
 0x18f   :  { %v1497_v62 = vmul.f32 0.001953125, %v1496_v40  ;;  %v1498_v41 = vmul.f32 %v1495_v39, %v1495_v39 }
 0x191   :  { %v1499_v50 = vsub.f32 %v1497_v62, %v1498_v41 }
 0x193   :  { %v1500_v43 = vmax.f32 %v1499_v50, 0.0 }
 0x195   :  { %v1502_v47 = vadd.f32 1e-05, %v1500_v43 }
 0x197   :  { %2058 = vrsqrt.f32 %v1502_v47 }
 0x1a1   :  { %v2059_v49 = vpop.eup %2058 }
 0x1a2   :  { %v1504_v52 = vmul.f32 %v2059_v49, %v1501_v58 }
 0x1a4   :  { %1505 = vst [vmem:[%s2521_s5] sm:$0x1] %v1504_v52  ;;  %v1507_v44 = vmul.f32 %v1504_v52, %v1495_v39 }
 0x1a6   :  { %v1508_v54 = vsub.f32 %v1506_v17, %v1507_v44 }
 0x1a8   :  { %1509 = vst [vmem:[%s2522_s6] sm:$0x1] %v1508_v54 }

// kernel: block_forward.9
= control target key start
LH: loop header
LB: loop body
LE: loop exit
PB: predicated region body
PF: predicated region fallthrough
CT: control target
= control target key end

     0   :  { %s1511_s0 = inlined_call_operand.vmem [shape: f32[512,128], index: 0, kind: input, shape index: {}]   ;;  %s1512_s1 = inlined_call_operand.vmem [shape: f32[1,128], index: 1, kind: input, shape index: {}]   ;;  %s1513_s2 = inlined_call_operand.vmem [shape: f32[1,128], index: 2, kind: input, shape index: {}]   ;;  %s1514_s3 = inlined_call_operand.vmem [shape: f32[512,128], index: 3, kind: input, shape index: {}]   ;;  %s1515_s4 = inlined_call_operand.vmem [shape: f32[1,128], index: 4, kind: input, shape index: {}]   ;;  %s1516_s5 = inlined_call_operand.vmem [shape: f32[1,128], index: 5, kind: input, shape index: {}]   ;;  %s1517_s6 = inlined_call_operand.vmem [shape: f32[512,128], index: 6, kind: output, shape index: {}]  }
   0x1   :  { %v23_v0 = vld [vmem:[%s1511_s0] sm:$0xff]  ;;  %v24_v8 = vld [vmem:[%s1511_s0 + $0x8] sm:$0xff]  ;;  %v25_v10 = vld [vmem:[%s1511_s0 + $0x10] sm:$0xff] }
   0x2   :  { %v680_v1 = vld [vmem:[%s1512_s1] ss:$0 sm:$0xff]  ;;  %v230_v9 = vld [vmem:[%s1514_s3 + $0x8] sm:$0xff]  ;;  %v231_v15 = vld [vmem:[%s1514_s3 + $0x10] sm:$0xff] }
   0x3   :  { %v685_v2 = vld [vmem:[%s1513_s2] ss:$0 sm:$0xff]  ;;  %v94_v3 = vmul.f32 %v680_v1, %v23_v0  ;;  %v95_v12 = vmul.f32 %v680_v1, %v24_v8  ;;  %v96_v14 = vmul.f32 %v680_v1, %v25_v10  ;;  %v26_v16 = vld [vmem:[%s1511_s0 + $0x18] sm:$0xff]  ;;  %v28_v24 = vld [vmem:[%s1511_s0 + $0x28] sm:$0xff] }
   0x4   :  { %v229_v4 = vld [vmem:[%s1514_s3] sm:$0xff]  ;;  %v232_v17 = vld [vmem:[%s1514_s3 + $0x18] sm:$0xff]  ;;  %v97_v20 = vmul.f32 %v680_v1, %v26_v16  ;;  %v234_v29 = vld [vmem:[%s1514_s3 + $0x28] sm:$0xff]  ;;  %v99_v38 = vmul.f32 %v680_v1, %v28_v24 }
   0x5   :  { %v694_v5 = vld [vmem:[%s1515_s4] ss:$0 sm:$0xff]  ;;  %v165_v11 = vadd.f32 %v685_v2, %v94_v3  ;;  %v166_v25 = vadd.f32 %v685_v2, %v95_v12  ;;  %v167_v27 = vadd.f32 %v685_v2, %v96_v14  ;;  %v29_v34 = vld [vmem:[%s1511_s0 + $0x30] sm:$0xff]  ;;  %v30_v44 = vld [vmem:[%s1511_s0 + $0x38] sm:$0xff] }
   0x6   :  { %v699_v6 = vld [vmem:[%s1516_s5] ss:$0 sm:$0xff]  ;;  %v300_v7 = vmul.f32 %v694_v5, %v229_v4  ;;  %v301_v13 = vmul.f32 %v694_v5, %v230_v9  ;;  %v302_v19 = vmul.f32 %v694_v5, %v231_v15  ;;  %v303_v21 = vmul.f32 %v694_v5, %v232_v17  ;;  %v235_v39 = vld [vmem:[%s1514_s3 + $0x30] sm:$0xff]  ;;  %v236_v45 = vld [vmem:[%s1514_s3 + $0x38] sm:$0xff] }
   0x7   :  { %v27_v22 = vld [vmem:[%s1511_s0 + $0x20] sm:$0xff]  ;;  %v168_v32 = vadd.f32 %v685_v2, %v97_v20  ;;  %v305_v43 = vmul.f32 %v694_v5, %v234_v29  ;;  %v170_v48 = vadd.f32 %v685_v2, %v99_v38  ;;  %v100_v49 = vmul.f32 %v680_v1, %v29_v34  ;;  %v32_v56 = vld [vmem:[%s1511_s0 + $0x48] sm:$0xff]  ;;  %v33_v4 = vld [vmem:[%s1511_s0 + $0x50] sm:$0xff] }
   0x8   :  { %v371_v18 = vadd.f32 %v699_v6, %v300_v7  ;;  %v233_v23 = vld [vmem:[%s1514_s3 + $0x20] sm:$0xff]  ;;  %v372_v26 = vadd.f32 %v699_v6, %v301_v13  ;;  %v98_v28 = vmul.f32 %v680_v1, %v27_v22  ;;  %v373_v31 = vadd.f32 %v699_v6, %v302_v19  ;;  %v238_v3 = vld [vmem:[%s1514_s3 + $0x48] sm:$0xff]  ;;  %v34_v12 = vld [vmem:[%s1511_s0 + $0x58] sm:$0xff] }
   0x9   :  { %v374_v33 = vadd.f32 %v699_v6, %v303_v21  ;;  %v304_v37 = vmul.f32 %v694_v5, %v233_v23  ;;  %v31_v50 = vld [vmem:[%s1511_s0 + $0x40] sm:$0xff]  ;;  %v376_v54 = vadd.f32 %v699_v6, %v305_v43  ;;  %v306_v55 = vmul.f32 %v694_v5, %v235_v39  ;;  %v240_v17 = vld [vmem:[%s1514_s3 + $0x58] sm:$0xff]  ;;  %v37_v34 = vld [vmem:[%s1511_s0 + $0x70] sm:$0xff] }
   0xa   :  { %v435_v30 = vadd.f32 %v371_v18, %v165_v11  ;;  %v436_v35 = vadd.f32 %v372_v26, %v166_v25  ;;  %v169_v36 = vadd.f32 %v685_v2, %v98_v28  ;;  %v437_v41 = vadd.f32 %v373_v31, %v167_v27  ;;  %v237_v51 = vld [vmem:[%s1514_s3 + $0x40] sm:$0xff]  ;;  %v239_v11 = vld [vmem:[%s1514_s3 + $0x50] sm:$0xff]  ;;  %v36_v28 = vld [vmem:[%s1511_s0 + $0x68] sm:$0xff] }
   0xb   :  { %v438_v42 = vadd.f32 %v374_v33, %v168_v32  ;;  %v375_v47 = vadd.f32 %v699_v6, %v304_v37  ;;  %v171_v58 = vadd.f32 %v685_v2, %v100_v49  ;;  %v101_v59 = vmul.f32 %v680_v1, %v30_v44  ;;  %v35_v22 = vld [vmem:[%s1511_s0 + $0x60] sm:$0xff]  ;;  %v242_v33 = vld [vmem:[%s1514_s3 + $0x68] sm:$0xff]  ;;  %v243_v43 = vld [vmem:[%s1514_s3 + $0x70] sm:$0xff] }
   0xc   :  { %v499_v40 = vmax.f32 %v435_v30, 0.0  ;;  %v500_v46 = vmax.f32 %v436_v35, 0.0  ;;  %v501_v52 = vmax.f32 %v437_v41, 0.0  ;;  %v307_v60 = vmul.f32 %v694_v5, %v236_v45  ;;  %v241_v27 = vld [vmem:[%s1514_s3 + $0x60] sm:$0xff]  ;;  %v244_v49 = vld [vmem:[%s1514_s3 + $0x78] sm:$0xff] }
   0xd   :  { %v502_v53 = vmax.f32 %v438_v42, 0.0  ;;  %v439_v57 = vadd.f32 %v375_v47, %v169_v36  ;;  %v440_v61 = vadd.f32 %v376_v54, %v170_v48  ;;  %v377_v62 = vadd.f32 %v699_v6, %v306_v55  ;;  %v38_v48 = vld [vmem:[%s1511_s0 + $0x78] sm:$0xff]  ;;  %v39_v54 = vld [vmem:[%s1511_s0 + $0x80] sm:$0xff] }
   0xe   :  { %563 = vst [vmem:[%s1517_s6] sm:$0xff] %v499_v40  ;;  %564 = vst [vmem:[%s1517_s6 + $0x8] sm:$0xff] %v500_v46  ;;  %v102_v63 = vmul.f32 %v680_v1, %v31_v50  ;;  %v308_v0 = vmul.f32 %v694_v5, %v237_v51  ;;  %v172_v8 = vadd.f32 %v685_v2, %v101_v59  ;;  %v245_v55 = vld [vmem:[%s1514_s3 + $0x80] sm:$0xff] }
   0xf   :  { %565 = vst [vmem:[%s1517_s6 + $0x10] sm:$0xff] %v501_v52  ;;  %566 = vst [vmem:[%s1517_s6 + $0x18] sm:$0xff] %v502_v53  ;;  %v503_v7 = vmax.f32 %v439_v57, 0.0  ;;  %v378_v9 = vadd.f32 %v699_v6, %v307_v60  ;;  %v103_v10 = vmul.f32 %v680_v1, %v32_v56  ;;  %v504_v13 = vmax.f32 %v440_v61, 0.0  ;;  %v40_v60 = vld [vmem:[%s1511_s0 + $0x88] sm:$0xff] }
  0x10   :  { %v441_v14 = vadd.f32 %v377_v62, %v171_v58  ;;  %v173_v15 = vadd.f32 %v685_v2, %v102_v63  ;;  %v379_v16 = vadd.f32 %v699_v6, %v308_v0  ;;  %v309_v20 = vmul.f32 %v694_v5, %v238_v3 }
  0x11   :  { %567 = vst [vmem:[%s1517_s6 + $0x20] sm:$0xff] %v503_v7  ;;  %v442_v18 = vadd.f32 %v378_v9, %v172_v8  ;;  %v174_v19 = vadd.f32 %v685_v2, %v103_v10  ;;  %v104_v21 = vmul.f32 %v680_v1, %v33_v4  ;;  %568 = vst [vmem:[%s1517_s6 + $0x28] sm:$0xff] %v504_v13  ;;  %v246_v9 = vld [vmem:[%s1514_s3 + $0x88] sm:$0xff]  ;;  %v41_v10 = vld [vmem:[%s1511_s0 + $0x90] sm:$0xff] }
  0x12   :  { %v505_v23 = vmax.f32 %v441_v14, 0.0  ;;  %v443_v24 = vadd.f32 %v379_v16, %v173_v15  ;;  %v310_v25 = vmul.f32 %v694_v5, %v239_v11  ;;  %v105_v26 = vmul.f32 %v680_v1, %v34_v12  ;;  %v247_v15 = vld [vmem:[%s1514_s3 + $0x90] sm:$0xff]  ;;  %v42_v16 = vld [vmem:[%s1511_s0 + $0x98] sm:$0xff] }
  0x13   :  { %v506_v29 = vmax.f32 %v442_v18, 0.0  ;;  %v380_v30 = vadd.f32 %v699_v6, %v309_v20  ;;  %v175_v31 = vadd.f32 %v685_v2, %v104_v21  ;;  %v311_v32 = vmul.f32 %v694_v5, %v240_v17  ;;  %v248_v21 = vld [vmem:[%s1514_s3 + $0x98] sm:$0xff] }
  0x14   :  { %569 = vst [vmem:[%s1517_s6 + $0x30] sm:$0xff] %v505_v23  ;;  %v507_v35 = vmax.f32 %v443_v24, 0.0  ;;  %v381_v36 = vadd.f32 %v699_v6, %v310_v25  ;;  %v176_v37 = vadd.f32 %v685_v2, %v105_v26  ;;  %v106_v38 = vmul.f32 %v680_v1, %v35_v22  ;;  %v43_v26 = vld [vmem:[%s1511_s0 + $0xa0] sm:$0xff] }
  0x15   :  { %570 = vst [vmem:[%s1517_s6 + $0x38] sm:$0xff] %v506_v29  ;;  %v444_v39 = vadd.f32 %v380_v30, %v174_v19  ;;  %v382_v40 = vadd.f32 %v699_v6, %v311_v32  ;;  %v312_v41 = vmul.f32 %v694_v5, %v241_v27  ;;  %v107_v42 = vmul.f32 %v680_v1, %v36_v28  ;;  %v44_v32 = vld [vmem:[%s1511_s0 + $0xa8] sm:$0xff] }
  0x16   :  { %571 = vst [vmem:[%s1517_s6 + $0x40] sm:$0xff] %v507_v35  ;;  %v445_v44 = vadd.f32 %v381_v36, %v175_v31  ;;  %v177_v45 = vadd.f32 %v685_v2, %v106_v38  ;;  %v313_v46 = vmul.f32 %v694_v5, %v242_v33  ;;  %v108_v47 = vmul.f32 %v680_v1, %v37_v34  ;;  %v249_v31 = vld [vmem:[%s1514_s3 + $0xa0] sm:$0xff]  ;;  %v45_v38 = vld [vmem:[%s1511_s0 + $0xb0] sm:$0xff] }
  0x17   :  { %v508_v50 = vmax.f32 %v444_v39, 0.0  ;;  %v446_v51 = vadd.f32 %v382_v40, %v176_v37  ;;  %v383_v52 = vadd.f32 %v699_v6, %v312_v41  ;;  %v178_v53 = vadd.f32 %v685_v2, %v107_v42  ;;  %v250_v37 = vld [vmem:[%s1514_s3 + $0xa8] sm:$0xff] }
  0x18   :  { %v509_v56 = vmax.f32 %v445_v44, 0.0  ;;  %v384_v57 = vadd.f32 %v699_v6, %v313_v46  ;;  %v179_v58 = vadd.f32 %v685_v2, %v108_v47  ;;  %v314_v59 = vmul.f32 %v694_v5, %v243_v43  ;;  %v251_v47 = vld [vmem:[%s1514_s3 + $0xb0] sm:$0xff] }
  0x19   :  { %572 = vst [vmem:[%s1517_s6 + $0x48] sm:$0xff] %v508_v50  ;;  %v510_v61 = vmax.f32 %v446_v51, 0.0  ;;  %v447_v62 = vadd.f32 %v383_v52, %v177_v45  ;;  %v109_v63 = vmul.f32 %v680_v1, %v38_v48  ;;  %v315_v0 = vmul.f32 %v694_v5, %v244_v49  ;;  %v46_v52 = vld [vmem:[%s1511_s0 + $0xb8] sm:$0xff] }
  0x1a   :  { %573 = vst [vmem:[%s1517_s6 + $0x50] sm:$0xff] %v509_v56  ;;  %v448_v3 = vadd.f32 %v384_v57, %v178_v53  ;;  %v385_v4 = vadd.f32 %v699_v6, %v314_v59  ;;  %v110_v7 = vmul.f32 %v680_v1, %v39_v54  ;;  %v316_v8 = vmul.f32 %v694_v5, %v245_v55  ;;  %v252_v53 = vld [vmem:[%s1514_s3 + $0xb8] sm:$0xff]  ;;  %v253_v59 = vld [vmem:[%s1514_s3 + $0xc0] sm:$0xff] }
  0x1b   :  { %574 = vst [vmem:[%s1517_s6 + $0x58] sm:$0xff] %v510_v61  ;;  %v511_v11 = vmax.f32 %v447_v62, 0.0  ;;  %v180_v12 = vadd.f32 %v685_v2, %v109_v63  ;;  %v386_v13 = vadd.f32 %v699_v6, %v315_v0  ;;  %v111_v14 = vmul.f32 %v680_v1, %v40_v60  ;;  %v48_v0 = vld [vmem:[%s1511_s0 + $0xc8] sm:$0xff] }
  0x1c   :  { %v512_v17 = vmax.f32 %v448_v3, 0.0  ;;  %v449_v18 = vadd.f32 %v385_v4, %v179_v58  ;;  %v181_v19 = vadd.f32 %v685_v2, %v110_v7  ;;  %v387_v20 = vadd.f32 %v699_v6, %v316_v8  ;;  %v47_v58 = vld [vmem:[%s1511_s0 + $0xc0] sm:$0xff] }
  0x1d   :  { %575 = vst [vmem:[%s1517_s6 + $0x60] sm:$0xff] %v511_v11  ;;  %v450_v22 = vadd.f32 %v386_v13, %v180_v12  ;;  %v182_v23 = vadd.f32 %v685_v2, %v111_v14  ;;  %v317_v24 = vmul.f32 %v694_v5, %v246_v9  ;;  %v112_v25 = vmul.f32 %v680_v1, %v41_v10  ;;  %v254_v13 = vld [vmem:[%s1514_s3 + $0xc8] sm:$0xff]  ;;  %v49_v14 = vld [vmem:[%s1511_s0 + $0xd0] sm:$0xff] }
  0x1e   :  { %576 = vst [vmem:[%s1517_s6 + $0x68] sm:$0xff] %v512_v17  ;;  %v513_v27 = vmax.f32 %v449_v18, 0.0  ;;  %v451_v28 = vadd.f32 %v387_v20, %v181_v19  ;;  %v318_v29 = vmul.f32 %v694_v5, %v247_v15  ;;  %v113_v30 = vmul.f32 %v680_v1, %v42_v16  ;;  %v255_v19 = vld [vmem:[%s1514_s3 + $0xd0] sm:$0xff]  ;;  %v50_v20 = vld [vmem:[%s1511_s0 + $0xd8] sm:$0xff] }
  0x1f   :  { %v514_v33 = vmax.f32 %v450_v22, 0.0  ;;  %v388_v34 = vadd.f32 %v699_v6, %v317_v24  ;;  %v183_v35 = vadd.f32 %v685_v2, %v112_v25  ;;  %v319_v36 = vmul.f32 %v694_v5, %v248_v21  ;;  %v256_v25 = vld [vmem:[%s1514_s3 + $0xd8] sm:$0xff] }
  0x20   :  { %577 = vst [vmem:[%s1517_s6 + $0x70] sm:$0xff] %v513_v27  ;;  %v515_v39 = vmax.f32 %v451_v28, 0.0  ;;  %v389_v40 = vadd.f32 %v699_v6, %v318_v29  ;;  %v184_v41 = vadd.f32 %v685_v2, %v113_v30  ;;  %v114_v42 = vmul.f32 %v680_v1, %v43_v26  ;;  %v51_v30 = vld [vmem:[%s1511_s0 + $0xe0] sm:$0xff] }
  0x21   :  { %578 = vst [vmem:[%s1517_s6 + $0x78] sm:$0xff] %v514_v33  ;;  %v452_v43 = vadd.f32 %v388_v34, %v182_v23  ;;  %v390_v44 = vadd.f32 %v699_v6, %v319_v36  ;;  %v320_v45 = vmul.f32 %v694_v5, %v249_v31  ;;  %v115_v46 = vmul.f32 %v680_v1, %v44_v32  ;;  %v52_v36 = vld [vmem:[%s1511_s0 + $0xe8] sm:$0xff] }
  0x22   :  { %579 = vst [vmem:[%s1517_s6 + $0x80] sm:$0xff] %v515_v39  ;;  %v453_v48 = vadd.f32 %v389_v40, %v183_v35  ;;  %v185_v49 = vadd.f32 %v685_v2, %v114_v42  ;;  %v321_v50 = vmul.f32 %v694_v5, %v250_v37  ;;  %v116_v51 = vmul.f32 %v680_v1, %v45_v38  ;;  %v257_v35 = vld [vmem:[%s1514_s3 + $0xe0] sm:$0xff]  ;;  %v53_v42 = vld [vmem:[%s1511_s0 + $0xf0] sm:$0xff] }
  0x23   :  { %v516_v54 = vmax.f32 %v452_v43, 0.0  ;;  %v454_v55 = vadd.f32 %v390_v44, %v184_v41  ;;  %v391_v56 = vadd.f32 %v699_v6, %v320_v45  ;;  %v186_v57 = vadd.f32 %v685_v2, %v115_v46  ;;  %v258_v41 = vld [vmem:[%s1514_s3 + $0xe8] sm:$0xff] }
  0x24   :  { %v517_v60 = vmax.f32 %v453_v48, 0.0  ;;  %v392_v61 = vadd.f32 %v699_v6, %v321_v50  ;;  %v187_v62 = vadd.f32 %v685_v2, %v116_v51  ;;  %v322_v63 = vmul.f32 %v694_v5, %v251_v47  ;;  %v259_v51 = vld [vmem:[%s1514_s3 + $0xf0] sm:$0xff] }
  0x25   :  { %580 = vst [vmem:[%s1517_s6 + $0x88] sm:$0xff] %v516_v54  ;;  %v518_v3 = vmax.f32 %v454_v55, 0.0  ;;  %v455_v4 = vadd.f32 %v391_v56, %v185_v49  ;;  %v117_v7 = vmul.f32 %v680_v1, %v46_v52  ;;  %v323_v8 = vmul.f32 %v694_v5, %v252_v53  ;;  %v54_v56 = vld [vmem:[%s1511_s0 + $0xf8] sm:$0xff] }
  0x26   :  { %581 = vst [vmem:[%s1517_s6 + $0x90] sm:$0xff] %v517_v60  ;;  %v456_v9 = vadd.f32 %v392_v61, %v186_v57  ;;  %v393_v10 = vadd.f32 %v699_v6, %v322_v63  ;;  %v118_v11 = vmul.f32 %v680_v1, %v47_v58  ;;  %v324_v12 = vmul.f32 %v694_v5, %v253_v59  ;;  %v260_v57 = vld [vmem:[%s1514_s3 + $0xf8] sm:$0xff]  ;;  %v261_v63 = vld [vmem:[%s1514_s3 + $0x100] sm:$0xff] }
  0x27   :  { %582 = vst [vmem:[%s1517_s6 + $0x98] sm:$0xff] %v518_v3  ;;  %v519_v15 = vmax.f32 %v455_v4, 0.0  ;;  %v188_v16 = vadd.f32 %v685_v2, %v117_v7  ;;  %v394_v17 = vadd.f32 %v699_v6, %v323_v8  ;;  %v119_v18 = vmul.f32 %v680_v1, %v48_v0  ;;  %v56_v8 = vld [vmem:[%s1511_s0 + $0x108] sm:$0xff] }
  0x28   :  { %v520_v21 = vmax.f32 %v456_v9, 0.0  ;;  %v457_v22 = vadd.f32 %v393_v10, %v187_v62  ;;  %v189_v23 = vadd.f32 %v685_v2, %v118_v11  ;;  %v395_v24 = vadd.f32 %v699_v6, %v324_v12  ;;  %v55_v62 = vld [vmem:[%s1511_s0 + $0x100] sm:$0xff] }
  0x29   :  { %583 = vst [vmem:[%s1517_s6 + $0xa0] sm:$0xff] %v519_v15  ;;  %v458_v26 = vadd.f32 %v394_v17, %v188_v16  ;;  %v190_v27 = vadd.f32 %v685_v2, %v119_v18  ;;  %v325_v28 = vmul.f32 %v694_v5, %v254_v13  ;;  %v120_v29 = vmul.f32 %v680_v1, %v49_v14  ;;  %v262_v17 = vld [vmem:[%s1514_s3 + $0x108] sm:$0xff]  ;;  %v57_v18 = vld [vmem:[%s1511_s0 + $0x110] sm:$0xff] }
  0x2a   :  { %584 = vst [vmem:[%s1517_s6 + $0xa8] sm:$0xff] %v520_v21  ;;  %v521_v31 = vmax.f32 %v457_v22, 0.0  ;;  %v459_v32 = vadd.f32 %v395_v24, %v189_v23  ;;  %v326_v33 = vmul.f32 %v694_v5, %v255_v19  ;;  %v121_v34 = vmul.f32 %v680_v1, %v50_v20  ;;  %v263_v23 = vld [vmem:[%s1514_s3 + $0x110] sm:$0xff]  ;;  %v58_v24 = vld [vmem:[%s1511_s0 + $0x118] sm:$0xff] }
  0x2b   :  { %v522_v37 = vmax.f32 %v458_v26, 0.0  ;;  %v396_v38 = vadd.f32 %v699_v6, %v325_v28  ;;  %v191_v39 = vadd.f32 %v685_v2, %v120_v29  ;;  %v327_v40 = vmul.f32 %v694_v5, %v256_v25  ;;  %v264_v29 = vld [vmem:[%s1514_s3 + $0x118] sm:$0xff] }
  0x2c   :  { %585 = vst [vmem:[%s1517_s6 + $0xb0] sm:$0xff] %v521_v31  ;;  %v523_v43 = vmax.f32 %v459_v32, 0.0  ;;  %v397_v44 = vadd.f32 %v699_v6, %v326_v33  ;;  %v192_v45 = vadd.f32 %v685_v2, %v121_v34  ;;  %v122_v46 = vmul.f32 %v680_v1, %v51_v30  ;;  %v59_v34 = vld [vmem:[%s1511_s0 + $0x120] sm:$0xff] }
  0x2d   :  { %586 = vst [vmem:[%s1517_s6 + $0xb8] sm:$0xff] %v522_v37  ;;  %v460_v47 = vadd.f32 %v396_v38, %v190_v27  ;;  %v398_v48 = vadd.f32 %v699_v6, %v327_v40  ;;  %v328_v49 = vmul.f32 %v694_v5, %v257_v35  ;;  %v123_v50 = vmul.f32 %v680_v1, %v52_v36  ;;  %v60_v40 = vld [vmem:[%s1511_s0 + $0x128] sm:$0xff] }
  0x2e   :  { %587 = vst [vmem:[%s1517_s6 + $0xc0] sm:$0xff] %v523_v43  ;;  %v461_v52 = vadd.f32 %v397_v44, %v191_v39  ;;  %v193_v53 = vadd.f32 %v685_v2, %v122_v46  ;;  %v329_v54 = vmul.f32 %v694_v5, %v258_v41  ;;  %v124_v55 = vmul.f32 %v680_v1, %v53_v42  ;;  %v265_v39 = vld [vmem:[%s1514_s3 + $0x120] sm:$0xff]  ;;  %v61_v46 = vld [vmem:[%s1511_s0 + $0x130] sm:$0xff] }
  0x2f   :  { %v524_v58 = vmax.f32 %v460_v47, 0.0  ;;  %v462_v59 = vadd.f32 %v398_v48, %v192_v45  ;;  %v399_v60 = vadd.f32 %v699_v6, %v328_v49  ;;  %v194_v61 = vadd.f32 %v685_v2, %v123_v50  ;;  %v266_v45 = vld [vmem:[%s1514_s3 + $0x128] sm:$0xff] }
  0x30   :  { %v525_v0 = vmax.f32 %v461_v52, 0.0  ;;  %v400_v3 = vadd.f32 %v699_v6, %v329_v54  ;;  %v195_v4 = vadd.f32 %v685_v2, %v124_v55  ;;  %v330_v7 = vmul.f32 %v694_v5, %v259_v51  ;;  %v267_v55 = vld [vmem:[%s1514_s3 + $0x130] sm:$0xff] }
  0x31   :  { %588 = vst [vmem:[%s1517_s6 + $0xc8] sm:$0xff] %v524_v58  ;;  %v526_v9 = vmax.f32 %v462_v59, 0.0  ;;  %v463_v10 = vadd.f32 %v399_v60, %v193_v53  ;;  %v125_v11 = vmul.f32 %v680_v1, %v54_v56  ;;  %v331_v12 = vmul.f32 %v694_v5, %v260_v57  ;;  %v62_v60 = vld [vmem:[%s1511_s0 + $0x138] sm:$0xff] }
  0x32   :  { %589 = vst [vmem:[%s1517_s6 + $0xd0] sm:$0xff] %v525_v0  ;;  %v464_v13 = vadd.f32 %v400_v3, %v194_v61  ;;  %v401_v14 = vadd.f32 %v699_v6, %v330_v7  ;;  %v126_v15 = vmul.f32 %v680_v1, %v55_v62  ;;  %v332_v16 = vmul.f32 %v694_v5, %v261_v63  ;;  %v268_v61 = vld [vmem:[%s1514_s3 + $0x138] sm:$0xff]  ;;  %v269_v7 = vld [vmem:[%s1514_s3 + $0x140] sm:$0xff] }
  0x33   :  { %590 = vst [vmem:[%s1517_s6 + $0xd8] sm:$0xff] %v526_v9  ;;  %v527_v19 = vmax.f32 %v463_v10, 0.0  ;;  %v196_v20 = vadd.f32 %v685_v2, %v125_v11  ;;  %v402_v21 = vadd.f32 %v699_v6, %v331_v12  ;;  %v127_v22 = vmul.f32 %v680_v1, %v56_v8  ;;  %v64_v12 = vld [vmem:[%s1511_s0 + $0x148] sm:$0xff] }
  0x34   :  { %v528_v25 = vmax.f32 %v464_v13, 0.0  ;;  %v465_v26 = vadd.f32 %v401_v14, %v195_v4  ;;  %v197_v27 = vadd.f32 %v685_v2, %v126_v15  ;;  %v403_v28 = vadd.f32 %v699_v6, %v332_v16  ;;  %v63_v4 = vld [vmem:[%s1511_s0 + $0x140] sm:$0xff] }
  0x35   :  { %591 = vst [vmem:[%s1517_s6 + $0xe0] sm:$0xff] %v527_v19  ;;  %v466_v30 = vadd.f32 %v402_v21, %v196_v20  ;;  %v198_v31 = vadd.f32 %v685_v2, %v127_v22  ;;  %v333_v32 = vmul.f32 %v694_v5, %v262_v17  ;;  %v128_v33 = vmul.f32 %v680_v1, %v57_v18  ;;  %v270_v21 = vld [vmem:[%s1514_s3 + $0x148] sm:$0xff]  ;;  %v65_v22 = vld [vmem:[%s1511_s0 + $0x150] sm:$0xff] }
  0x36   :  { %592 = vst [vmem:[%s1517_s6 + $0xe8] sm:$0xff] %v528_v25  ;;  %v529_v35 = vmax.f32 %v465_v26, 0.0  ;;  %v467_v36 = vadd.f32 %v403_v28, %v197_v27  ;;  %v334_v37 = vmul.f32 %v694_v5, %v263_v23  ;;  %v129_v38 = vmul.f32 %v680_v1, %v58_v24  ;;  %v271_v27 = vld [vmem:[%s1514_s3 + $0x150] sm:$0xff]  ;;  %v66_v28 = vld [vmem:[%s1511_s0 + $0x158] sm:$0xff] }
  0x37   :  { %v530_v41 = vmax.f32 %v466_v30, 0.0  ;;  %v404_v42 = vadd.f32 %v699_v6, %v333_v32  ;;  %v199_v43 = vadd.f32 %v685_v2, %v128_v33  ;;  %v335_v44 = vmul.f32 %v694_v5, %v264_v29  ;;  %v272_v33 = vld [vmem:[%s1514_s3 + $0x158] sm:$0xff] }
  0x38   :  { %593 = vst [vmem:[%s1517_s6 + $0xf0] sm:$0xff] %v529_v35  ;;  %v531_v47 = vmax.f32 %v467_v36, 0.0  ;;  %v405_v48 = vadd.f32 %v699_v6, %v334_v37  ;;  %v200_v49 = vadd.f32 %v685_v2, %v129_v38  ;;  %v130_v50 = vmul.f32 %v680_v1, %v59_v34  ;;  %v67_v38 = vld [vmem:[%s1511_s0 + $0x160] sm:$0xff] }
  0x39   :  { %594 = vst [vmem:[%s1517_s6 + $0xf8] sm:$0xff] %v530_v41  ;;  %v468_v51 = vadd.f32 %v404_v42, %v198_v31  ;;  %v406_v52 = vadd.f32 %v699_v6, %v335_v44  ;;  %v336_v53 = vmul.f32 %v694_v5, %v265_v39  ;;  %v131_v54 = vmul.f32 %v680_v1, %v60_v40  ;;  %v68_v44 = vld [vmem:[%s1511_s0 + $0x168] sm:$0xff] }
  0x3a   :  { %595 = vst [vmem:[%s1517_s6 + $0x100] sm:$0xff] %v531_v47  ;;  %v469_v56 = vadd.f32 %v405_v48, %v199_v43  ;;  %v201_v57 = vadd.f32 %v685_v2, %v130_v50  ;;  %v337_v58 = vmul.f32 %v694_v5, %v266_v45  ;;  %v132_v59 = vmul.f32 %v680_v1, %v61_v46  ;;  %v273_v43 = vld [vmem:[%s1514_s3 + $0x160] sm:$0xff]  ;;  %v69_v50 = vld [vmem:[%s1511_s0 + $0x170] sm:$0xff] }
  0x3b   :  { %v532_v62 = vmax.f32 %v468_v51, 0.0  ;;  %v470_v63 = vadd.f32 %v406_v52, %v200_v49  ;;  %v407_v0 = vadd.f32 %v699_v6, %v336_v53  ;;  %v202_v3 = vadd.f32 %v685_v2, %v131_v54  ;;  %v274_v49 = vld [vmem:[%s1514_s3 + $0x168] sm:$0xff] }
  0x3c   :  { %v533_v8 = vmax.f32 %v469_v56, 0.0  ;;  %v408_v9 = vadd.f32 %v699_v6, %v337_v58  ;;  %v203_v10 = vadd.f32 %v685_v2, %v132_v59  ;;  %v338_v11 = vmul.f32 %v694_v5, %v267_v55  ;;  %v275_v59 = vld [vmem:[%s1514_s3 + $0x170] sm:$0xff] }
  0x3d   :  { %596 = vst [vmem:[%s1517_s6 + $0x108] sm:$0xff] %v532_v62  ;;  %v534_v13 = vmax.f32 %v470_v63, 0.0  ;;  %v471_v14 = vadd.f32 %v407_v0, %v201_v57  ;;  %v133_v15 = vmul.f32 %v680_v1, %v62_v60  ;;  %v339_v16 = vmul.f32 %v694_v5, %v268_v61  ;;  %v70_v0 = vld [vmem:[%s1511_s0 + $0x178] sm:$0xff] }
  0x3e   :  { %597 = vst [vmem:[%s1517_s6 + $0x110] sm:$0xff] %v533_v8  ;;  %v472_v17 = vadd.f32 %v408_v9, %v202_v3  ;;  %v409_v18 = vadd.f32 %v699_v6, %v338_v11  ;;  %v134_v19 = vmul.f32 %v680_v1, %v63_v4  ;;  %v340_v20 = vmul.f32 %v694_v5, %v269_v7  ;;  %v276_v3 = vld [vmem:[%s1514_s3 + $0x178] sm:$0xff]  ;;  %v277_v11 = vld [vmem:[%s1514_s3 + $0x180] sm:$0xff] }
  0x3f   :  { %598 = vst [vmem:[%s1517_s6 + $0x118] sm:$0xff] %v534_v13  ;;  %v535_v23 = vmax.f32 %v471_v14, 0.0  ;;  %v204_v24 = vadd.f32 %v685_v2, %v133_v15  ;;  %v410_v25 = vadd.f32 %v699_v6, %v339_v16  ;;  %v135_v26 = vmul.f32 %v680_v1, %v64_v12  ;;  %v72_v16 = vld [vmem:[%s1511_s0 + $0x188] sm:$0xff] }
  0x40   :  { %v536_v29 = vmax.f32 %v472_v17, 0.0  ;;  %v473_v30 = vadd.f32 %v409_v18, %v203_v10  ;;  %v205_v31 = vadd.f32 %v685_v2, %v134_v19  ;;  %v411_v32 = vadd.f32 %v699_v6, %v340_v20  ;;  %v71_v10 = vld [vmem:[%s1511_s0 + $0x180] sm:$0xff] }
  0x41   :  { %599 = vst [vmem:[%s1517_s6 + $0x120] sm:$0xff] %v535_v23  ;;  %v474_v34 = vadd.f32 %v410_v25, %v204_v24  ;;  %v206_v35 = vadd.f32 %v685_v2, %v135_v26  ;;  %v341_v36 = vmul.f32 %v694_v5, %v270_v21  ;;  %v136_v37 = vmul.f32 %v680_v1, %v65_v22  ;;  %v278_v25 = vld [vmem:[%s1514_s3 + $0x188] sm:$0xff]  ;;  %v73_v26 = vld [vmem:[%s1511_s0 + $0x190] sm:$0xff] }
  0x42   :  { %600 = vst [vmem:[%s1517_s6 + $0x128] sm:$0xff] %v536_v29  ;;  %v537_v39 = vmax.f32 %v473_v30, 0.0  ;;  %v475_v40 = vadd.f32 %v411_v32, %v205_v31  ;;  %v342_v41 = vmul.f32 %v694_v5, %v271_v27  ;;  %v137_v42 = vmul.f32 %v680_v1, %v66_v28  ;;  %v279_v31 = vld [vmem:[%s1514_s3 + $0x190] sm:$0xff]  ;;  %v74_v32 = vld [vmem:[%s1511_s0 + $0x198] sm:$0xff] }
  0x43   :  { %v538_v45 = vmax.f32 %v474_v34, 0.0  ;;  %v412_v46 = vadd.f32 %v699_v6, %v341_v36  ;;  %v207_v47 = vadd.f32 %v685_v2, %v136_v37  ;;  %v343_v48 = vmul.f32 %v694_v5, %v272_v33  ;;  %v280_v37 = vld [vmem:[%s1514_s3 + $0x198] sm:$0xff] }
  0x44   :  { %601 = vst [vmem:[%s1517_s6 + $0x130] sm:$0xff] %v537_v39  ;;  %v539_v51 = vmax.f32 %v475_v40, 0.0  ;;  %v413_v52 = vadd.f32 %v699_v6, %v342_v41  ;;  %v208_v53 = vadd.f32 %v685_v2, %v137_v42  ;;  %v138_v54 = vmul.f32 %v680_v1, %v67_v38  ;;  %v75_v42 = vld [vmem:[%s1511_s0 + $0x1a0] sm:$0xff] }
  0x45   :  { %602 = vst [vmem:[%s1517_s6 + $0x138] sm:$0xff] %v538_v45  ;;  %v476_v55 = vadd.f32 %v412_v46, %v206_v35  ;;  %v414_v56 = vadd.f32 %v699_v6, %v343_v48  ;;  %v344_v57 = vmul.f32 %v694_v5, %v273_v43  ;;  %v139_v58 = vmul.f32 %v680_v1, %v68_v44  ;;  %v76_v48 = vld [vmem:[%s1511_s0 + $0x1a8] sm:$0xff] }
  0x46   :  { %603 = vst [vmem:[%s1517_s6 + $0x140] sm:$0xff] %v539_v51  ;;  %v477_v60 = vadd.f32 %v413_v52, %v207_v47  ;;  %v209_v61 = vadd.f32 %v685_v2, %v138_v54  ;;  %v345_v62 = vmul.f32 %v694_v5, %v274_v49  ;;  %v140_v63 = vmul.f32 %v680_v1, %v69_v50  ;;  %v281_v47 = vld [vmem:[%s1514_s3 + $0x1a0] sm:$0xff]  ;;  %v77_v54 = vld [vmem:[%s1511_s0 + $0x1b0] sm:$0xff] }
  0x47   :  { %v540_v4 = vmax.f32 %v476_v55, 0.0  ;;  %v478_v7 = vadd.f32 %v414_v56, %v208_v53  ;;  %v415_v8 = vadd.f32 %v699_v6, %v344_v57  ;;  %v210_v9 = vadd.f32 %v685_v2, %v139_v58  ;;  %v282_v53 = vld [vmem:[%s1514_s3 + $0x1a8] sm:$0xff] }
  0x48   :  { %v541_v12 = vmax.f32 %v477_v60, 0.0  ;;  %v416_v13 = vadd.f32 %v699_v6, %v345_v62  ;;  %v211_v14 = vadd.f32 %v685_v2, %v140_v63  ;;  %v346_v15 = vmul.f32 %v694_v5, %v275_v59  ;;  %v283_v63 = vld [vmem:[%s1514_s3 + $0x1b0] sm:$0xff] }
  0x49   :  { %604 = vst [vmem:[%s1517_s6 + $0x148] sm:$0xff] %v540_v4  ;;  %v542_v17 = vmax.f32 %v478_v7, 0.0  ;;  %v479_v18 = vadd.f32 %v415_v8, %v209_v61  ;;  %v141_v19 = vmul.f32 %v680_v1, %v70_v0  ;;  %v347_v20 = vmul.f32 %v694_v5, %v276_v3  ;;  %v78_v8 = vld [vmem:[%s1511_s0 + $0x1b8] sm:$0xff] }
  0x4a   :  { %605 = vst [vmem:[%s1517_s6 + $0x150] sm:$0xff] %v541_v12  ;;  %v480_v21 = vadd.f32 %v416_v13, %v210_v9  ;;  %v417_v22 = vadd.f32 %v699_v6, %v346_v15  ;;  %v142_v23 = vmul.f32 %v680_v1, %v71_v10  ;;  %v348_v24 = vmul.f32 %v694_v5, %v277_v11  ;;  %v284_v9 = vld [vmem:[%s1514_s3 + $0x1b8] sm:$0xff]  ;;  %v285_v15 = vld [vmem:[%s1514_s3 + $0x1c0] sm:$0xff] }
  0x4b   :  { %606 = vst [vmem:[%s1517_s6 + $0x158] sm:$0xff] %v542_v17  ;;  %v543_v27 = vmax.f32 %v479_v18, 0.0  ;;  %v212_v28 = vadd.f32 %v685_v2, %v141_v19  ;;  %v418_v29 = vadd.f32 %v699_v6, %v347_v20  ;;  %v143_v30 = vmul.f32 %v680_v1, %v72_v16  ;;  %v80_v20 = vld [vmem:[%s1511_s0 + $0x1c8] sm:$0xff] }
  0x4c   :  { %v544_v33 = vmax.f32 %v480_v21, 0.0  ;;  %v481_v34 = vadd.f32 %v417_v22, %v211_v14  ;;  %v213_v35 = vadd.f32 %v685_v2, %v142_v23  ;;  %v419_v36 = vadd.f32 %v699_v6, %v348_v24  ;;  %v79_v14 = vld [vmem:[%s1511_s0 + $0x1c0] sm:$0xff] }
  0x4d   :  { %607 = vst [vmem:[%s1517_s6 + $0x160] sm:$0xff] %v543_v27  ;;  %v482_v38 = vadd.f32 %v418_v29, %v212_v28  ;;  %v214_v39 = vadd.f32 %v685_v2, %v143_v30  ;;  %v349_v40 = vmul.f32 %v694_v5, %v278_v25  ;;  %v144_v41 = vmul.f32 %v680_v1, %v73_v26  ;;  %v286_v29 = vld [vmem:[%s1514_s3 + $0x1c8] sm:$0xff]  ;;  %v81_v30 = vld [vmem:[%s1511_s0 + $0x1d0] sm:$0xff] }
  0x4e   :  { %608 = vst [vmem:[%s1517_s6 + $0x168] sm:$0xff] %v544_v33  ;;  %v545_v43 = vmax.f32 %v481_v34, 0.0  ;;  %v483_v44 = vadd.f32 %v419_v36, %v213_v35  ;;  %v350_v45 = vmul.f32 %v694_v5, %v279_v31  ;;  %v145_v46 = vmul.f32 %v680_v1, %v74_v32  ;;  %v82_v35 = vld [vmem:[%s1511_s0 + $0x1d8] sm:$0xff] }
  0x4f   :  { %v546_v49 = vmax.f32 %v482_v38, 0.0  ;;  %v420_v50 = vadd.f32 %v699_v6, %v349_v40  ;;  %v215_v51 = vadd.f32 %v685_v2, %v144_v41  ;;  %v351_v52 = vmul.f32 %v694_v5, %v280_v37  ;;  %v288_v40 = vld [vmem:[%s1514_s3 + $0x1d8] sm:$0xff]  ;;  %v635_v41 = vld [vmem:[%s1513_s2] ss:$0 sm:$0xff] }
  0x50   :  { %609 = vst [vmem:[%s1517_s6 + $0x170] sm:$0xff] %v545_v43  ;;  %v547_v55 = vmax.f32 %v483_v44, 0.0  ;;  %v421_v56 = vadd.f32 %v699_v6, %v350_v45  ;;  %v216_v57 = vadd.f32 %v685_v2, %v145_v46  ;;  %v146_v58 = vmul.f32 %v680_v1, %v75_v42  ;;  %v83_v45 = vld [vmem:[%s1511_s0 + $0x1e0] sm:$0xff] }
  0x51   :  { %610 = vst [vmem:[%s1517_s6 + $0x178] sm:$0xff] %v546_v49  ;;  %v484_v59 = vadd.f32 %v420_v50, %v214_v39  ;;  %v422_v60 = vadd.f32 %v699_v6, %v351_v52  ;;  %v352_v61 = vmul.f32 %v694_v5, %v281_v47  ;;  %v147_v62 = vmul.f32 %v680_v1, %v76_v48  ;;  %v289_v50 = vld [vmem:[%s1514_s3 + $0x1e0] sm:$0xff] }
  0x52   :  { %611 = vst [vmem:[%s1517_s6 + $0x180] sm:$0xff] %v547_v55  ;;  %v485_v0 = vadd.f32 %v421_v56, %v215_v51  ;;  %v217_v3 = vadd.f32 %v685_v2, %v146_v58  ;;  %v353_v4 = vmul.f32 %v694_v5, %v282_v53  ;;  %v148_v7 = vmul.f32 %v680_v1, %v77_v54  ;;  %v84_v51 = vld [vmem:[%s1511_s0 + $0x1e8] sm:$0xff]  ;;  %v638_v53 = vld [vmem:[%s1516_s5] ss:$0 sm:$0xff]  ;;  %v85_v58 = vld [vmem:[%s1511_s0 + $0x1f0] sm:$0xff] }
  0x53   :  { %v548_v10 = vmax.f32 %v484_v59, 0.0  ;;  %v486_v11 = vadd.f32 %v422_v60, %v216_v57  ;;  %v423_v12 = vadd.f32 %v699_v6, %v352_v61  ;;  %v218_v13 = vadd.f32 %v685_v2, %v147_v62  ;;  %v290_v57 = vld [vmem:[%s1514_s3 + $0x1e8] sm:$0xff] }
  0x54   :  { %v549_v16 = vmax.f32 %v485_v0, 0.0  ;;  %v424_v17 = vadd.f32 %v699_v6, %v353_v4  ;;  %v219_v18 = vadd.f32 %v685_v2, %v148_v7  ;;  %v354_v19 = vmul.f32 %v694_v5, %v283_v63  ;;  %v291_v7 = vld [vmem:[%s1514_s3 + $0x1f0] sm:$0xff] }
  0x55   :  { %612 = vst [vmem:[%s1517_s6 + $0x188] sm:$0xff] %v548_v10  ;;  %v550_v21 = vmax.f32 %v486_v11, 0.0  ;;  %v487_v22 = vadd.f32 %v423_v12, %v217_v3  ;;  %v149_v23 = vmul.f32 %v680_v1, %v78_v8  ;;  %v355_v24 = vmul.f32 %v694_v5, %v284_v9  ;;  %v86_v12 = vld [vmem:[%s1511_s0 + $0x1f8] sm:$0xff] }
  0x56   :  { %613 = vst [vmem:[%s1517_s6 + $0x190] sm:$0xff] %v549_v16  ;;  %v488_v25 = vadd.f32 %v424_v17, %v218_v13  ;;  %v425_v26 = vadd.f32 %v699_v6, %v354_v19  ;;  %v150_v27 = vmul.f32 %v680_v1, %v79_v14  ;;  %v356_v28 = vmul.f32 %v694_v5, %v285_v15  ;;  %v287_v5 = vld [vmem:[%s1514_s3 + $0x1d0] sm:$0xff]  ;;  %v292_v13 = vld [vmem:[%s1514_s3 + $0x1f8] sm:$0xff] }
  0x57   :  { %614 = vst [vmem:[%s1517_s6 + $0x198] sm:$0xff] %v550_v21  ;;  %v551_v31 = vmax.f32 %v487_v22, 0.0  ;;  %v220_v32 = vadd.f32 %v685_v2, %v149_v23  ;;  %v426_v33 = vadd.f32 %v699_v6, %v355_v24  ;;  %v151_v34 = vmul.f32 %v680_v1, %v80_v20 }
  0x58   :  { %v552_v36 = vmax.f32 %v488_v25, 0.0  ;;  %v489_v37 = vadd.f32 %v425_v26, %v219_v18  ;;  %v221_v38 = vadd.f32 %v685_v2, %v150_v27  ;;  %v427_v39 = vadd.f32 %v699_v6, %v356_v28  ;;  %v636_v2 = vld [vmem:[%s1515_s4] ss:$0 sm:$0xff] }
  0x59   :  { %615 = vst [vmem:[%s1517_s6 + $0x1a0] sm:$0xff] %v551_v31  ;;  %v490_v1 = vadd.f32 %v426_v33, %v220_v32  ;;  %v222_v42 = vadd.f32 %v635_v41, %v151_v34  ;;  %v357_v43 = vmul.f32 %v636_v2, %v286_v29  ;;  %v637_v6 = vld [vmem:[%s1512_s1] ss:$0 sm:$0xff]  ;;  %v358_v48 = vmul.f32 %v636_v2, %v287_v5 }
  0x5a   :  { %v152_v44 = vmul.f32 %v637_v6, %v81_v30  ;;  %616 = vst [vmem:[%s1517_s6 + $0x1a8] sm:$0xff] %v552_v36  ;;  %v553_v46 = vmax.f32 %v489_v37, 0.0  ;;  %v491_v47 = vadd.f32 %v427_v39, %v221_v38  ;;  %v153_v49 = vmul.f32 %v637_v6, %v82_v35 }
  0x5b   :  { %v554_v52 = vmax.f32 %v490_v1, 0.0  ;;  %v428_v54 = vadd.f32 %v638_v53, %v357_v43  ;;  %v359_v56 = vmul.f32 %v636_v2, %v288_v40  ;;  %v429_v60 = vadd.f32 %v638_v53, %v358_v48 }
  0x5c   :  { %v223_v55 = vadd.f32 %v635_v41, %v152_v44  ;;  %617 = vst [vmem:[%s1517_s6 + $0x1b0] sm:$0xff] %v553_v46  ;;  %v555_v59 = vmax.f32 %v491_v47, 0.0  ;;  %v224_v61 = vadd.f32 %v635_v41, %v153_v49  ;;  %v154_v62 = vmul.f32 %v637_v6, %v83_v45 }
  0x5d   :  { %618 = vst [vmem:[%s1517_s6 + $0x1b8] sm:$0xff] %v554_v52  ;;  %v492_v63 = vadd.f32 %v428_v54, %v222_v42  ;;  %v430_v0 = vadd.f32 %v638_v53, %v359_v56  ;;  %v360_v3 = vmul.f32 %v636_v2, %v289_v50  ;;  %v155_v4 = vmul.f32 %v637_v6, %v84_v51 }
  0x5e   :  { %619 = vst [vmem:[%s1517_s6 + $0x1c0] sm:$0xff] %v555_v59  ;;  %v493_v8 = vadd.f32 %v429_v60, %v223_v55  ;;  %v225_v9 = vadd.f32 %v635_v41, %v154_v62  ;;  %v361_v10 = vmul.f32 %v636_v2, %v290_v57  ;;  %v156_v11 = vmul.f32 %v637_v6, %v85_v58 }
  0x5f   :  { %v556_v14 = vmax.f32 %v492_v63, 0.0  ;;  %v494_v15 = vadd.f32 %v430_v0, %v224_v61  ;;  %v431_v16 = vadd.f32 %v638_v53, %v360_v3  ;;  %v226_v17 = vadd.f32 %v635_v41, %v155_v4 }
  0x60   :  { %v557_v18 = vmax.f32 %v493_v8, 0.0  ;;  %v432_v19 = vadd.f32 %v638_v53, %v361_v10  ;;  %v227_v20 = vadd.f32 %v635_v41, %v156_v11  ;;  %v362_v21 = vmul.f32 %v636_v2, %v291_v7 }
  0x61   :  { %620 = vst [vmem:[%s1517_s6 + $0x1c8] sm:$0xff] %v556_v14  ;;  %v558_v22 = vmax.f32 %v494_v15, 0.0  ;;  %v495_v23 = vadd.f32 %v431_v16, %v225_v9  ;;  %v157_v24 = vmul.f32 %v637_v6, %v86_v12  ;;  %v363_v25 = vmul.f32 %v636_v2, %v292_v13 }
  0x62   :  { %621 = vst [vmem:[%s1517_s6 + $0x1d0] sm:$0xff] %v557_v18  ;;  %v496_v26 = vadd.f32 %v432_v19, %v226_v17  ;;  %v433_v27 = vadd.f32 %v638_v53, %v362_v21 }
  0x63   :  { %622 = vst [vmem:[%s1517_s6 + $0x1d8] sm:$0xff] %v558_v22  ;;  %v559_v28 = vmax.f32 %v495_v23, 0.0  ;;  %v228_v29 = vadd.f32 %v635_v41, %v157_v24  ;;  %v434_v30 = vadd.f32 %v638_v53, %v363_v25 }
  0x64   :  { %v560_v31 = vmax.f32 %v496_v26, 0.0  ;;  %v497_v32 = vadd.f32 %v433_v27, %v227_v20 }
  0x65   :  { %623 = vst [vmem:[%s1517_s6 + $0x1e0] sm:$0xff] %v559_v28  ;;  %v498_v33 = vadd.f32 %v434_v30, %v228_v29 }
  0x66   :  { %624 = vst [vmem:[%s1517_s6 + $0x1e8] sm:$0xff] %v560_v31  ;;  %v561_v34 = vmax.f32 %v497_v32, 0.0 }
  0x67   :  { %v562_v5 = vmax.f32 %v498_v33, 0.0 }
  0x68   :  { %625 = vst [vmem:[%s1517_s6 + $0x1f0] sm:$0xff] %v561_v34 }
  0x69   :  { %626 = vst [vmem:[%s1517_s6 + $0x1f8] sm:$0xff] %v562_v5 }

// kernel: block_forward.7
= control target key start
LH: loop header
LB: loop body
LE: loop exit
PB: predicated region body
PF: predicated region fallthrough
CT: control target
= control target key end

     0   :  { %v1485_v40 = vmov 0.0   ;;  %s2037_s1 = inlined_call_operand.vmem [shape: bf16[128,128], index: 1, kind: input, shape index: {}]   ;;  %s2038_s0 = inlined_call_operand.vmem [shape: bf16[512,128], index: 0, kind: input, shape index: {}]   ;;  %s2039_s4 = inlined_call_operand.vmem [shape: f32[512,128], index: 4, kind: output, shape index: {0}]   ;;  %s2040_s2 = inlined_call_operand.vmem [shape: f32[1,128], index: 2, kind: input, shape index: {}]   ;;  %s2041_s3 = inlined_call_operand.vmem [shape: f32[1,128], index: 3, kind: input, shape index: {}]   ;;  %s2042_s5 = inlined_call_operand.vmem [shape: f32[1,128], index: 5, kind: output, shape index: {1}]   ;;  %s2043_s6 = inlined_call_operand.vmem [shape: f32[1,128], index: 6, kind: output, shape index: {2}]  }
   0x1   :  { %v1443_v0 = vld [vmem:[%s2037_s1] sm:$0xff]   ;;  %v1444_v1 = vld [vmem:[%s2037_s1 + $0x8] sm:$0xff]   ;;  %v1445_v2 = vld [vmem:[%s2037_s1 + $0x10] sm:$0xff]   ;;  %27 = vst [vmem:[#allocation3] sm:$0x1] %v1485_v40 }
   0x2   :  { %1346 = vmatprep.subr.bf16.mxu0 %v1443_v0  ;;  %1426 = vmatprep.subr.bf16.mxu1 %v1443_v0  ;;  %v1446_v3 = vld [vmem:[%s2037_s1 + $0x18] sm:$0xff]   ;;  %v1451_v4 = vld [vmem:[%s2038_s0] sm:$0xff]   ;;  %v1448_v6 = vld [vmem:[%s2037_s1 + $0x28] sm:$0xff]   ;;  %28 = vst [vmem:[#allocation4] sm:$0x1] %v1485_v40 }
   0x3   :  { %1347 = vmatpush3.bf16.msra.mxu0 %v1443_v0  ;;  %1434 = vmatpush3.bf16.msra.mxu1 %v1443_v0  ;;  %v1447_v5 = vld [vmem:[%s2037_s1 + $0x20] sm:$0xff]   ;;  %v1449_v7 = vld [vmem:[%s2037_s1 + $0x30] sm:$0xff]   ;;  %v1450_v8 = vld [vmem:[%s2037_s1 + $0x38] sm:$0xff]  }
   0x4   :  { %1348 = vmatprep.subr.bf16.mxu0 %v1444_v1  ;;  %1427 = vmatprep.subr.bf16.mxu1 %v1444_v1  ;;  %v1467_v9 = vld [vmem:[%s2038_s0 + $0x80] sm:$0xff]   ;;  %v1452_v10 = vld [vmem:[%s2038_s0 + $0x8] sm:$0xff]   ;;  %v1453_v11 = vld [vmem:[%s2038_s0 + $0x10] sm:$0xff]  }
   0x5   :  { %1362 = vmatprep.mubr.bf16.mxu0 %v1451_v4  ;;  %1394 = vmatprep.mubr.bf16.mxu1 %v1467_v9  ;;  %v1468_v12 = vld [vmem:[%s2038_s0 + $0x88] sm:$0xff]   ;;  %v1469_v13 = vld [vmem:[%s2038_s0 + $0x90] sm:$0xff]   ;;  %v1454_v14 = vld [vmem:[%s2038_s0 + $0x18] sm:$0xff]  }
   0x6   :  { %v1455_v15 = vld [vmem:[%s2038_s0 + $0x20] sm:$0xff]   ;;  %v1470_v16 = vld [vmem:[%s2038_s0 + $0x98] sm:$0xff]   ;;  %v1456_v18 = vld [vmem:[%s2038_s0 + $0x28] sm:$0xff]  }
   0x7   :  { %1349 = vmatpush3.bf16.msra.mxu0 %v1444_v1  ;;  %1435 = vmatpush3.bf16.msra.mxu1 %v1444_v1  ;;  %v1471_v17 = vld [vmem:[%s2038_s0 + $0xa0] sm:$0xff]   ;;  %v1472_v19 = vld [vmem:[%s2038_s0 + $0xa8] sm:$0xff]   ;;  %v1457_v20 = vld [vmem:[%s2038_s0 + $0x30] sm:$0xff]  }
   0x8   :  { %1350 = vmatprep.subr.bf16.mxu0 %v1445_v2  ;;  %1428 = vmatprep.subr.bf16.mxu1 %v1445_v2  ;;  %v1473_v21 = vld [vmem:[%s2038_s0 + $0xb0] sm:$0xff]   ;;  %v1458_v22 = vld [vmem:[%s2038_s0 + $0x38] sm:$0xff]   ;;  %v1459_v24 = vld [vmem:[%s2038_s0 + $0x40] sm:$0xff]  }
   0x9   :  { %v1474_v23 = vld [vmem:[%s2038_s0 + $0xb8] sm:$0xff]   ;;  %v1475_v25 = vld [vmem:[%s2038_s0 + $0xc0] sm:$0xff]   ;;  %v1460_v26 = vld [vmem:[%s2038_s0 + $0x48] sm:$0xff]  }
   0xa   :  { %v1476_v27 = vld [vmem:[%s2038_s0 + $0xc8] sm:$0xff]   ;;  %v1461_v28 = vld [vmem:[%s2038_s0 + $0x50] sm:$0xff]   ;;  %v1462_v30 = vld [vmem:[%s2038_s0 + $0x58] sm:$0xff]  }
   0xb   :  { %1351 = vmatpush3.bf16.msra.mxu0 %v1445_v2  ;;  %1436 = vmatpush3.bf16.msra.mxu1 %v1445_v2  ;;  %v1477_v29 = vld [vmem:[%s2038_s0 + $0xd0] sm:$0xff]   ;;  %v1478_v31 = vld [vmem:[%s2038_s0 + $0xd8] sm:$0xff]   ;;  %v1463_v32 = vld [vmem:[%s2038_s0 + $0x60] sm:$0xff]  }
   0xc   :  { %1352 = vmatprep.subr.bf16.mxu0 %v1446_v3  ;;  %1429 = vmatprep.subr.bf16.mxu1 %v1446_v3  ;;  %v1479_v33 = vld [vmem:[%s2038_s0 + $0xe0] sm:$0xff]   ;;  %v1464_v34 = vld [vmem:[%s2038_s0 + $0x68] sm:$0xff]   ;;  %v1465_v36 = vld [vmem:[%s2038_s0 + $0x70] sm:$0xff]  }
   0xd   :  { %v1480_v35 = vld [vmem:[%s2038_s0 + $0xe8] sm:$0xff]   ;;  %v1481_v37 = vld [vmem:[%s2038_s0 + $0xf0] sm:$0xff]   ;;  %v1466_v38 = vld [vmem:[%s2038_s0 + $0x78] sm:$0xff]  }
   0xe   :  { %v1482_v39 = vld [vmem:[%s2038_s0 + $0xf8] sm:$0xff]  }
   0xf   :  { %1353 = vmatpush3.bf16.msra.mxu0 %v1446_v3  ;;  %1437 = vmatpush3.bf16.msra.mxu1 %v1446_v3 }
  0x10   :  { %1354 = vmatprep.subr.bf16.mxu0 %v1447_v5  ;;  %1430 = vmatprep.subr.bf16.mxu1 %v1447_v5 }
  0x13   :  { %1355 = vmatpush3.bf16.msra.mxu0 %v1447_v5  ;;  %1438 = vmatpush3.bf16.msra.mxu1 %v1447_v5 }
  0x14   :  { %1356 = vmatprep.subr.bf16.mxu0 %v1448_v6  ;;  %1431 = vmatprep.subr.bf16.mxu1 %v1448_v6 }
  0x17   :  { %1357 = vmatpush3.bf16.msra.mxu0 %v1448_v6  ;;  %1439 = vmatpush3.bf16.msra.mxu1 %v1448_v6 }
  0x18   :  { %1358 = vmatprep.subr.bf16.mxu0 %v1449_v7  ;;  %1432 = vmatprep.subr.bf16.mxu1 %v1449_v7 }
  0x1b   :  { %1359 = vmatpush3.bf16.msra.mxu0 %v1449_v7  ;;  %1440 = vmatpush3.bf16.msra.mxu1 %v1449_v7 }
  0x1c   :  { %1360 = vmatprep.subr.bf16.mxu0 %v1450_v8  ;;  %1433 = vmatprep.subr.bf16.mxu1 %v1450_v8 }
  0x1f   :  { %1361 = vmatpush3.bf16.msra.mxu0 %v1450_v8  ;;  %1441 = vmatpush3.bf16.msra.mxu1 %v1450_v8 }
  0x22   :  { %1363 = vmatmul.mubr.bf16.vlgmr.msra.gmra.mrb[0].mxu0 %v1452_v10  ;;  %1395 = vmatmul.mubr.bf16.vlgmr.msra.gmra.mrb[0].mxu1 %v1468_v12 }
  0x23   :  { %1366 = vmatprep.mubr.bf16.mxu0 %v1453_v11  ;;  %1398 = vmatprep.mubr.bf16.mxu1 %v1469_v13 }
  0x2a   :  { %1367 = vmatmul.mubr.bf16.gmra.mrb[4].mxu0 %v1454_v14  ;;  %1399 = vmatmul.mubr.bf16.gmra.mrb[4].mxu1 %v1470_v16 }
  0x2b   :  { %1370 = vmatprep.mubr.bf16.mxu0 %v1455_v15  ;;  %1402 = vmatprep.mubr.bf16.mxu1 %v1471_v17 }
  0x32   :  { %1371 = vmatmul.mubr.bf16.gmra.mrb[8].mxu0 %v1456_v18  ;;  %1403 = vmatmul.mubr.bf16.gmra.mrb[8].mxu1 %v1472_v19 }
  0x33   :  { %1374 = vmatprep.mubr.bf16.mxu0 %v1457_v20  ;;  %1406 = vmatprep.mubr.bf16.mxu1 %v1473_v21 }
  0x3a   :  { %1375 = vmatmul.mubr.bf16.gmra.mrb[12].mxu0 %v1458_v22  ;;  %1407 = vmatmul.mubr.bf16.gmra.mrb[12].mxu1 %v1474_v23 }
  0x3b   :  { %1378 = vmatprep.mubr.bf16.mxu0 %v1459_v24  ;;  %1410 = vmatprep.mubr.bf16.mxu1 %v1475_v25 }
  0x42   :  { %1379 = vmatmul.mubr.bf16.gmra.mrb[16].mxu0 %v1460_v26  ;;  %1411 = vmatmul.mubr.bf16.gmra.mrb[16].mxu1 %v1476_v27 }
  0x43   :  { %1382 = vmatprep.mubr.bf16.mxu0 %v1461_v28  ;;  %1414 = vmatprep.mubr.bf16.mxu1 %v1477_v29 }
  0x4a   :  { %1383 = vmatmul.mubr.bf16.gmra.mrb[20].mxu0 %v1462_v30  ;;  %1415 = vmatmul.mubr.bf16.gmra.mrb[20].mxu1 %v1478_v31 }
  0x4b   :  { %1386 = vmatprep.mubr.bf16.mxu0 %v1463_v32  ;;  %1418 = vmatprep.mubr.bf16.mxu1 %v1479_v33 }
  0x52   :  { %1387 = vmatmul.mubr.bf16.gmra.mrb[24].mxu0 %v1464_v34  ;;  %1419 = vmatmul.mubr.bf16.gmra.mrb[24].mxu1 %v1480_v35 }
  0x53   :  { %1390 = vmatprep.mubr.bf16.mxu0 %v1465_v36  ;;  %1422 = vmatprep.mubr.bf16.mxu1 %v1481_v37 }
  0x5a   :  { %1391 = vmatmul.mubr.bf16.gmra.mrb[28].mxu0 %v1466_v38  ;;  %1423 = vmatmul.mubr.bf16.gmra.mrb[28].mxu1 %v1482_v39 }
  0xf5   :  { %v1364_v41 = vpop.f32.mrb[0].mxu0  ;;  %v1641_v42 = vpop.f32.mrb[0].mxu1 }
  0xf6   :  { %966 = vst [vmem:[%s2039_s4 + $0x10] sm:$0xff] %v1364_v41  ;;  %v514_v43 = vpop.f32.mrb[1].mxu0  ;;  %998 = vst [vmem:[%s2039_s4 + $0x110] sm:$0xff] %v1641_v42  ;;  %v1650_v44 = vpop.f32.mrb[1].mxu1  ;;  %v1103_v52 = vmul.f32 %v1364_v41, %v1364_v41 }
  0xf7   :  { %964 = vst [vmem:[%s2039_s4] sm:$0xff] %v514_v43  ;;  %v1365_v45 = vpop.f32.mrb[2].mxu0  ;;  %996 = vst [vmem:[%s2039_s4 + $0x100] sm:$0xff] %v1650_v44  ;;  %v1659_v46 = vpop.f32.mrb[2].mxu1  ;;  %v1101_v49 = vmul.f32 %v514_v43, %v514_v43 }
  0xf8   :  { %967 = vst [vmem:[%s2039_s4 + $0x18] sm:$0xff] %v1365_v45  ;;  %v517_v47 = vpop.f32.mrb[3].mxu0  ;;  %999 = vst [vmem:[%s2039_s4 + $0x118] sm:$0xff] %v1659_v46  ;;  %v1668_v48 = vpop.f32.mrb[3].mxu1  ;;  %v1104_v55 = vmul.f32 %v1365_v45, %v1365_v45 }
  0xf9   :  { %965 = vst [vmem:[%s2039_s4 + $0x8] sm:$0xff] %v517_v47  ;;  %v1029_v50 = vadd.f32 %v517_v47, %v514_v43  ;;  %v1102_v51 = vmul.f32 %v517_v47, %v517_v47  ;;  %997 = vst [vmem:[%s2039_s4 + $0x108] sm:$0xff] %v1668_v48 }
  0xfb   :  { %v1030_v53 = vadd.f32 %v1364_v41, %v1029_v50  ;;  %v1165_v54 = vadd.f32 %v1102_v51, %v1101_v49 }
  0xfd   :  { %v1166_v56 = vadd.f32 %v1165_v54, %v1103_v52  ;;  %v1368_v57 = vpop.f32.mrb[4].mxu0  ;;  %v1031_v58 = vadd.f32 %v1365_v45, %v1030_v53  ;;  %v1677_v59 = vpop.f32.mrb[4].mxu1 }
  0xfe   :  { %970 = vst [vmem:[%s2039_s4 + $0x30] sm:$0xff] %v1368_v57  ;;  %v530_v60 = vpop.f32.mrb[5].mxu0  ;;  %1002 = vst [vmem:[%s2039_s4 + $0x130] sm:$0xff] %v1677_v59  ;;  %v1686_v61 = vpop.f32.mrb[5].mxu1  ;;  %v1107_v8 = vmul.f32 %v1368_v57, %v1368_v57 }
  0xff   :  { %968 = vst [vmem:[%s2039_s4 + $0x20] sm:$0xff] %v530_v60  ;;  %v1032_v62 = vadd.f32 %v1031_v58, %v530_v60  ;;  %v1105_v63 = vmul.f32 %v530_v60, %v530_v60  ;;  %v1167_v0 = vadd.f32 %v1166_v56, %v1104_v55  ;;  %v1369_v1 = vpop.f32.mrb[6].mxu0  ;;  %1000 = vst [vmem:[%s2039_s4 + $0x120] sm:$0xff] %v1686_v61  ;;  %v1695_v2 = vpop.f32.mrb[6].mxu1 }
 0x100   :  { %971 = vst [vmem:[%s2039_s4 + $0x38] sm:$0xff] %v1369_v1  ;;  %v533_v3 = vpop.f32.mrb[7].mxu0  ;;  %1003 = vst [vmem:[%s2039_s4 + $0x138] sm:$0xff] %v1695_v2  ;;  %v1704_v4 = vpop.f32.mrb[7].mxu1  ;;  %v1108_v11 = vmul.f32 %v1369_v1, %v1369_v1 }
 0x101   :  { %v1168_v5 = vadd.f32 %v1167_v0, %v1105_v63  ;;  %969 = vst [vmem:[%s2039_s4 + $0x28] sm:$0xff] %v533_v3  ;;  %v1033_v6 = vadd.f32 %v1032_v62, %v533_v3  ;;  %v1106_v7 = vmul.f32 %v533_v3, %v533_v3  ;;  %1001 = vst [vmem:[%s2039_s4 + $0x128] sm:$0xff] %v1704_v4 }
 0x103   :  { %v1034_v9 = vadd.f32 %v1368_v57, %v1033_v6  ;;  %v1169_v10 = vadd.f32 %v1168_v5, %v1106_v7 }
 0x105   :  { %v1170_v12 = vadd.f32 %v1169_v10, %v1107_v8  ;;  %v1372_v13 = vpop.f32.mrb[8].mxu0  ;;  %v1035_v14 = vadd.f32 %v1369_v1, %v1034_v9  ;;  %v1713_v15 = vpop.f32.mrb[8].mxu1 }
 0x106   :  { %974 = vst [vmem:[%s2039_s4 + $0x50] sm:$0xff] %v1372_v13  ;;  %v546_v16 = vpop.f32.mrb[9].mxu0  ;;  %1006 = vst [vmem:[%s2039_s4 + $0x150] sm:$0xff] %v1713_v15  ;;  %v1722_v17 = vpop.f32.mrb[9].mxu1  ;;  %v1111_v28 = vmul.f32 %v1372_v13, %v1372_v13 }
 0x107   :  { %972 = vst [vmem:[%s2039_s4 + $0x40] sm:$0xff] %v546_v16  ;;  %v1036_v18 = vadd.f32 %v1035_v14, %v546_v16  ;;  %v1109_v19 = vmul.f32 %v546_v16, %v546_v16  ;;  %v1171_v20 = vadd.f32 %v1170_v12, %v1108_v11  ;;  %v1373_v21 = vpop.f32.mrb[10].mxu0  ;;  %1004 = vst [vmem:[%s2039_s4 + $0x140] sm:$0xff] %v1722_v17  ;;  %v1731_v22 = vpop.f32.mrb[10].mxu1 }
 0x108   :  { %975 = vst [vmem:[%s2039_s4 + $0x58] sm:$0xff] %v1373_v21  ;;  %v549_v23 = vpop.f32.mrb[11].mxu0  ;;  %1007 = vst [vmem:[%s2039_s4 + $0x158] sm:$0xff] %v1731_v22  ;;  %v1740_v24 = vpop.f32.mrb[11].mxu1  ;;  %v1112_v31 = vmul.f32 %v1373_v21, %v1373_v21 }
 0x109   :  { %v1172_v25 = vadd.f32 %v1171_v20, %v1109_v19  ;;  %973 = vst [vmem:[%s2039_s4 + $0x48] sm:$0xff] %v549_v23  ;;  %v1037_v26 = vadd.f32 %v1036_v18, %v549_v23  ;;  %v1110_v27 = vmul.f32 %v549_v23, %v549_v23  ;;  %1005 = vst [vmem:[%s2039_s4 + $0x148] sm:$0xff] %v1740_v24 }
 0x10b   :  { %v1038_v29 = vadd.f32 %v1372_v13, %v1037_v26  ;;  %v1173_v30 = vadd.f32 %v1172_v25, %v1110_v27 }
 0x10d   :  { %v1174_v32 = vadd.f32 %v1173_v30, %v1111_v28  ;;  %v1376_v33 = vpop.f32.mrb[12].mxu0  ;;  %v1039_v34 = vadd.f32 %v1373_v21, %v1038_v29  ;;  %v1749_v35 = vpop.f32.mrb[12].mxu1 }
 0x10e   :  { %978 = vst [vmem:[%s2039_s4 + $0x70] sm:$0xff] %v1376_v33  ;;  %v562_v36 = vpop.f32.mrb[13].mxu0  ;;  %1010 = vst [vmem:[%s2039_s4 + $0x170] sm:$0xff] %v1749_v35  ;;  %v1758_v37 = vpop.f32.mrb[13].mxu1  ;;  %v1115_v52 = vmul.f32 %v1376_v33, %v1376_v33 }
 0x10f   :  { %976 = vst [vmem:[%s2039_s4 + $0x60] sm:$0xff] %v562_v36  ;;  %v1040_v38 = vadd.f32 %v1039_v34, %v562_v36  ;;  %v1113_v39 = vmul.f32 %v562_v36, %v562_v36  ;;  %v1175_v40 = vadd.f32 %v1174_v32, %v1112_v31  ;;  %v1377_v41 = vpop.f32.mrb[14].mxu0  ;;  %1008 = vst [vmem:[%s2039_s4 + $0x160] sm:$0xff] %v1758_v37  ;;  %v1767_v43 = vpop.f32.mrb[14].mxu1 }
 0x110   :  { %979 = vst [vmem:[%s2039_s4 + $0x78] sm:$0xff] %v1377_v41  ;;  %v565_v45 = vpop.f32.mrb[15].mxu0  ;;  %1011 = vst [vmem:[%s2039_s4 + $0x178] sm:$0xff] %v1767_v43  ;;  %v1776_v47 = vpop.f32.mrb[15].mxu1  ;;  %v1116_v55 = vmul.f32 %v1377_v41, %v1377_v41 }
 0x111   :  { %v1176_v49 = vadd.f32 %v1175_v40, %v1113_v39  ;;  %977 = vst [vmem:[%s2039_s4 + $0x68] sm:$0xff] %v565_v45  ;;  %v1041_v50 = vadd.f32 %v1040_v38, %v565_v45  ;;  %v1114_v51 = vmul.f32 %v565_v45, %v565_v45  ;;  %1009 = vst [vmem:[%s2039_s4 + $0x168] sm:$0xff] %v1776_v47 }
 0x113   :  { %v1042_v53 = vadd.f32 %v1376_v33, %v1041_v50  ;;  %v1177_v54 = vadd.f32 %v1176_v49, %v1114_v51 }
 0x115   :  { %v1178_v56 = vadd.f32 %v1177_v54, %v1115_v52  ;;  %v1380_v57 = vpop.f32.mrb[16].mxu0  ;;  %v1043_v58 = vadd.f32 %v1377_v41, %v1042_v53  ;;  %v1785_v60 = vpop.f32.mrb[16].mxu1 }
 0x116   :  { %982 = vst [vmem:[%s2039_s4 + $0x90] sm:$0xff] %v1380_v57  ;;  %v578_v62 = vpop.f32.mrb[17].mxu0  ;;  %1014 = vst [vmem:[%s2039_s4 + $0x190] sm:$0xff] %v1785_v60  ;;  %v1794_v63 = vpop.f32.mrb[17].mxu1  ;;  %v1119_v12 = vmul.f32 %v1380_v57, %v1380_v57 }
 0x117   :  { %980 = vst [vmem:[%s2039_s4 + $0x80] sm:$0xff] %v578_v62  ;;  %v1044_v0 = vadd.f32 %v1043_v58, %v578_v62  ;;  %v1117_v1 = vmul.f32 %v578_v62, %v578_v62  ;;  %v1179_v3 = vadd.f32 %v1178_v56, %v1116_v55  ;;  %v1381_v5 = vpop.f32.mrb[18].mxu0  ;;  %1012 = vst [vmem:[%s2039_s4 + $0x180] sm:$0xff] %v1794_v63  ;;  %v1803_v6 = vpop.f32.mrb[18].mxu1 }
 0x118   :  { %983 = vst [vmem:[%s2039_s4 + $0x98] sm:$0xff] %v1381_v5  ;;  %v581_v7 = vpop.f32.mrb[19].mxu0  ;;  %1015 = vst [vmem:[%s2039_s4 + $0x198] sm:$0xff] %v1803_v6  ;;  %v1812_v8 = vpop.f32.mrb[19].mxu1  ;;  %v1120_v16 = vmul.f32 %v1381_v5, %v1381_v5 }
 0x119   :  { %v1180_v9 = vadd.f32 %v1179_v3, %v1117_v1  ;;  %981 = vst [vmem:[%s2039_s4 + $0x88] sm:$0xff] %v581_v7  ;;  %v1045_v10 = vadd.f32 %v1044_v0, %v581_v7  ;;  %v1118_v11 = vmul.f32 %v581_v7, %v581_v7  ;;  %1013 = vst [vmem:[%s2039_s4 + $0x188] sm:$0xff] %v1812_v8 }
 0x11b   :  { %v1046_v13 = vadd.f32 %v1380_v57, %v1045_v10  ;;  %v1181_v14 = vadd.f32 %v1180_v9, %v1118_v11 }
 0x11d   :  { %v1182_v18 = vadd.f32 %v1181_v14, %v1119_v12  ;;  %v1384_v19 = vpop.f32.mrb[20].mxu0  ;;  %v1047_v20 = vadd.f32 %v1381_v5, %v1046_v13  ;;  %v1821_v21 = vpop.f32.mrb[20].mxu1 }
 0x11e   :  { %986 = vst [vmem:[%s2039_s4 + $0xb0] sm:$0xff] %v1384_v19  ;;  %v594_v23 = vpop.f32.mrb[21].mxu0  ;;  %1018 = vst [vmem:[%s2039_s4 + $0x1b0] sm:$0xff] %v1821_v21  ;;  %v1830_v25 = vpop.f32.mrb[21].mxu1  ;;  %v1123_v38 = vmul.f32 %v1384_v19, %v1384_v19 }
 0x11f   :  { %984 = vst [vmem:[%s2039_s4 + $0xa0] sm:$0xff] %v594_v23  ;;  %v1048_v26 = vadd.f32 %v1047_v20, %v594_v23  ;;  %v1121_v27 = vmul.f32 %v594_v23, %v594_v23  ;;  %v1183_v28 = vadd.f32 %v1182_v18, %v1120_v16  ;;  %v1385_v29 = vpop.f32.mrb[22].mxu0  ;;  %1016 = vst [vmem:[%s2039_s4 + $0x1a0] sm:$0xff] %v1830_v25  ;;  %v1839_v30 = vpop.f32.mrb[22].mxu1 }
 0x120   :  { %987 = vst [vmem:[%s2039_s4 + $0xb8] sm:$0xff] %v1385_v29  ;;  %v597_v31 = vpop.f32.mrb[23].mxu0  ;;  %1019 = vst [vmem:[%s2039_s4 + $0x1b8] sm:$0xff] %v1839_v30  ;;  %v1848_v32 = vpop.f32.mrb[23].mxu1  ;;  %v1124_v41 = vmul.f32 %v1385_v29, %v1385_v29 }
 0x121   :  { %v1184_v33 = vadd.f32 %v1183_v28, %v1121_v27  ;;  %985 = vst [vmem:[%s2039_s4 + $0xa8] sm:$0xff] %v597_v31  ;;  %v1049_v34 = vadd.f32 %v1048_v26, %v597_v31  ;;  %v1122_v36 = vmul.f32 %v597_v31, %v597_v31  ;;  %1017 = vst [vmem:[%s2039_s4 + $0x1a8] sm:$0xff] %v1848_v32 }
 0x123   :  { %v1050_v39 = vadd.f32 %v1384_v19, %v1049_v34  ;;  %v1185_v40 = vadd.f32 %v1184_v33, %v1122_v36 }
 0x125   :  { %v1186_v45 = vadd.f32 %v1185_v40, %v1123_v38  ;;  %v1388_v49 = vpop.f32.mrb[24].mxu0  ;;  %v1051_v50 = vadd.f32 %v1385_v29, %v1050_v39  ;;  %v1857_v51 = vpop.f32.mrb[24].mxu1 }
 0x126   :  { %990 = vst [vmem:[%s2039_s4 + $0xd0] sm:$0xff] %v1388_v49  ;;  %v610_v52 = vpop.f32.mrb[25].mxu0  ;;  %1022 = vst [vmem:[%s2039_s4 + $0x1d0] sm:$0xff] %v1857_v51  ;;  %v1866_v53 = vpop.f32.mrb[25].mxu1  ;;  %v1127_v7 = vmul.f32 %v1388_v49, %v1388_v49 }
 0x127   :  { %988 = vst [vmem:[%s2039_s4 + $0xc0] sm:$0xff] %v610_v52  ;;  %v1052_v54 = vadd.f32 %v1051_v50, %v610_v52  ;;  %v1125_v55 = vmul.f32 %v610_v52, %v610_v52  ;;  %v1187_v56 = vadd.f32 %v1186_v45, %v1124_v41  ;;  %v1389_v57 = vpop.f32.mrb[26].mxu0  ;;  %1020 = vst [vmem:[%s2039_s4 + $0x1c0] sm:$0xff] %v1866_v53  ;;  %v1875_v58 = vpop.f32.mrb[26].mxu1 }
 0x128   :  { %991 = vst [vmem:[%s2039_s4 + $0xd8] sm:$0xff] %v1389_v57  ;;  %v613_v62 = vpop.f32.mrb[27].mxu0  ;;  %1023 = vst [vmem:[%s2039_s4 + $0x1d8] sm:$0xff] %v1875_v58  ;;  %v1884_v0 = vpop.f32.mrb[27].mxu1  ;;  %v1128_v11 = vmul.f32 %v1389_v57, %v1389_v57  ;;  %v1133_v50 = vmul.f32 %v1650_v44, %v1650_v44 }
 0x129   :  { %v1188_v1 = vadd.f32 %v1187_v56, %v1125_v55  ;;  %989 = vst [vmem:[%s2039_s4 + $0xc8] sm:$0xff] %v613_v62  ;;  %v1053_v3 = vadd.f32 %v1052_v54, %v613_v62  ;;  %v1126_v5 = vmul.f32 %v613_v62, %v613_v62  ;;  %1021 = vst [vmem:[%s2039_s4 + $0x1c8] sm:$0xff] %v1884_v0 }
 0x12a   :  { %v1135_v62 = vmul.f32 %v1641_v42, %v1641_v42 }
 0x12b   :  { %v1054_v9 = vadd.f32 %v1388_v49, %v1053_v3  ;;  %v1189_v10 = vadd.f32 %v1188_v1, %v1126_v5  ;;  %v1136_v5 = vmul.f32 %v1659_v46, %v1659_v46 }
 0x12d   :  { %v1190_v12 = vadd.f32 %v1189_v10, %v1127_v7  ;;  %v1392_v13 = vpop.f32.mrb[28].mxu0  ;;  %v1055_v14 = vadd.f32 %v1389_v57, %v1054_v9  ;;  %v1893_v16 = vpop.f32.mrb[28].mxu1  ;;  %v1134_v57 = vmul.f32 %v1668_v48, %v1668_v48 }
 0x12e   :  { %994 = vst [vmem:[%s2039_s4 + $0xf0] sm:$0xff] %v1392_v13  ;;  %v626_v18 = vpop.f32.mrb[29].mxu0  ;;  %1026 = vst [vmem:[%s2039_s4 + $0x1f0] sm:$0xff] %v1893_v16  ;;  %v1902_v19 = vpop.f32.mrb[29].mxu1  ;;  %v1131_v38 = vmul.f32 %v1392_v13, %v1392_v13 }
 0x12f   :  { %992 = vst [vmem:[%s2039_s4 + $0xe0] sm:$0xff] %v626_v18  ;;  %v1056_v20 = vadd.f32 %v1055_v14, %v626_v18  ;;  %v1129_v23 = vmul.f32 %v626_v18, %v626_v18  ;;  %v1191_v26 = vadd.f32 %v1190_v12, %v1128_v11  ;;  %v1393_v27 = vpop.f32.mrb[30].mxu0  ;;  %1024 = vst [vmem:[%s2039_s4 + $0x1e0] sm:$0xff] %v1902_v19  ;;  %v1911_v28 = vpop.f32.mrb[30].mxu1 }
 0x130   :  { %995 = vst [vmem:[%s2039_s4 + $0xf8] sm:$0xff] %v1393_v27  ;;  %v629_v29 = vpop.f32.mrb[31].mxu0  ;;  %1027 = vst [vmem:[%s2039_s4 + $0x1f8] sm:$0xff] %v1911_v28  ;;  %v1920_v31 = vpop.f32.mrb[31].mxu1  ;;  %v1132_v41 = vmul.f32 %v1393_v27, %v1393_v27 }
 0x131   :  { %v1192_v33 = vadd.f32 %v1191_v26, %v1129_v23  ;;  %993 = vst [vmem:[%s2039_s4 + $0xe8] sm:$0xff] %v629_v29  ;;  %v1057_v34 = vadd.f32 %v1056_v20, %v629_v29  ;;  %v1130_v36 = vmul.f32 %v629_v29, %v629_v29  ;;  %1025 = vst [vmem:[%s2039_s4 + $0x1e8] sm:$0xff] %v1920_v31 }
 0x133   :  { %v1058_v39 = vadd.f32 %v1392_v13, %v1057_v34  ;;  %v1193_v40 = vadd.f32 %v1192_v33, %v1130_v36  ;;  %v1138_v13 = vmul.f32 %v1704_v4, %v1704_v4  ;;  %v1142_v33 = vmul.f32 %v1740_v24, %v1740_v24 }
 0x135   :  { %v1194_v45 = vadd.f32 %v1193_v40, %v1131_v38  ;;  %v1059_v49 = vadd.f32 %v1393_v27, %v1058_v39 }
 0x137   :  { %v1060_v52 = vadd.f32 %v1059_v49, %v1650_v44  ;;  %v1195_v54 = vadd.f32 %v1194_v45, %v1132_v41  ;;  %v1137_v44 = vmul.f32 %v1686_v61, %v1686_v61  ;;  %v1146_v49 = vmul.f32 %v1776_v47, %v1776_v47 }
 0x139   :  { %v1196_v55 = vadd.f32 %v1195_v54, %v1133_v50  ;;  %v1061_v56 = vadd.f32 %v1060_v52, %v1668_v48 }
 0x13b   :  { %v1062_v1 = vadd.f32 %v1641_v42, %v1061_v56  ;;  %v1197_v3 = vadd.f32 %v1196_v55, %v1134_v57  ;;  %v1139_v42 = vmul.f32 %v1677_v59, %v1677_v59 }
 0x13d   :  { %v1198_v7 = vadd.f32 %v1197_v3, %v1135_v62  ;;  %v1063_v9 = vadd.f32 %v1659_v46, %v1062_v1  ;;  %v1140_v46 = vmul.f32 %v1695_v2, %v1695_v2  ;;  %v1150_v1 = vmul.f32 %v1812_v8, %v1812_v8 }
 0x13f   :  { %v1064_v10 = vadd.f32 %v1063_v9, %v1686_v61  ;;  %v1199_v11 = vadd.f32 %v1198_v7, %v1136_v5  ;;  %v1141_v61 = vmul.f32 %v1722_v17, %v1722_v17 }
 0x141   :  { %v1200_v12 = vadd.f32 %v1199_v11, %v1137_v44  ;;  %v1065_v48 = vadd.f32 %v1064_v10, %v1704_v4 }
 0x143   :  { %v1066_v14 = vadd.f32 %v1677_v59, %v1065_v48  ;;  %v1201_v18 = vadd.f32 %v1200_v12, %v1138_v13  ;;  %v1143_v59 = vmul.f32 %v1713_v15, %v1713_v15  ;;  %v1154_v12 = vmul.f32 %v1848_v32, %v1848_v32 }
 0x145   :  { %v1202_v20 = vadd.f32 %v1201_v18, %v1139_v42  ;;  %v1067_v23 = vadd.f32 %v1695_v2, %v1066_v14  ;;  %v1144_v2 = vmul.f32 %v1731_v22, %v1731_v22 }
 0x147   :  { %v1068_v26 = vadd.f32 %v1067_v23, %v1722_v17  ;;  %v1203_v27 = vadd.f32 %v1202_v20, %v1140_v46  ;;  %v1145_v17 = vmul.f32 %v1758_v37, %v1758_v37  ;;  %v1158_v23 = vmul.f32 %v1884_v0, %v1884_v0 }
 0x149   :  { %v1204_v29 = vadd.f32 %v1203_v27, %v1141_v61  ;;  %v1069_v4 = vadd.f32 %v1068_v26, %v1740_v24 }
 0x14b   :  { %v1070_v34 = vadd.f32 %v1713_v15, %v1069_v4  ;;  %v1205_v36 = vadd.f32 %v1204_v29, %v1142_v33  ;;  %v1147_v15 = vmul.f32 %v1749_v35, %v1749_v35 }
 0x14d   :  { %v1206_v38 = vadd.f32 %v1205_v36, %v1143_v59  ;;  %v1071_v39 = vadd.f32 %v1731_v22, %v1070_v34  ;;  %v1148_v22 = vmul.f32 %v1767_v43, %v1767_v43  ;;  %v1162_v34 = vmul.f32 %v1920_v31, %v1920_v31 }
 0x14f   :  { %v1072_v40 = vadd.f32 %v1071_v39, %v1758_v37  ;;  %v1207_v41 = vadd.f32 %v1206_v38, %v1144_v2  ;;  %v1149_v37 = vmul.f32 %v1794_v63, %v1794_v63 }
 0x151   :  { %v1208_v45 = vadd.f32 %v1207_v41, %v1145_v17  ;;  %v1073_v24 = vadd.f32 %v1072_v40, %v1776_v47 }
 0x153   :  { %v1074_v50 = vadd.f32 %v1749_v35, %v1073_v24  ;;  %v1209_v52 = vadd.f32 %v1208_v45, %v1146_v49  ;;  %v1151_v35 = vmul.f32 %v1785_v60, %v1785_v60 }
 0x155   :  { %v1210_v54 = vadd.f32 %v1209_v52, %v1147_v15  ;;  %v1075_v55 = vadd.f32 %v1767_v43, %v1074_v50  ;;  %v1152_v43 = vmul.f32 %v1803_v6, %v1803_v6  ;;  %v1028_v52 = vld [vmem:[#allocation3] sm:$0x1] }
 0x157   :  { %v1076_v56 = vadd.f32 %v1075_v55, %v1794_v63  ;;  %v1211_v57 = vadd.f32 %v1210_v54, %v1148_v22  ;;  %v1153_v63 = vmul.f32 %v1830_v25, %v1830_v25  ;;  %v1100_v54 = vld [vmem:[#allocation4] sm:$0x1] }
 0x159   :  { %v1212_v62 = vadd.f32 %v1211_v57, %v1149_v37  ;;  %v1077_v47 = vadd.f32 %v1076_v56, %v1812_v8 }
 0x15b   :  { %v1078_v3 = vadd.f32 %v1785_v60, %v1077_v47  ;;  %v1213_v5 = vadd.f32 %v1212_v62, %v1150_v1  ;;  %v1155_v60 = vmul.f32 %v1821_v21, %v1821_v21 }
 0x15d   :  { %v1214_v7 = vadd.f32 %v1213_v5, %v1151_v35  ;;  %v1079_v9 = vadd.f32 %v1803_v6, %v1078_v3  ;;  %v1156_v6 = vmul.f32 %v1839_v30, %v1839_v30 }
 0x15f   :  { %v1080_v44 = vadd.f32 %v1079_v9, %v1830_v25  ;;  %v1215_v10 = vadd.f32 %v1214_v7, %v1152_v43  ;;  %v1157_v25 = vmul.f32 %v1866_v53, %v1866_v53  ;;  %v1245_v43 = vld [vmem:[%s2040_s2] sm:$0x1] }
 0x161   :  { %v1216_v11 = vadd.f32 %v1215_v10, %v1153_v63  ;;  %v1081_v8 = vadd.f32 %v1080_v44, %v1848_v32  ;;  %v1250_v63 = vld [vmem:[%s2041_s3] sm:$0x1] }
 0x163   :  { %v1082_v48 = vadd.f32 %v1821_v21, %v1081_v8  ;;  %v1217_v13 = vadd.f32 %v1216_v11, %v1154_v12  ;;  %v1159_v21 = vmul.f32 %v1857_v51, %v1857_v51 }
 0x165   :  { %v1218_v42 = vadd.f32 %v1217_v13, %v1155_v60  ;;  %v1083_v14 = vadd.f32 %v1839_v30, %v1082_v48  ;;  %v1160_v30 = vmul.f32 %v1875_v58, %v1875_v58 }
 0x167   :  { %v1084_v18 = vadd.f32 %v1083_v14, %v1866_v53  ;;  %v1219_v46 = vadd.f32 %v1218_v42, %v1156_v6  ;;  %v1161_v53 = vmul.f32 %v1902_v19, %v1902_v19 }
 0x169   :  { %v1220_v20 = vadd.f32 %v1219_v46, %v1157_v25  ;;  %v1085_v32 = vadd.f32 %v1084_v18, %v1884_v0 }
 0x16b   :  { %v1086_v61 = vadd.f32 %v1857_v51, %v1085_v32  ;;  %v1221_v26 = vadd.f32 %v1220_v20, %v1158_v23  ;;  %v1163_v51 = vmul.f32 %v1893_v16, %v1893_v16 }
 0x16d   :  { %v1222_v27 = vadd.f32 %v1221_v26, %v1159_v21  ;;  %v1087_v29 = vadd.f32 %v1875_v58, %v1086_v61  ;;  %v1164_v58 = vmul.f32 %v1911_v28, %v1911_v28 }
 0x16f   :  { %v1088_v4 = vadd.f32 %v1087_v29, %v1902_v19  ;;  %v1223_v33 = vadd.f32 %v1222_v27, %v1160_v30 }
 0x171   :  { %v1224_v59 = vadd.f32 %v1223_v33, %v1161_v53  ;;  %v1089_v0 = vadd.f32 %v1088_v4, %v1920_v31 }
 0x173   :  { %v1090_v36 = vadd.f32 %v1893_v16, %v1089_v0  ;;  %v1225_v2 = vadd.f32 %v1224_v59, %v1162_v34 }
 0x175   :  { %v1091_v38 = vadd.f32 %v1911_v28, %v1090_v36  ;;  %v1226_v39 = vadd.f32 %v1225_v2, %v1163_v51 }
 0x177   :  { %v1092_v19 = vrot.slane %v1091_v38, 4  ;;  %v1227_v17 = vadd.f32 %v1226_v39, %v1164_v58 }
 0x179   :  { %v1093_v40 = vadd.f32 %v1092_v19, %v1091_v38  ;;  %v1228_v41 = vrot.slane %v1227_v17, 4 }
 0x17b   :  { %v1094_v45 = vrot.slane %v1093_v40, 2  ;;  %v1229_v24 = vadd.f32 %v1228_v41, %v1227_v17 }
 0x17d   :  { %v1095_v49 = vadd.f32 %v1094_v45, %v1093_v40  ;;  %v1230_v31 = vrot.slane %v1229_v24, 2 }
 0x17f   :  { %v1096_v15 = vrot.slane %v1095_v49, 1  ;;  %v1231_v50 = vadd.f32 %v1230_v31, %v1229_v24 }
 0x181   :  { %v1097_v22 = vadd.f32 %v1096_v15, %v1095_v49  ;;  %v1232_v16 = vrot.slane %v1231_v50, 1 }
 0x183   :  { %v1098_v55 = vadd.f32 %v1097_v22, %v1028_v52  ;;  %v1233_v37 = vadd.f32 %v1232_v16, %v1231_v50 }
 0x185   :  { %1099 = vst [vmem:[#allocation3] sm:$0x1] %v1098_v55  ;;  %v1234_v56 = vadd.f32 %v1233_v37, %v1100_v54 }
 0x187   :  { %1235 = vst [vmem:[#allocation4] sm:$0x1] %v1234_v56 }
 0x18c   :  { %v1238_v28 = vld [vmem:[#allocation3] sm:$0x1] }
 0x18d   :  { %v1239_v57 = vmul.f32 0.001953125, %v1238_v28 }
 0x18e   :  { %v1240_v62 = vld [vmem:[#allocation4] sm:$0x1] }
 0x18f   :  { %v1241_v47 = vmul.f32 0.001953125, %v1240_v62  ;;  %v1242_v1 = vmul.f32 %v1239_v57, %v1239_v57 }
 0x191   :  { %v1243_v35 = vsub.f32 %v1241_v47, %v1242_v1 }
 0x193   :  { %v1244_v3 = vmax.f32 %v1243_v35, 0.0 }
 0x195   :  { %v1246_v5 = vadd.f32 1e-05, %v1244_v3 }
 0x197   :  { %1483 = vrsqrt.f32 %v1246_v5 }
 0x1a1   :  { %v1484_v7 = vpop.eup %1483 }
 0x1a2   :  { %v1248_v9 = vmul.f32 %v1484_v7, %v1245_v43 }
 0x1a4   :  { %1249 = vst [vmem:[%s2042_s5] sm:$0x1] %v1248_v9  ;;  %v1251_v44 = vmul.f32 %v1248_v9, %v1239_v57 }
 0x1a6   :  { %v1252_v10 = vsub.f32 %v1250_v63, %v1251_v44 }
 0x1a8   :  { %1253 = vst [vmem:[%s2043_s6] sm:$0x1] %v1252_v10 }

</bundles_post_ra>
